<compile_context>
chip_gen: v7x
topology: tpu7x:2x2x1
jax: 0.10.0
libtpu: 0.0.40
codegen_flags: <defaults>
</compile_context>

<pallas_src>
import functools

import jax
import jax.numpy as jnp
from jax.experimental import pallas as pl
from jax.experimental.pallas import tpu as pltpu

NEG_INF = float(jnp.finfo(jnp.float32).min)
LN_EPS = 1e-5
# explicit scoped-VMEM budget: above the 16 MiB (v5e) / 32 MiB (v6e, v7x) defaults,
# below physical VMEM on every generation (128 / 128 / 64 MiB).
_VMEM_LIMIT = 48 * 1024 * 1024


# ------------------------------------------------------------------ helpers

def _tile(dim, target, base):
    """Largest tile <= target that divides `dim` and is a multiple of `base`,
    or the full dim if the dim is small / no such divisor exists."""
    if dim <= target:
        return dim
    t = (target // base) * base
    while t >= base:
        if dim % t == 0:
            return t
        t -= base
    # TODO(synk): pad real (non-power-of-two) shapes instead of silently untiling.
    return dim


def _cparams(*sem, vmem=_VMEM_LIMIT):
    return pltpu.CompilerParams(dimension_semantics=tuple(sem),
                                vmem_limit_bytes=vmem)


def _single_buffer():
    # constant-index blocks: second pipeline buffer is pure VMEM waste
    return dict(pipeline_mode=pl.Buffered(1))


# ------------------------------------------------------------------ linear (projections)

def _linear_kernel(x_ref, w_ref, b_ref, o_ref):
    """y = x @ w + b   (x bf16, w bf16, f32 MXU accumulation)."""
    x = x_ref[...].astype(jnp.bfloat16)          # no-op when already bf16
    y = jnp.dot(x, w_ref[...], preferred_element_type=jnp.float32) + b_ref[...]
    o_ref[...] = y.astype(o_ref.dtype)


def linear(x2d, w, b, *, out_dtype=jnp.bfloat16, tile_m=512, tile_n=1024):
    """x2d: [M, K] bf16   w: [K, N] bf16   b: [N] f32 -> [M, N]."""
    M, K = x2d.shape
    N = w.shape[1]
    tm = _tile(M, tile_m, 8)
    tn = _tile(N, tile_n, 128)
    return pl.pallas_call(
        _linear_kernel,
        out_shape=jax.ShapeDtypeStruct((M, N), out_dtype),
        grid_spec=pl.GridSpec(
            grid=(M // tm, N // tn),
            in_specs=[
                pl.BlockSpec((tm, K), lambda i, j: (i, 0)),
                pl.BlockSpec((K, tn), lambda i, j: (0, j)),
                pl.BlockSpec((1, tn), lambda i, j: (0, j)),
            ],
            out_specs=pl.BlockSpec((tm, tn), lambda i, j: (i, j)),
        ),
        compiler_params=_cparams("parallel", "parallel"),
    )(x2d, w, b[None, :].astype(jnp.float32))


# ------------------------------------------------------------------ attention

def _mha_tile(get_q, get_k, get_v, bias, o_ref, *, n_heads, d_head):
    """Attention for one query tile; each head written straight into o_ref."""
    for h in range(n_heads):
        qh = get_q(h)                                      # [tq, Dh] bf16 (scale folded in W_q)
        kh = get_k(h)                                      # [Sk, Dh] bf16
        s = jax.lax.dot_general(qh, kh, (((1,), (1,)), ((), ())),
                                preferred_element_type=jnp.float32)
        s = s + bias
        s = s - jnp.max(s, axis=-1, keepdims=True)
        p = jnp.exp(s)
        p = p * pl.reciprocal(jnp.sum(p, axis=-1, keepdims=True), approx=True)
        ctx = jnp.dot(p.astype(jnp.bfloat16), get_v(h),
                      preferred_element_type=jnp.float32)
        o_ref[:, pl.ds(h * d_head, d_head)] = ctx.astype(o_ref.dtype)


def _self_attn_kernel(qkv_ref, pb_ref, o_ref, *, n_heads, tq, causal):
    Sk, D3 = qkv_ref.shape
    D = D3 // 3
    Dh = D // n_heads
    q0 = pl.multiple_of(pl.program_id(1) * tq, tq)
    bias = pb_ref[...]                                     # [1, Sk] additive pad bias
    if causal:
        rows = jax.lax.broadcasted_iota(jnp.int32, (tq, Sk), 0) + q0
        cols = jax.lax.broadcasted_iota(jnp.int32, (tq, Sk), 1)
        # == clamp(causal_mask + pad_mask, finfo.min) from the PyTorch forward
        bias = jnp.where(cols > rows, NEG_INF, bias)
    _mha_tile(lambda h: qkv_ref[pl.ds(q0, tq), pl.ds(h * Dh, Dh)],
              lambda h: qkv_ref[:, pl.ds(D + h * Dh, Dh)],
              lambda h: qkv_ref[:, pl.ds(2 * D + h * Dh, Dh)],
              bias, o_ref, n_heads=n_heads, d_head=Dh)


def self_attention(qkv, pad_bias, n_heads, *, causal, tile_q=256):
    """qkv: [B, S, 3D] bf16 (fused projection), pad_bias: [B, 1, S] f32."""
    B, S, D3 = qkv.shape
    D = D3 // 3
    tq = _tile(S, tile_q, 8)
    return pl.pallas_call(
        functools.partial(_self_attn_kernel, n_heads=n_heads, tq=tq, causal=causal),
        out_shape=jax.ShapeDtypeStruct((B, S, D), jnp.bfloat16),
        grid_spec=pl.GridSpec(
            grid=(B, S // tq),
            in_specs=[
                # whole fused QKV per batch stays resident (index constant over qi)
                pl.BlockSpec((None, S, D3), lambda b, qi: (b, 0, 0)),
                pl.BlockSpec((None, 1, S), lambda b, qi: (b, 0, 0)),
            ],
            out_specs=pl.BlockSpec((None, tq, D), lambda b, qi: (b, qi, 0)),
        ),
        compiler_params=_cparams("parallel", "parallel"),
    )(qkv, pad_bias)


def _cross_attn_kernel(q_ref, kv_ref, pb_ref, o_ref, *, n_heads):
    D = q_ref.shape[-1]
    Dh = D // n_heads
    _mha_tile(lambda h: q_ref[:, pl.ds(h * Dh, Dh)],
              lambda h: kv_ref[:, pl.ds(h * Dh, Dh)],
              lambda h: kv_ref[:, pl.ds(D + h * Dh, Dh)],
              pb_ref[...], o_ref, n_heads=n_heads, d_head=Dh)


def cross_attention(q, kv, pad_bias, n_heads, *, tile_q=256):
    """q: [B, Sq, D] bf16, kv: [B, Sk, 2D] bf16, pad_bias: [B, 1, Sk] f32."""
    B, Sq, D = q.shape
    Sk = kv.shape[1]
    tq = _tile(Sq, tile_q, 8)
    return pl.pallas_call(
        functools.partial(_cross_attn_kernel, n_heads=n_heads),
        out_shape=jax.ShapeDtypeStruct((B, Sq, D), jnp.bfloat16),
        grid_spec=pl.GridSpec(
            grid=(B, Sq // tq),
            in_specs=[
                pl.BlockSpec((None, tq, D), lambda b, qi: (b, qi, 0)),
                pl.BlockSpec((None, Sk, 2 * D), lambda b, qi: (b, 0, 0)),
                pl.BlockSpec((None, 1, Sk), lambda b, qi: (b, 0, 0)),
            ],
            out_specs=pl.BlockSpec((None, tq, D), lambda b, qi: (b, qi, 0)),
        ),
        compiler_params=_cparams("parallel", "parallel"),
    )(q, kv, pad_bias)


# ------------------------------------------------------------------ o-proj + residual + LN

def _resid_oproj_ln_kernel(a_ref, x_ref, w_ref, b_ref, g_ref, be_ref, o_ref, *, eps):
    """out = LayerNorm(x + attn_ctx @ W_o + b_o)  (post-LN BART sublayer tail)."""
    y = jnp.dot(a_ref[...], w_ref[...], preferred_element_type=jnp.float32)
    y = y + b_ref[...] + x_ref[...].astype(jnp.float32)
    mu = jnp.mean(y, axis=-1, keepdims=True)
    yc = y - mu
    var = jnp.mean(yc * yc, axis=-1, keepdims=True)
    o_ref[...] = (yc * jax.lax.rsqrt(var + eps) * g_ref[...] + be_ref[...]
                  ).astype(o_ref.dtype)


def resid_oproj_ln(ctx2d, x2d, w, b, gamma, beta, *, tile_m=256):
    M, D = x2d.shape
    tm = _tile(M, tile_m, 8)
    const = _single_buffer()
    return pl.pallas_call(
        functools.partial(_resid_oproj_ln_kernel, eps=LN_EPS),
        out_shape=jax.ShapeDtypeStruct((M, D), jnp.bfloat16),
        grid_spec=pl.GridSpec(
            grid=(M // tm,),
            in_specs=[
                pl.BlockSpec((tm, D), lambda i: (i, 0)),
                pl.BlockSpec((tm, D), lambda i: (i, 0)),
                pl.BlockSpec((D, D), lambda i: (0, 0), **const),
                pl.BlockSpec((1, D), lambda i: (0, 0), **const),
                pl.BlockSpec((1, D), lambda i: (0, 0), **const),
                pl.BlockSpec((1, D), lambda i: (0, 0), **const),
            ],
            out_specs=pl.BlockSpec((tm, D), lambda i: (i, 0)),
        ),
        compiler_params=_cparams("parallel"),
    )(ctx2d, x2d, w, b[None, :], gamma[None, :], beta[None, :])


# ------------------------------------------------------------------ FFN + residual + LN (F tiled)

def _ffn_res_ln_kernel(x_ref, w1_ref, b1_ref, w2_ref, b2_ref, g_ref, be_ref,
                       o_ref, acc_ref, *, eps):
    """out = LayerNorm(x + fc2(GELU(fc1(x)))), F chunked as a reduction axis."""
    f = pl.program_id(1)

    @pl.when(f == 0)
    def _():
        acc_ref[...] = jnp.zeros_like(acc_ref)

    h = jnp.dot(x_ref[...], w1_ref[...],
                preferred_element_type=jnp.float32) + b1_ref[...]
    # TODO(synk): HF BART uses exact (erf) GELU; tanh-approx GELU is used in-kernel.
    h = jax.nn.gelu(h, approximate=True)
    acc_ref[...] += jnp.dot(h.astype(jnp.bfloat16), w2_ref[...],
                            preferred_element_type=jnp.float32)

    @pl.when(f == pl.num_programs(1) - 1)
    def _():
        y = acc_ref[...] + b2_ref[...] + x_ref[...].astype(jnp.float32)
        mu = jnp.mean(y, axis=-1, keepdims=True)
        yc = y - mu
        var = jnp.mean(yc * yc, axis=-1, keepdims=True)
        o_ref[...] = (yc * jax.lax.rsqrt(var + eps) * g_ref[...] + be_ref[...]
                      ).astype(o_ref.dtype)


def ffn_res_ln(x2d, w1, b1, w2, b2, gamma, beta, *, tile_m=256, tile_f=1024):
    M, D = x2d.shape
    F = w1.shape[1]
    tm = _tile(M, tile_m, 8)
    tf = _tile(F, tile_f, 128)
    const = _single_buffer()
    return pl.pallas_call(
        functools.partial(_ffn_res_ln_kernel, eps=LN_EPS),
        out_shape=jax.ShapeDtypeStruct((M, D), jnp.bfloat16),
        grid_spec=pltpu.PrefetchScalarGridSpec(
            num_scalar_prefetch=0,
            grid=(M // tm, F // tf),
            in_specs=[
                pl.BlockSpec((tm, D), lambda i, f: (i, 0)),
                pl.BlockSpec((D, tf), lambda i, f: (0, f)),
                pl.BlockSpec((1, tf), lambda i, f: (0, f)),
                pl.BlockSpec((tf, D), lambda i, f: (f, 0)),
                pl.BlockSpec((1, D), lambda i, f: (0, 0), **const),
                pl.BlockSpec((1, D), lambda i, f: (0, 0), **const),
                pl.BlockSpec((1, D), lambda i, f: (0, 0), **const),
            ],
            out_specs=pl.BlockSpec((tm, D), lambda i, f: (i, 0)),
            scratch_shapes=[pltpu.VMEM((tm, D), jnp.float32)],
        ),
        compiler_params=_cparams("parallel", "arbitrary"),
    )(x2d, w1, b1[None, :], w2, b2[None, :], gamma[None, :], beta[None, :])


# ------------------------------------------------------------------ residual add + lm_head

def _add_lmhead_kernel(dec_ref, graft_ref, w_ref, o_ref):
    """logits = (decoder_hidden + graformer_hidden) @ W_lm   (no bias)."""
    h = dec_ref[...] + graft_ref[...]          # bf16 add, recomputed per V tile (cheap)
    o_ref[...] = jnp.dot(h, w_ref[...],
                         preferred_element_type=jnp.float32).astype(o_ref.dtype)


def add_lm_head(dec2d, graft2d, w_lm, *, tile_n=1024):
    """Single full-M row block; grid only over V -> W_lm streamed exactly once."""
    M, D = dec2d.shape
    V = w_lm.shape[1]
    tn = _tile(V, tile_n, 128)                 # real vocab should be padded to 128x
    const = _single_buffer()
    return pl.pallas_call(
        _add_lmhead_kernel,
        out_shape=jax.ShapeDtypeStruct((M, V), jnp.float32),
        grid_spec=pl.GridSpec(
            grid=(V // tn,),
            in_specs=[
                pl.BlockSpec((M, D), lambda j: (0, 0), **const),
                pl.BlockSpec((M, D), lambda j: (0, 0), **const),
                pl.BlockSpec((D, tn), lambda j: (0, j)),
            ],
            out_specs=pl.BlockSpec((M, tn), lambda j: (0, j)),
        ),
        compiler_params=_cparams("parallel"),
    )(dec2d, graft2d, w_lm)


# ------------------------------------------------------------------ mask glue (tiny, no S*S tensors)

def pad_bias_from_mask(mask):
    """HF _expand_mask compressed to [B, 1, src] additive f32; broadcast in-kernel."""
    return jnp.where(mask[:, None, :] > 0, 0.0, NEG_INF).astype(jnp.float32)


# ------------------------------------------------------------------ graft module glue

def attn_sublayer_self(x, pad_bias, p, n_heads, *, causal):
    B, S, D = x.shape
    x2d = x.reshape(B * S, D)
    qkv = linear(x2d, p["qkv_w"], p["qkv_b"]).reshape(B, S, 3 * D)
    ctx = self_attention(qkv, pad_bias, n_heads, causal=causal)        # [B,S,D] bf16
    h = resid_oproj_ln(ctx.reshape(B * S, D), x2d,
                       p["o_w"], p["o_b"], p["ln_g"], p["ln_b"])
    return h.reshape(B, S, D)


def attn_sublayer_cross(x, enc, pad_bias, p, n_heads):
    B, Sq, D = x.shape
    Sk = enc.shape[1]
    x2d = x.reshape(B * Sq, D)
    q = linear(x2d, p["q_w"], p["q_b"]).reshape(B, Sq, D)
    kv = linear(enc.reshape(B * Sk, D), p["kv_w"], p["kv_b"]).reshape(B, Sk, 2 * D)
    ctx = cross_attention(q, kv, pad_bias, n_heads)                    # [B,Sq,D] bf16
    h = resid_oproj_ln(ctx.reshape(B * Sq, D), x2d,
                       p["o_w"], p["o_b"], p["ln_g"], p["ln_b"])
    return h.reshape(B, Sq, D)


def ffn_sublayer(x, p):
    B, S, D = x.shape
    out = ffn_res_ln(x.reshape(B * S, D), p["fc1_w"], p["fc1_b"],
                     p["fc2_w"], p["fc2_b"], p["ln_g"], p["ln_b"])
    return out.reshape(B, S, D)


def encoder_layer(x, pad_bias, p, n_heads):
    h = attn_sublayer_self(x, pad_bias, p["self_attn"], n_heads, causal=False)
    return ffn_sublayer(h, p["ffn"])


def decoder_layer(x, dec_pad_bias, enc, enc_pad_bias, p, n_heads):
    h = attn_sublayer_self(x, dec_pad_bias, p["self_attn"], n_heads, causal=True)
    h = attn_sublayer_cross(h, enc, enc_pad_bias, p["cross_attn"], n_heads)
    return ffn_sublayer(h, p["ffn"])


def student_grafomer_forward(params, encoder_hidden, decoder_hidden,
                             attention_mask, decoder_attention_mask, n_heads):
    B, S_dec, D = decoder_hidden.shape
    enc_bias = pad_bias_from_mask(attention_mask)            # enc self + cross (src side)
    dec_bias = pad_bias_from_mask(decoder_attention_mask)    # causal part built in-kernel

    enc = encoder_hidden.astype(jnp.bfloat16)                # bf16 activations between kernels
    dec_in = decoder_hidden.astype(jnp.bfloat16)

    # GraftAttentionModule: 2 encoder layers + 2 decoder layers
    for p in params["graft_enc_layers"]:
        enc = encoder_layer(enc, enc_bias, p, n_heads)
    graft = dec_in
    for p in params["graft_dec_layers"]:
        graft = decoder_layer(graft, dec_bias, enc, enc_bias, p, n_heads)

    # output_hidden_states = decoder_hidden + graformer_hidden; then lm_head
    logits2d = add_lm_head(dec_in.reshape(B * S_dec, D),
                           graft.reshape(B * S_dec, D),
                           params["lm_head_w"])
    V = params["lm_head_w"].shape[1]
    return logits2d.reshape(B, S_dec, V)


# ------------------------------------------------------------------ deterministic param init
# matmul weights stored bf16 (MXU-native); biases / LN params f32.
# The 1/sqrt(head_dim) softmax scale is folded into the Q projection at init.

def _wf(key, shape, scale=0.02):
    return scale * jax.random.normal(key, shape, dtype=jnp.float32)


def init_self_attn(key, d, n_heads):
    k1, k2 = jax.random.split(key, 2)
    hs = float(d // n_heads) ** -0.5
    qkv_w = _wf(k1, (d, 3 * d)).at[:, :d].multiply(hs)       # fold scale into Q cols
    qkv_b = jnp.zeros((3 * d,), jnp.float32).at[:d].multiply(hs)
    return {
        "qkv_w": qkv_w.astype(jnp.bfloat16), "qkv_b": qkv_b,
        "o_w": _wf(k2, (d, d)).astype(jnp.bfloat16),
        "o_b": jnp.zeros((d,), jnp.float32),
        "ln_g": jnp.ones((d,), jnp.float32), "ln_b": jnp.zeros((d,), jnp.float32),
    }


def init_cross_attn(key, d, n_heads):
    k1, k2, k3 = jax.random.split(key, 3)
    hs = float(d // n_heads) ** -0.5
    return {
        "q_w": (_wf(k1, (d, d)) * hs).astype(jnp.bfloat16),  # fold scale into Q
        "q_b": jnp.zeros((d,), jnp.float32),
        "kv_w": _wf(k2, (d, 2 * d)).astype(jnp.bfloat16),
        "kv_b": jnp.zeros((2 * d,), jnp.float32),
        "o_w": _wf(k3, (d, d)).astype(jnp.bfloat16),
        "o_b": jnp.zeros((d,), jnp.float32),
        "ln_g": jnp.ones((d,), jnp.float32), "ln_b": jnp.zeros((d,), jnp.float32),
    }


def init_ffn(key, d, f):
    k1, k2 = jax.random.split(key, 2)
    return {
        "fc1_w": _wf(k1, (d, f)).astype(jnp.bfloat16),
        "fc1_b": jnp.zeros((f,), jnp.float32),
        "fc2_w": _wf(k2, (f, d)).astype(jnp.bfloat16),
        "fc2_b": jnp.zeros((d,), jnp.float32),
        "ln_g": jnp.ones((d,), jnp.float32), "ln_b": jnp.zeros((d,), jnp.float32),
    }


def init_enc_layer(key, d, f, n_heads):
    k1, k2 = jax.random.split(key, 2)
    return {"self_attn": init_self_attn(k1, d, n_heads), "ffn": init_ffn(k2, d, f)}


def init_dec_layer(key, d, f, n_heads):
    k1, k2, k3 = jax.random.split(key, 3)
    return {"self_attn": init_self_attn(k1, d, n_heads),
            "cross_attn": init_cross_attn(k2, d, n_heads),
            "ffn": init_ffn(k3, d, f)}


def init_params(key, d, f, vocab, n_heads, n_enc=2, n_dec=2):
    keys = jax.random.split(key, n_enc + n_dec + 1)
    return {
        "graft_enc_layers": [init_enc_layer(keys[i], d, f, n_heads)
                             for i in range(n_enc)],
        "graft_dec_layers": [init_dec_layer(keys[n_enc + i], d, f, n_heads)
                             for i in range(n_dec)],
        "lm_head_w": _wf(keys[-1], (d, vocab)).astype(jnp.bfloat16),
    }


# ------------------------------------------------------------------ main

if __name__ == "__main__":
    # small shapes consistent with the module (real model: D=768, heads=12, ffn=3072)
    B, S_ENC, S_DEC = 2, 16, 8
    D, N_HEADS, FFN, VOCAB = 64, 4, 128, 128

    key = jax.random.PRNGKey(0)
    k_enc, k_dec, k_par = jax.random.split(key, 3)

    encoder_hidden = jax.random.normal(k_enc, (B, S_ENC, D), dtype=jnp.float32)
    decoder_hidden = jax.random.normal(k_dec, (B, S_DEC, D), dtype=jnp.float32)
    attention_mask = jnp.ones((B, S_ENC), jnp.int32).at[1, -3:].set(0)  # pad last 3 of ex 1
    decoder_attention_mask = jnp.ones((B, S_DEC), jnp.int32)

    params = init_params(k_par, D, FFN, VOCAB, N_HEADS)

    fwd = jax.jit(functools.partial(student_grafomer_forward, n_heads=N_HEADS))
    logits = fwd(params, encoder_hidden, decoder_hidden,
                 attention_mask, decoder_attention_mask)
    logits = jax.block_until_ready(logits)

    assert logits.shape == (B, S_DEC, VOCAB)
    assert bool(jnp.all(jnp.isfinite(logits)))
    print("KERNEL_OK")
</pallas_src>

<mosaic_0001>
module attributes {stable_mosaic.version = 11 : i64} {
  func.func @_linear_kernel(%arg0: i32, %arg1: i32, %arg2: memref<32x64xbf16, #tpu.memory_space<vmem>>, %arg3: memref<64x192xbf16, #tpu.memory_space<vmem>>, %arg4: memref<1x192xf32, #tpu.memory_space<vmem>>, %arg5: memref<32x192xbf16, #tpu.memory_space<vmem>>) attributes {dimension_semantics = [#tpu.dimension_semantics<parallel>, #tpu.dimension_semantics<parallel>], iteration_bounds = array<i64: 1, 1>, scalar_prefetch = 0 : i64, scratch_operands = 0 : i64, tpu.core_type = #tpu.core_type<tc>, window_params = [{transform_indices = @transform_0, window_bounds = array<i64: 32, 64>}, {transform_indices = @transform_1, window_bounds = array<i64: 64, 192>}, {transform_indices = @transform_2, window_bounds = array<i64: 1, 192>}, {transform_indices = @transform_3, window_bounds = array<i64: 32, 192>}]} {
    %c0 = arith.constant 0 : index
    %c0_0 = arith.constant 0 : index
    %0 = vector.load %arg2[%c0, %c0_0] : memref<32x64xbf16, #tpu.memory_space<vmem>>, vector<32x64xbf16>
    %c0_1 = arith.constant 0 : index
    %c0_2 = arith.constant 0 : index
    %1 = vector.load %arg3[%c0_1, %c0_2] : memref<64x192xbf16, #tpu.memory_space<vmem>>, vector<64x192xbf16>
    %cst = arith.constant dense<0.000000e+00> : vector<32x192xf32>
    %2 = tpu.matmul %0, %1, %cst {dimension_numbers = #tpu.dot_dimension_numbers<[1], [0], [0], [1], [0, 0, 1, 1], [], []>} : vector<32x64xbf16>, vector<64x192xbf16>, vector<32x192xf32> -> vector<32x192xf32>
    %c0_3 = arith.constant 0 : index
    %c0_4 = arith.constant 0 : index
    %3 = vector.load %arg4[%c0_3, %c0_4] : memref<1x192xf32, #tpu.memory_space<vmem>>, vector<1x192xf32>
    %4 = vector.broadcast %3 : vector<1x192xf32> to vector<32x192xf32>
    %5 = arith.addf %2, %4 : vector<32x192xf32>
    %6 = arith.truncf %5 : vector<32x192xf32> to vector<32x192xbf16>
    %c0_5 = arith.constant 0 : index
    %c0_6 = arith.constant 0 : index
    %7 = vector.load %arg5[%c0_5, %c0_6] : memref<32x192xbf16, #tpu.memory_space<vmem>>, vector<32x192xbf16>
    tpu.vector_store %arg5[%c0_5, %c0_6], %6 {strides = array<i32>} : memref<32x192xbf16, #tpu.memory_space<vmem>>, vector<32x192xbf16>,
    return
  }
  func.func @transform_0(%arg0: i32, %arg1: i32) -> (i32, i32) {
    %c0_i32 = arith.constant 0 : i32
    %c0_i32_0 = arith.constant 0 : i32
    return %arg0, %c0_i32 : i32, i32
  }
  func.func @transform_1(%arg0: i32, %arg1: i32) -> (i32, i32) {
    %c0_i32 = arith.constant 0 : i32
    %c0_i32_0 = arith.constant 0 : i32
    return %c0_i32, %arg1 : i32, i32
  }
  func.func @transform_2(%arg0: i32, %arg1: i32) -> (i32, i32) {
    %c0_i32 = arith.constant 0 : i32
    %c0_i32_0 = arith.constant 0 : i32
    return %c0_i32, %arg1 : i32, i32
  }
  func.func @transform_3(%arg0: i32, %arg1: i32) -> (i32, i32) {
    %c0_i32 = arith.constant 0 : i32
    return %arg0, %arg1 : i32, i32
  }
}

module attributes {stable_mosaic.version = 11 : i64} {
  func.func @_self_attn_kernel(%arg0: i32, %arg1: i32, %arg2: memref<1x16x192xbf16, #tpu.memory_space<vmem>>, %arg3: memref<1x1x16xf32, #tpu.memory_space<vmem>>, %arg4: memref<1x16x64xbf16, #tpu.memory_space<vmem>>) attributes {dimension_semantics = [#tpu.dimension_semantics<parallel>, #tpu.dimension_semantics<parallel>], iteration_bounds = array<i64: 2, 1>, scalar_prefetch = 0 : i64, scratch_operands = 0 : i64, tpu.core_type = #tpu.core_type<tc>, window_params = [{transform_indices = @transform_0, window_bounds = array<i64: 1, 16, 192>}, {transform_indices = @transform_1, window_bounds = array<i64: 1, 1, 16>}, {transform_indices = @transform_2, window_bounds = array<i64: 1, 16, 64>}]} {
    %c16_i32 = arith.constant 16 : i32
    %0 = arith.muli %arg1, %c16_i32 : i32
    %1 = tpu.assume_multiple %0, 16 : i32
    %c0 = arith.constant 0 : index
    %c0_0 = arith.constant 0 : index
    %c0_1 = arith.constant 0 : index
    %2 = vector.load %arg3[%c0, %c0_0, %c0_1] : memref<1x1x16xf32, #tpu.memory_space<vmem>>, vector<1x1x16xf32>
    %3 = vector.shape_cast %2 : vector<1x1x16xf32> to vector<1x16xf32>
    %c0_2 = arith.constant 0 : index
    %4 = arith.index_cast %1 : i32 to index
    %c0_3 = arith.constant 0 : index
    %5 = vector.load %arg2[%c0_2, %4, %c0_3] : memref<1x16x192xbf16, #tpu.memory_space<vmem>>, vector<1x16x16xbf16>
    %6 = vector.shape_cast %5 : vector<1x16x16xbf16> to vector<16x16xbf16>
    %c0_4 = arith.constant 0 : index
    %c0_5 = arith.constant 0 : index
    %c64 = arith.constant 64 : index
    %7 = vector.load %arg2[%c0_4, %c0_5, %c64] : memref<1x16x192xbf16, #tpu.memory_space<vmem>>, vector<1x16x16xbf16>
    %8 = vector.shape_cast %7 : vector<1x16x16xbf16> to vector<16x16xbf16>
    %cst = arith.constant dense<0.000000e+00> : vector<16x16xf32>
    %9 = tpu.matmul %6, %8, %cst {dimension_numbers = #tpu.dot_dimension_numbers<[1], [1], [0], [0], [0, 0, 1, 0], [], []>} : vector<16x16xbf16>, vector<16x16xbf16>, vector<16x16xf32> -> vector<16x16xf32>
    %10 = vector.broadcast %3 : vector<1x16xf32> to vector<16x16xf32>
    %11 = arith.addf %9, %10 : vector<16x16xf32>
    %cst_6 = arith.constant dense<0xFF800000> : vector<16xf32>
    %12 = vector.multi_reduction <maximumf>, %11, %cst_6 [1] : vector<16x16xf32> to vector<16xf32>
    %13 = vector.shape_cast %12 : vector<16xf32> to vector<16x1xf32>
    %14 = vector.broadcast %13 : vector<16x1xf32> to vector<16x16xf32>
    %15 = arith.subf %11, %14 : vector<16x16xf32>
    %16 = math.exp %15 : vector<16x16xf32>
    %cst_7 = arith.constant dense<0.000000e+00> : vector<16xf32>
    %17 = vector.multi_reduction <add>, %16, %cst_7 [1] : vector<16x16xf32> to vector<16xf32>
    %18 = vector.shape_cast %17 : vector<16xf32> to vector<16x1xf32>
    %19 = tpu.reciprocal %18 {approx = true} : vector<16x1xf32> -> vector<16x1xf32>
    %20 = vector.broadcast %19 : vector<16x1xf32> to vector<16x16xf32>
    %21 = arith.mulf %16, %20 : vector<16x16xf32>
    %22 = arith.truncf %21 : vector<16x16xf32> to vector<16x16xbf16>
    %c0_8 = arith.constant 0 : index
    %c0_9 = arith.constant 0 : index
    %c128 = arith.constant 128 : index
    %23 = vector.load %arg2[%c0_8, %c0_9, %c128] : memref<1x16x192xbf16, #tpu.memory_space<vmem>>, vector<1x16x16xbf16>
    %24 = vector.shape_cast %23 : vector<1x16x16xbf16> to vector<16x16xbf16>
    %cst_10 = arith.constant dense<0.000000e+00> : vector<16x16xf32>
    %25 = tpu.matmul %22, %24, %cst_10 {dimension_numbers = #tpu.dot_dimension_numbers<[1], [0], [0], [1], [0, 0, 1, 1], [], []>} : vector<16x16xbf16>, vector<16x16xbf16>, vector<16x16xf32> -> vector<16x16xf32>
    %26 = arith.truncf %25 : vector<16x16xf32> to vector<16x16xbf16>
    %c0_11 = arith.constant 0 : index
    %c0_12 = arith.constant 0 : index
    %c0_13 = arith.constant 0 : index
    %27 = vector.load %arg4[%c0_11, %c0_12, %c0_13] : memref<1x16x64xbf16, #tpu.memory_space<vmem>>, vector<1x16x16xbf16>
    %28 = vector.shape_cast %27 : vector<1x16x16xbf16> to vector<16x16xbf16>
    %29 = vector.shape_cast %26 : vector<16x16xbf16> to vector<1x16x16xbf16>
    tpu.vector_store %arg4[%c0_11, %c0_12, %c0_13], %29 {strides = array<i32>} : memref<1x16x64xbf16, #tpu.memory_space<vmem>>, vector<1x16x16xbf16>,
    %c0_14 = arith.constant 0 : index
    %30 = arith.index_cast %1 : i32 to index
    %c16 = arith.constant 16 : index
    %31 = vector.load %arg2[%c0_14, %30, %c16] : memref<1x16x192xbf16, #tpu.memory_space<vmem>>, vector<1x16x16xbf16>
    %32 = vector.shape_cast %31 : vector<1x16x16xbf16> to vector<16x16xbf16>
    %c0_15 = arith.constant 0 : index
    %c0_16 = arith.constant 0 : index
    %c80 = arith.constant 80 : index
    %33 = vector.load %arg2[%c0_15, %c0_16, %c80] : memref<1x16x192xbf16, #tpu.memory_space<vmem>>, vector<1x16x16xbf16>
    %34 = vector.shape_cast %33 : vector<1x16x16xbf16> to vector<16x16xbf16>
    %cst_17 = arith.constant dense<0.000000e+00> : vector<16x16xf32>
    %35 = tpu.matmul %32, %34, %cst_17 {dimension_numbers = #tpu.dot_dimension_numbers<[1], [1], [0], [0], [0, 0, 1, 0], [], []>} : vector<16x16xbf16>, vector<16x16xbf16>, vector<16x16xf32> -> vector<16x16xf32>
    %36 = vector.broadcast %3 : vector<1x16xf32> to vector<16x16xf32>
    %37 = arith.addf %35, %36 : vector<16x16xf32>
    %cst_18 = arith.constant dense<0xFF800000> : vector<16xf32>
    %38 = vector.multi_reduction <maximumf>, %37, %cst_18 [1] : vector<16x16xf32> to vector<16xf32>
    %39 = vector.shape_cast %38 : vector<16xf32> to vector<16x1xf32>
    %40 = vector.broadcast %39 : vector<16x1xf32> to vector<16x16xf32>
    %41 = arith.subf %37, %40 : vector<16x16xf32>
    %42 = math.exp %41 : vector<16x16xf32>
    %cst_19 = arith.constant dense<0.000000e+00> : vector<16xf32>
    %43 = vector.multi_reduction <add>, %42, %cst_19 [1] : vector<16x16xf32> to vector<16xf32>
    %44 = vector.shape_cast %43 : vector<16xf32> to vector<16x1xf32>
    %45 = tpu.reciprocal %44 {approx = true} : vector<16x1xf32> -> vector<16x1xf32>
    %46 = vector.broadcast %45 : vector<16x1xf32> to vector<16x16xf32>
    %47 = arith.mulf %42, %46 : vector<16x16xf32>
    %48 = arith.truncf %47 : vector<16x16xf32> to vector<16x16xbf16>
    %c0_20 = arith.constant 0 : index
    %c0_21 = arith.constant 0 : index
    %c144 = arith.constant 144 : index
    %49 = vector.load %arg2[%c0_20, %c0_21, %c144] : memref<1x16x192xbf16, #tpu.memory_space<vmem>>, vector<1x16x16xbf16>
    %50 = vector.shape_cast %49 : vector<1x16x16xbf16> to vector<16x16xbf16>
    %cst_22 = arith.constant dense<0.000000e+00> : vector<16x16xf32>
    %51 = tpu.matmul %48, %50, %cst_22 {dimension_numbers = #tpu.dot_dimension_numbers<[1], [0], [0], [1], [0, 0, 1, 1], [], []>} : vector<16x16xbf16>, vector<16x16xbf16>, vector<16x16xf32> -> vector<16x16xf32>
    %52 = arith.truncf %51 : vector<16x16xf32> to vector<16x16xbf16>
    %c0_23 = arith.constant 0 : index
    %c0_24 = arith.constant 0 : index
    %c16_25 = arith.constant 16 : index
    %53 = vector.load %arg4[%c0_23, %c0_24, %c16_25] : memref<1x16x64xbf16, #tpu.memory_space<vmem>>, vector<1x16x16xbf16>
    %54 = vector.shape_cast %53 : vector<1x16x16xbf16> to vector<16x16xbf16>
    %55 = vector.shape_cast %52 : vector<16x16xbf16> to vector<1x16x16xbf16>
    tpu.vector_store %arg4[%c0_23, %c0_24, %c16_25], %55 {strides = array<i32>} : memref<1x16x64xbf16, #tpu.memory_space<vmem>>, vector<1x16x16xbf16>,
    %c0_26 = arith.constant 0 : index
    %56 = arith.index_cast %1 : i32 to index
    %c32 = arith.constant 32 : index
    %57 = vector.load %arg2[%c0_26, %56, %c32] : memref<1x16x192xbf16, #tpu.memory_space<vmem>>, vector<1x16x16xbf16>
    %58 = vector.shape_cast %57 : vector<1x16x16xbf16> to vector<16x16xbf16>
    %c0_27 = arith.constant 0 : index
    %c0_28 = arith.constant 0 : index
    %c96 = arith.constant 96 : index
    %59 = vector.load %arg2[%c0_27, %c0_28, %c96] : memref<1x16x192xbf16, #tpu.memory_space<vmem>>, vector<1x16x16xbf16>
    %60 = vector.shape_cast %59 : vector<1x16x16xbf16> to vector<16x16xbf16>
    %cst_29 = arith.constant dense<0.000000e+00> : vector<16x16xf32>
    %61 = tpu.matmul %58, %60, %cst_29 {dimension_numbers = #tpu.dot_dimension_numbers<[1], [1], [0], [0], [0, 0, 1, 0], [], []>} : vector<16x16xbf16>, vector<16x16xbf16>, vector<16x16xf32> -> vector<16x16xf32>
    %62 = vector.broadcast %3 : vector<1x16xf32> to vector<16x16xf32>
    %63 = arith.addf %61, %62 : vector<16x16xf32>
    %cst_30 = arith.constant dense<0xFF800000> : vector<16xf32>
    %64 = vector.multi_reduction <maximumf>, %63, %cst_30 [1] : vector<16x16xf32> to vector<16xf32>
    %65 = vector.shape_cast %64 : vector<16xf32> to vector<16x1xf32>
    %66 = vector.broadcast %65 : vector<16x1xf32> to vector<16x16xf32>
    %67 = arith.subf %63, %66 : vector<16x16xf32>
    %68 = math.exp %67 : vector<16x16xf32>
    %cst_31 = arith.constant dense<0.000000e+00> : vector<16xf32>
    %69 = vector.multi_reduction <add>, %68, %cst_31 [1] : vector<16x16xf32> to vector<16xf32>
    %70 = vector.shape_cast %69 : vector<16xf32> to vector<16x1xf32>
    %71 = tpu.reciprocal %70 {approx = true} : vector<16x1xf32> -> vector<16x1xf32>
    %72 = vector.broadcast %71 : vector<16x1xf32> to vector<16x16xf32>
    %73 = arith.mulf %68, %72 : vector<16x16xf32>
    %74 = arith.truncf %73 : vector<16x16xf32> to vector<16x16xbf16>
    %c0_32 = arith.constant 0 : index
    %c0_33 = arith.constant 0 : index
    %c160 = arith.constant 160 : index
    %75 = vector.load %arg2[%c0_32, %c0_33, %c160] : memref<1x16x192xbf16, #tpu.memory_space<vmem>>, vector<1x16x16xbf16>
    %76 = vector.shape_cast %75 : vector<1x16x16xbf16> to vector<16x16xbf16>
    %cst_34 = arith.constant dense<0.000000e+00> : vector<16x16xf32>
    %77 = tpu.matmul %74, %76, %cst_34 {dimension_numbers = #tpu.dot_dimension_numbers<[1], [0], [0], [1], [0, 0, 1, 1], [], []>} : vector<16x16xbf16>, vector<16x16xbf16>, vector<16x16xf32> -> vector<16x16xf32>
    %78 = arith.truncf %77 : vector<16x16xf32> to vector<16x16xbf16>
    %c0_35 = arith.constant 0 : index
    %c0_36 = arith.constant 0 : index
    %c32_37 = arith.constant 32 : index
    %79 = vector.load %arg4[%c0_35, %c0_36, %c32_37] : memref<1x16x64xbf16, #tpu.memory_space<vmem>>, vector<1x16x16xbf16>
    %80 = vector.shape_cast %79 : vector<1x16x16xbf16> to vector<16x16xbf16>
    %81 = vector.shape_cast %78 : vector<16x16xbf16> to vector<1x16x16xbf16>
    tpu.vector_store %arg4[%c0_35, %c0_36, %c32_37], %81 {strides = array<i32>} : memref<1x16x64xbf16, #tpu.memory_space<vmem>>, vector<1x16x16xbf16>,
    %c0_38 = arith.constant 0 : index
    %82 = arith.index_cast %1 : i32 to index
    %c48 = arith.constant 48 : index
    %83 = vector.load %arg2[%c0_38, %82, %c48] : memref<1x16x192xbf16, #tpu.memory_space<vmem>>, vector<1x16x16xbf16>
    %84 = vector.shape_cast %83 : vector<1x16x16xbf16> to vector<16x16xbf16>
    %c0_39 = arith.constant 0 : index
    %c0_40 = arith.constant 0 : index
    %c112 = arith.constant 112 : index
    %85 = vector.load %arg2[%c0_39, %c0_40, %c112] : memref<1x16x192xbf16, #tpu.memory_space<vmem>>, vector<1x16x16xbf16>
    %86 = vector.shape_cast %85 : vector<1x16x16xbf16> to vector<16x16xbf16>
    %cst_41 = arith.constant dense<0.000000e+00> : vector<16x16xf32>
    %87 = tpu.matmul %84, %86, %cst_41 {dimension_numbers = #tpu.dot_dimension_numbers<[1], [1], [0], [0], [0, 0, 1, 0], [], []>} : vector<16x16xbf16>, vector<16x16xbf16>, vector<16x16xf32> -> vector<16x16xf32>
    %88 = vector.broadcast %3 : vector<1x16xf32> to vector<16x16xf32>
    %89 = arith.addf %87, %88 : vector<16x16xf32>
    %cst_42 = arith.constant dense<0xFF800000> : vector<16xf32>
    %90 = vector.multi_reduction <maximumf>, %89, %cst_42 [1] : vector<16x16xf32> to vector<16xf32>
    %91 = vector.shape_cast %90 : vector<16xf32> to vector<16x1xf32>
    %92 = vector.broadcast %91 : vector<16x1xf32> to vector<16x16xf32>
    %93 = arith.subf %89, %92 : vector<16x16xf32>
    %94 = math.exp %93 : vector<16x16xf32>
    %cst_43 = arith.constant dense<0.000000e+00> : vector<16xf32>
    %95 = vector.multi_reduction <add>, %94, %cst_43 [1] : vector<16x16xf32> to vector<16xf32>
    %96 = vector.shape_cast %95 : vector<16xf32> to vector<16x1xf32>
    %97 = tpu.reciprocal %96 {approx = true} : vector<16x1xf32> -> vector<16x1xf32>
    %98 = vector.broadcast %97 : vector<16x1xf32> to vector<16x16xf32>
    %99 = arith.mulf %94, %98 : vector<16x16xf32>
    %100 = arith.truncf %99 : vector<16x16xf32> to vector<16x16xbf16>
    %c0_44 = arith.constant 0 : index
    %c0_45 = arith.constant 0 : index
    %c176 = arith.constant 176 : index
    %101 = vector.load %arg2[%c0_44, %c0_45, %c176] : memref<1x16x192xbf16, #tpu.memory_space<vmem>>, vector<1x16x16xbf16>
    %102 = vector.shape_cast %101 : vector<1x16x16xbf16> to vector<16x16xbf16>
    %cst_46 = arith.constant dense<0.000000e+00> : vector<16x16xf32>
    %103 = tpu.matmul %100, %102, %cst_46 {dimension_numbers = #tpu.dot_dimension_numbers<[1], [0], [0], [1], [0, 0, 1, 1], [], []>} : vector<16x16xbf16>, vector<16x16xbf16>, vector<16x16xf32> -> vector<16x16xf32>
    %104 = arith.truncf %103 : vector<16x16xf32> to vector<16x16xbf16>
    %c0_47 = arith.constant 0 : index
    %c0_48 = arith.constant 0 : index
    %c48_49 = arith.constant 48 : index
    %105 = vector.load %arg4[%c0_47, %c0_48, %c48_49] : memref<1x16x64xbf16, #tpu.memory_space<vmem>>, vector<1x16x16xbf16>
    %106 = vector.shape_cast %105 : vector<1x16x16xbf16> to vector<16x16xbf16>
    %107 = vector.shape_cast %104 : vector<16x16xbf16> to vector<1x16x16xbf16>
    tpu.vector_store %arg4[%c0_47, %c0_48, %c48_49], %107 {strides = array<i32>} : memref<1x16x64xbf16, #tpu.memory_space<vmem>>, vector<1x16x16xbf16>,
    return
  }
  func.func @transform_0(%arg0: i32, %arg1: i32) -> (i32, i32, i32) {
    %c0_i32 = arith.constant 0 : i32
    %c0_i32_0 = arith.constant 0 : i32
    %c0_i32_1 = arith.constant 0 : i32
    return %arg0, %c0_i32, %c0_i32_0 : i32, i32, i32
  }
  func.func @transform_1(%arg0: i32, %arg1: i32) -> (i32, i32, i32) {
    %c0_i32 = arith.constant 0 : i32
    %c0_i32_0 = arith.constant 0 : i32
    %c0_i32_1 = arith.constant 0 : i32
    return %arg0, %c0_i32, %c0_i32_0 : i32, i32, i32
  }
  func.func @transform_2(%arg0: i32, %arg1: i32) -> (i32, i32, i32) {
    %c0_i32 = arith.constant 0 : i32
    %c0_i32_0 = arith.constant 0 : i32
    return %arg0, %arg1, %c0_i32 : i32, i32, i32
  }
}

module attributes {stable_mosaic.version = 11 : i64} {
  func.func @_resid_oproj_ln_kernel(%arg0: i32, %arg1: memref<32x64xbf16, #tpu.memory_space<vmem>>, %arg2: memref<32x64xbf16, #tpu.memory_space<vmem>>, %arg3: memref<64x64xbf16, #tpu.memory_space<vmem>>, %arg4: memref<1x64xf32, #tpu.memory_space<vmem>>, %arg5: memref<1x64xf32, #tpu.memory_space<vmem>>, %arg6: memref<1x64xf32, #tpu.memory_space<vmem>>, %arg7: memref<32x64xbf16, #tpu.memory_space<vmem>>) attributes {dimension_semantics = [#tpu.dimension_semantics<parallel>], iteration_bounds = array<i64: 1>, scalar_prefetch = 0 : i64, scratch_operands = 0 : i64, tpu.core_type = #tpu.core_type<tc>, window_params = [{transform_indices = @transform_0, window_bounds = array<i64: 32, 64>}, {transform_indices = @transform_1, window_bounds = array<i64: 32, 64>}, {pipeline_mode = #tpu.pipeline_mode<synchronous>, transform_indices = @transform_2, window_bounds = array<i64: 64, 64>}, {pipeline_mode = #tpu.pipeline_mode<synchronous>, transform_indices = @transform_3, window_bounds = array<i64: 1, 64>}, {pipeline_mode = #tpu.pipeline_mode<synchronous>, transform_indices = @transform_4, window_bounds = array<i64: 1, 64>}, {pipeline_mode = #tpu.pipeline_mode<synchronous>, transform_indices = @transform_5, window_bounds = array<i64: 1, 64>}, {transform_indices = @transform_6, window_bounds = array<i64: 32, 64>}]} {
    %c0 = arith.constant 0 : index
    %c0_0 = arith.constant 0 : index
    %0 = vector.load %arg1[%c0, %c0_0] : memref<32x64xbf16, #tpu.memory_space<vmem>>, vector<32x64xbf16>
    %c0_1 = arith.constant 0 : index
    %c0_2 = arith.constant 0 : index
    %1 = vector.load %arg3[%c0_1, %c0_2] : memref<64x64xbf16, #tpu.memory_space<vmem>>, vector<64x64xbf16>
    %cst = arith.constant dense<0.000000e+00> : vector<32x64xf32>
    %2 = tpu.matmul %0, %1, %cst {dimension_numbers = #tpu.dot_dimension_numbers<[1], [0], [0], [1], [0, 0, 1, 1], [], []>} : vector<32x64xbf16>, vector<64x64xbf16>, vector<32x64xf32> -> vector<32x64xf32>
    %c0_3 = arith.constant 0 : index
    %c0_4 = arith.constant 0 : index
    %3 = vector.load %arg4[%c0_3, %c0_4] : memref<1x64xf32, #tpu.memory_space<vmem>>, vector<1x64xf32>
    %4 = vector.broadcast %3 : vector<1x64xf32> to vector<32x64xf32>
    %5 = arith.addf %2, %4 : vector<32x64xf32>
    %c0_5 = arith.constant 0 : index
    %c0_6 = arith.constant 0 : index
    %6 = vector.load %arg2[%c0_5, %c0_6] : memref<32x64xbf16, #tpu.memory_space<vmem>>, vector<32x64xbf16>
    %7 = arith.extf %6 : vector<32x64xbf16> to vector<32x64xf32>
    %8 = arith.addf %5, %7 : vector<32x64xf32>
    %cst_7 = arith.constant dense<0.000000e+00> : vector<32xf32>
    %9 = vector.multi_reduction <add>, %8, %cst_7 [1] : vector<32x64xf32> to vector<32xf32>
    %10 = vector.shape_cast %9 : vector<32xf32> to vector<32x1xf32>
    %cst_8 = arith.constant 6.400000e+01 : f32
    %11 = vector.broadcast %cst_8 : f32 to vector<32x1xf32>
    %12 = arith.divf %10, %11 : vector<32x1xf32>
    %13 = vector.broadcast %12 : vector<32x1xf32> to vector<32x64xf32>
    %14 = arith.subf %8, %13 : vector<32x64xf32>
    %15 = arith.mulf %14, %14 : vector<32x64xf32>
    %cst_9 = arith.constant dense<0.000000e+00> : vector<32xf32>
    %16 = vector.multi_reduction <add>, %15, %cst_9 [1] : vector<32x64xf32> to vector<32xf32>
    %17 = vector.shape_cast %16 : vector<32xf32> to vector<32x1xf32>
    %cst_10 = arith.constant 6.400000e+01 : f32
    %18 = vector.broadcast %cst_10 : f32 to vector<32x1xf32>
    %19 = arith.divf %17, %18 : vector<32x1xf32>
    %cst_11 = arith.constant 9.99999974E-6 : f32
    %20 = vector.broadcast %cst_11 : f32 to vector<32x1xf32>
    %21 = arith.addf %19, %20 : vector<32x1xf32>
    %22 = math.rsqrt %21 : vector<32x1xf32>
    %23 = vector.broadcast %22 : vector<32x1xf32> to vector<32x64xf32>
    %24 = arith.mulf %14, %23 : vector<32x64xf32>
    %c0_12 = arith.constant 0 : index
    %c0_13 = arith.constant 0 : index
    %25 = vector.load %arg5[%c0_12, %c0_13] : memref<1x64xf32, #tpu.memory_space<vmem>>, vector<1x64xf32>
    %26 = vector.broadcast %25 : vector<1x64xf32> to vector<32x64xf32>
    %27 = arith.mulf %24, %26 : vector<32x64xf32>
    %c0_14 = arith.constant 0 : index
    %c0_15 = arith.constant 0 : index
    %28 = vector.load %arg6[%c0_14, %c0_15] : memref<1x64xf32, #tpu.memory_space<vmem>>, vector<1x64xf32>
    %29 = vector.broadcast %28 : vector<1x64xf32> to vector<32x64xf32>
    %30 = arith.addf %27, %29 : vector<32x64xf32>
    %31 = arith.truncf %30 : vector<32x64xf32> to vector<32x64xbf16>
    %c0_16 = arith.constant 0 : index
    %c0_17 = arith.constant 0 : index
    %32 = vector.load %arg7[%c0_16, %c0_17] : memref<32x64xbf16, #tpu.memory_space<vmem>>, vector<32x64xbf16>
    tpu.vector_store %arg7[%c0_16, %c0_17], %31 {strides = array<i32>} : memref<32x64xbf16, #tpu.memory_space<vmem>>, vector<32x64xbf16>,
    return
  }
  func.func @transform_0(%arg0: i32) -> (i32, i32) {
    %c0_i32 = arith.constant 0 : i32
    %c0_i32_0 = arith.constant 0 : i32
    return %arg0, %c0_i32 : i32, i32
  }
  func.func @transform_1(%arg0: i32) -> (i32, i32) {
    %c0_i32 = arith.constant 0 : i32
    %c0_i32_0 = arith.constant 0 : i32
    return %arg0, %c0_i32 : i32, i32
  }
  func.func @transform_2(%arg0: i32) -> (i32, i32) {
    %c0_i32 = arith.constant 0 : i32
    %c0_i32_0 = arith.constant 0 : i32
    %c0_i32_1 = arith.constant 0 : i32
    return %c0_i32, %c0_i32_0 : i32, i32
  }
  func.func @transform_3(%arg0: i32) -> (i32, i32) {
    %c0_i32 = arith.constant 0 : i32
    %c0_i32_0 = arith.constant 0 : i32
    %c0_i32_1 = arith.constant 0 : i32
    return %c0_i32, %c0_i32_0 : i32, i32
  }
  func.func @transform_4(%arg0: i32) -> (i32, i32) {
    %c0_i32 = arith.constant 0 : i32
    %c0_i32_0 = arith.constant 0 : i32
    %c0_i32_1 = arith.constant 0 : i32
    return %c0_i32, %c0_i32_0 : i32, i32
  }
  func.func @transform_5(%arg0: i32) -> (i32, i32) {
    %c0_i32 = arith.constant 0 : i32
    %c0_i32_0 = arith.constant 0 : i32
    %c0_i32_1 = arith.constant 0 : i32
    return %c0_i32, %c0_i32_0 : i32, i32
  }
  func.func @transform_6(%arg0: i32) -> (i32, i32) {
    %c0_i32 = arith.constant 0 : i32
    %c0_i32_0 = arith.constant 0 : i32
    return %arg0, %c0_i32 : i32, i32
  }
}

module attributes {stable_mosaic.version = 11 : i64} {
  func.func @_ffn_res_ln_kernel(%arg0: i32, %arg1: i32, %arg2: memref<32x64xbf16, #tpu.memory_space<vmem>>, %arg3: memref<64x128xbf16, #tpu.memory_space<vmem>>, %arg4: memref<1x128xf32, #tpu.memory_space<vmem>>, %arg5: memref<128x64xbf16, #tpu.memory_space<vmem>>, %arg6: memref<1x64xf32, #tpu.memory_space<vmem>>, %arg7: memref<1x64xf32, #tpu.memory_space<vmem>>, %arg8: memref<1x64xf32, #tpu.memory_space<vmem>>, %arg9: memref<32x64xbf16, #tpu.memory_space<vmem>>, %arg10: memref<32x64xf32, #tpu.memory_space<vmem>>) attributes {dimension_semantics = [#tpu.dimension_semantics<parallel>, #tpu.dimension_semantics<arbitrary>], iteration_bounds = array<i64: 1, 1>, scalar_prefetch = 0 : i64, scratch_operands = 1 : i64, tpu.core_type = #tpu.core_type<tc>, window_params = [{transform_indices = @transform_0, window_bounds = array<i64: 32, 64>}, {transform_indices = @transform_1, window_bounds = array<i64: 64, 128>}, {transform_indices = @transform_2, window_bounds = array<i64: 1, 128>}, {transform_indices = @transform_3, window_bounds = array<i64: 128, 64>}, {pipeline_mode = #tpu.pipeline_mode<synchronous>, transform_indices = @transform_4, window_bounds = array<i64: 1, 64>}, {pipeline_mode = #tpu.pipeline_mode<synchronous>, transform_indices = @transform_5, window_bounds = array<i64: 1, 64>}, {pipeline_mode = #tpu.pipeline_mode<synchronous>, transform_indices = @transform_6, window_bounds = array<i64: 1, 64>}, {transform_indices = @transform_7, window_bounds = array<i64: 32, 64>}]} {
    %c0_i32 = arith.constant 0 : i32
    %0 = arith.cmpi eq, %arg1, %c0_i32 : i32
    %1 = arith.extui %0 : i1 to i32
    %c0_i32_0 = arith.constant 0 : i32
    %2 = arith.cmpi ne, %1, %c0_i32_0 : i32
    scf.if %2 {
      %cst_19 = arith.constant 0.000000e+00 : f32
      %31 = vector.broadcast %cst_19 : f32 to vector<32x64xf32>
      %c0_20 = arith.constant 0 : index
      %c0_21 = arith.constant 0 : index
      %32 = vector.load %arg10[%c0_20, %c0_21] : memref<32x64xf32, #tpu.memory_space<vmem>>, vector<32x64xf32>
      tpu.vector_store %arg10[%c0_20, %c0_21], %31 {strides = array<i32>} : memref<32x64xf32, #tpu.memory_space<vmem>>, vector<32x64xf32>,
    } else {
    }
    %c0 = arith.constant 0 : index
    %c0_1 = arith.constant 0 : index
    %3 = vector.load %arg2[%c0, %c0_1] : memref<32x64xbf16, #tpu.memory_space<vmem>>, vector<32x64xbf16>
    %c0_2 = arith.constant 0 : index
    %c0_3 = arith.constant 0 : index
    %4 = vector.load %arg3[%c0_2, %c0_3] : memref<64x128xbf16, #tpu.memory_space<vmem>>, vector<64x128xbf16>
    %cst = arith.constant dense<0.000000e+00> : vector<32x128xf32>
    %5 = tpu.matmul %3, %4, %cst {dimension_numbers = #tpu.dot_dimension_numbers<[1], [0], [0], [1], [0, 0, 1, 1], [], []>} : vector<32x64xbf16>, vector<64x128xbf16>, vector<32x128xf32> -> vector<32x128xf32>
    %c0_4 = arith.constant 0 : index
    %c0_5 = arith.constant 0 : index
    %6 = vector.load %arg4[%c0_4, %c0_5] : memref<1x128xf32, #tpu.memory_space<vmem>>, vector<1x128xf32>
    %7 = vector.broadcast %6 : vector<1x128xf32> to vector<32x128xf32>
    %8 = arith.addf %5, %7 : vector<32x128xf32>
    %9 = arith.mulf %8, %8 : vector<32x128xf32>
    %10 = arith.mulf %8, %9 : vector<32x128xf32>
    %cst_6 = arith.constant 4.471500e-02 : f32
    %11 = vector.broadcast %cst_6 : f32 to vector<32x128xf32>
    %12 = arith.mulf %11, %10 : vector<32x128xf32>
    %13 = arith.addf %8, %12 : vector<32x128xf32>
    %cst_7 = arith.constant 0.797884583 : f32
    %14 = vector.broadcast %cst_7 : f32 to vector<32x128xf32>
    %15 = arith.mulf %14, %13 : vector<32x128xf32>
    %16 = math.tanh %15 : vector<32x128xf32>
    %cst_8 = arith.constant 1.000000e+00 : f32
    %17 = vector.broadcast %cst_8 : f32 to vector<32x128xf32>
    %18 = arith.addf %17, %16 : vector<32x128xf32>
    %cst_9 = arith.constant 5.000000e-01 : f32
    %19 = vector.broadcast %cst_9 : f32 to vector<32x128xf32>
    %20 = arith.mulf %19, %18 : vector<32x128xf32>
    %21 = arith.mulf %8, %20 : vector<32x128xf32>
    %c0_10 = arith.constant 0 : index
    %c0_11 = arith.constant 0 : index
    %22 = vector.load %arg10[%c0_10, %c0_11] : memref<32x64xf32, #tpu.memory_space<vmem>>, vector<32x64xf32>
    %23 = arith.truncf %21 : vector<32x128xf32> to vector<32x128xbf16>
    %c0_12 = arith.constant 0 : index
    %c0_13 = arith.constant 0 : index
    %24 = vector.load %arg5[%c0_12, %c0_13] : memref<128x64xbf16, #tpu.memory_space<vmem>>, vector<128x64xbf16>
    %cst_14 = arith.constant dense<0.000000e+00> : vector<32x64xf32>
    %25 = tpu.matmul %23, %24, %cst_14 {dimension_numbers = #tpu.dot_dimension_numbers<[1], [0], [0], [1], [0, 0, 1, 1], [], []>} : vector<32x128xbf16>, vector<128x64xbf16>, vector<32x64xf32> -> vector<32x64xf32>
    %26 = arith.addf %22, %25 : vector<32x64xf32>
    %c0_15 = arith.constant 0 : index
    %c0_16 = arith.constant 0 : index
    %27 = vector.load %arg10[%c0_15, %c0_16] : memref<32x64xf32, #tpu.memory_space<vmem>>, vector<32x64xf32>
    tpu.vector_store %arg10[%c0_15, %c0_16], %26 {strides = array<i32>} : memref<32x64xf32, #tpu.memory_space<vmem>>, vector<32x64xf32>,
    %c0_i32_17 = arith.constant 0 : i32
    %28 = arith.cmpi eq, %arg1, %c0_i32_17 : i32
    %29 = arith.extui %28 : i1 to i32
    %c0_i32_18 = arith.constant 0 : i32
    %30 = arith.cmpi ne, %29, %c0_i32_18 : i32
    scf.if %30 {
      %c0_19 = arith.constant 0 : index
      %c0_20 = arith.constant 0 : index
      %31 = vector.load %arg10[%c0_19, %c0_20] : memref<32x64xf32, #tpu.memory_space<vmem>>, vector<32x64xf32>
      %c0_21 = arith.constant 0 : index
      %c0_22 = arith.constant 0 : index
      %32 = vector.load %arg6[%c0_21, %c0_22] : memref<1x64xf32, #tpu.memory_space<vmem>>, vector<1x64xf32>
      %33 = vector.broadcast %32 : vector<1x64xf32> to vector<32x64xf32>
      %34 = arith.addf %31, %33 : vector<32x64xf32>
      %c0_23 = arith.constant 0 : index
      %c0_24 = arith.constant 0 : index
      %35 = vector.load %arg2[%c0_23, %c0_24] : memref<32x64xbf16, #tpu.memory_space<vmem>>, vector<32x64xbf16>
      %36 = arith.extf %35 : vector<32x64xbf16> to vector<32x64xf32>
      %37 = arith.addf %34, %36 : vector<32x64xf32>
      %cst_25 = arith.constant dense<0.000000e+00> : vector<32xf32>
      %38 = vector.multi_reduction <add>, %37, %cst_25 [1] : vector<32x64xf32> to vector<32xf32>
      %39 = vector.shape_cast %38 : vector<32xf32> to vector<32x1xf32>
      %cst_26 = arith.constant 6.400000e+01 : f32
      %40 = vector.broadcast %cst_26 : f32 to vector<32x1xf32>
      %41 = arith.divf %39, %40 : vector<32x1xf32>
      %42 = vector.broadcast %41 : vector<32x1xf32> to vector<32x64xf32>
      %43 = arith.subf %37, %42 : vector<32x64xf32>
      %44 = arith.mulf %43, %43 : vector<32x64xf32>
      %cst_27 = arith.constant dense<0.000000e+00> : vector<32xf32>
      %45 = vector.multi_reduction <add>, %44, %cst_27 [1] : vector<32x64xf32> to vector<32xf32>
      %46 = vector.shape_cast %45 : vector<32xf32> to vector<32x1xf32>
      %cst_28 = arith.constant 6.400000e+01 : f32
      %47 = vector.broadcast %cst_28 : f32 to vector<32x1xf32>
      %48 = arith.divf %46, %47 : vector<32x1xf32>
      %cst_29 = arith.constant 9.99999974E-6 : f32
      %49 = vector.broadcast %cst_29 : f32 to vector<32x1xf32>
      %50 = arith.addf %48, %49 : vector<32x1xf32>
      %51 = math.rsqrt %50 : vector<32x1xf32>
      %52 = vector.broadcast %51 : vector<32x1xf32> to vector<32x64xf32>
      %53 = arith.mulf %43, %52 : vector<32x64xf32>
      %c0_30 = arith.constant 0 : index
      %c0_31 = arith.constant 0 : index
      %54 = vector.load %arg7[%c0_30, %c0_31] : memref<1x64xf32, #tpu.memory_space<vmem>>, vector<1x64xf32>
      %55 = vector.broadcast %54 : vector<1x64xf32> to vector<32x64xf32>
      %56 = arith.mulf %53, %55 : vector<32x64xf32>
      %c0_32 = arith.constant 0 : index
      %c0_33 = arith.constant 0 : index
      %57 = vector.load %arg8[%c0_32, %c0_33] : memref<1x64xf32, #tpu.memory_space<vmem>>, vector<1x64xf32>
      %58 = vector.broadcast %57 : vector<1x64xf32> to vector<32x64xf32>
      %59 = arith.addf %56, %58 : vector<32x64xf32>
      %60 = arith.truncf %59 : vector<32x64xf32> to vector<32x64xbf16>
      %c0_34 = arith.constant 0 : index
      %c0_35 = arith.constant 0 : index
      %61 = vector.load %arg9[%c0_34, %c0_35] : memref<32x64xbf16, #tpu.memory_space<vmem>>, vector<32x64xbf16>
      tpu.vector_store %arg9[%c0_34, %c0_35], %60 {strides = array<i32>} : memref<32x64xbf16, #tpu.memory_space<vmem>>, vector<32x64xbf16>,
    } else {
    }
    return
  }
  func.func @transform_0(%arg0: i32, %arg1: i32) -> (i32, i32) {
    %c0_i32 = arith.constant 0 : i32
    %c0_i32_0 = arith.constant 0 : i32
    return %arg0, %c0_i32 : i32, i32
  }
  func.func @transform_1(%arg0: i32, %arg1: i32) -> (i32, i32) {
    %c0_i32 = arith.constant 0 : i32
    %c0_i32_0 = arith.constant 0 : i32
    return %c0_i32, %arg1 : i32, i32
  }
  func.func @transform_2(%arg0: i32, %arg1: i32) -> (i32, i32) {
    %c0_i32 = arith.constant 0 : i32
    %c0_i32_0 = arith.constant 0 : i32
    return %c0_i32, %arg1 : i32, i32
  }
  func.func @transform_3(%arg0: i32, %arg1: i32) -> (i32, i32) {
    %c0_i32 = arith.constant 0 : i32
    %c0_i32_0 = arith.constant 0 : i32
    return %arg1, %c0_i32 : i32, i32
  }
  func.func @transform_4(%arg0: i32, %arg1: i32) -> (i32, i32) {
    %c0_i32 = arith.constant 0 : i32
    %c0_i32_0 = arith.constant 0 : i32
    %c0_i32_1 = arith.constant 0 : i32
    return %c0_i32, %c0_i32_0 : i32, i32
  }
  func.func @transform_5(%arg0: i32, %arg1: i32) -> (i32, i32) {
    %c0_i32 = arith.constant 0 : i32
    %c0_i32_0 = arith.constant 0 : i32
    %c0_i32_1 = arith.constant 0 : i32
    return %c0_i32, %c0_i32_0 : i32, i32
  }
  func.func @transform_6(%arg0: i32, %arg1: i32) -> (i32, i32) {
    %c0_i32 = arith.constant 0 : i32
    %c0_i32_0 = arith.constant 0 : i32
    %c0_i32_1 = arith.constant 0 : i32
    return %c0_i32, %c0_i32_0 : i32, i32
  }
  func.func @transform_7(%arg0: i32, %arg1: i32) -> (i32, i32) {
    %c0_i32 = arith.constant 0 : i32
    %c0_i32_0 = arith.constant 0 : i32
    return %arg0, %c0_i32 : i32, i32
  }
}

module attributes {stable_mosaic.version = 11 : i64} {
  func.func @_linear_kernel(%arg0: i32, %arg1: i32, %arg2: memref<32x64xbf16, #tpu.memory_space<vmem>>, %arg3: memref<64x128xbf16, #tpu.memory_space<vmem>>, %arg4: memref<1x128xf32, #tpu.memory_space<vmem>>, %arg5: memref<32x128xbf16, #tpu.memory_space<vmem>>) attributes {dimension_semantics = [#tpu.dimension_semantics<parallel>, #tpu.dimension_semantics<parallel>], iteration_bounds = array<i64: 1, 1>, scalar_prefetch = 0 : i64, scratch_operands = 0 : i64, tpu.core_type = #tpu.core_type<tc>, window_params = [{transform_indices = @transform_0, window_bounds = array<i64: 32, 64>}, {transform_indices = @transform_1, window_bounds = array<i64: 64, 128>}, {transform_indices = @transform_2, window_bounds = array<i64: 1, 128>}, {transform_indices = @transform_3, window_bounds = array<i64: 32, 128>}]} {
    %c0 = arith.constant 0 : index
    %c0_0 = arith.constant 0 : index
    %0 = vector.load %arg2[%c0, %c0_0] : memref<32x64xbf16, #tpu.memory_space<vmem>>, vector<32x64xbf16>
    %c0_1 = arith.constant 0 : index
    %c0_2 = arith.constant 0 : index
    %1 = vector.load %arg3[%c0_1, %c0_2] : memref<64x128xbf16, #tpu.memory_space<vmem>>, vector<64x128xbf16>
    %cst = arith.constant dense<0.000000e+00> : vector<32x128xf32>
    %2 = tpu.matmul %0, %1, %cst {dimension_numbers = #tpu.dot_dimension_numbers<[1], [0], [0], [1], [0, 0, 1, 1], [], []>} : vector<32x64xbf16>, vector<64x128xbf16>, vector<32x128xf32> -> vector<32x128xf32>
    %c0_3 = arith.constant 0 : index
    %c0_4 = arith.constant 0 : index
    %3 = vector.load %arg4[%c0_3, %c0_4] : memref<1x128xf32, #tpu.memory_space<vmem>>, vector<1x128xf32>
    %4 = vector.broadcast %3 : vector<1x128xf32> to vector<32x128xf32>
    %5 = arith.addf %2, %4 : vector<32x128xf32>
    %6 = arith.truncf %5 : vector<32x128xf32> to vector<32x128xbf16>
    %c0_5 = arith.constant 0 : index
    %c0_6 = arith.constant 0 : index
    %7 = vector.load %arg5[%c0_5, %c0_6] : memref<32x128xbf16, #tpu.memory_space<vmem>>, vector<32x128xbf16>
    tpu.vector_store %arg5[%c0_5, %c0_6], %6 {strides = array<i32>} : memref<32x128xbf16, #tpu.memory_space<vmem>>, vector<32x128xbf16>,
    return
  }
  func.func @transform_0(%arg0: i32, %arg1: i32) -> (i32, i32) {
    %c0_i32 = arith.constant 0 : i32
    %c0_i32_0 = arith.constant 0 : i32
    return %arg0, %c0_i32 : i32, i32
  }
  func.func @transform_1(%arg0: i32, %arg1: i32) -> (i32, i32) {
    %c0_i32 = arith.constant 0 : i32
    %c0_i32_0 = arith.constant 0 : i32
    return %c0_i32, %arg1 : i32, i32
  }
  func.func @transform_2(%arg0: i32, %arg1: i32) -> (i32, i32) {
    %c0_i32 = arith.constant 0 : i32
    %c0_i32_0 = arith.constant 0 : i32
    return %c0_i32, %arg1 : i32, i32
  }
  func.func @transform_3(%arg0: i32, %arg1: i32) -> (i32, i32) {
    %c0_i32 = arith.constant 0 : i32
    return %arg0, %arg1 : i32, i32
  }
}

module attributes {stable_mosaic.version = 11 : i64} {
  func.func @_linear_kernel(%arg0: i32, %arg1: i32, %arg2: memref<16x64xbf16, #tpu.memory_space<vmem>>, %arg3: memref<64x192xbf16, #tpu.memory_space<vmem>>, %arg4: memref<1x192xf32, #tpu.memory_space<vmem>>, %arg5: memref<16x192xbf16, #tpu.memory_space<vmem>>) attributes {dimension_semantics = [#tpu.dimension_semantics<parallel>, #tpu.dimension_semantics<parallel>], iteration_bounds = array<i64: 1, 1>, scalar_prefetch = 0 : i64, scratch_operands = 0 : i64, tpu.core_type = #tpu.core_type<tc>, window_params = [{transform_indices = @transform_0, window_bounds = array<i64: 16, 64>}, {transform_indices = @transform_1, window_bounds = array<i64: 64, 192>}, {transform_indices = @transform_2, window_bounds = array<i64: 1, 192>}, {transform_indices = @transform_3, window_bounds = array<i64: 16, 192>}]} {
    %c0 = arith.constant 0 : index
    %c0_0 = arith.constant 0 : index
    %0 = vector.load %arg2[%c0, %c0_0] : memref<16x64xbf16, #tpu.memory_space<vmem>>, vector<16x64xbf16>
    %c0_1 = arith.constant 0 : index
    %c0_2 = arith.constant 0 : index
    %1 = vector.load %arg3[%c0_1, %c0_2] : memref<64x192xbf16, #tpu.memory_space<vmem>>, vector<64x192xbf16>
    %cst = arith.constant dense<0.000000e+00> : vector<16x192xf32>
    %2 = tpu.matmul %0, %1, %cst {dimension_numbers = #tpu.dot_dimension_numbers<[1], [0], [0], [1], [0, 0, 1, 1], [], []>} : vector<16x64xbf16>, vector<64x192xbf16>, vector<16x192xf32> -> vector<16x192xf32>
    %c0_3 = arith.constant 0 : index
    %c0_4 = arith.constant 0 : index
    %3 = vector.load %arg4[%c0_3, %c0_4] : memref<1x192xf32, #tpu.memory_space<vmem>>, vector<1x192xf32>
    %4 = vector.broadcast %3 : vector<1x192xf32> to vector<16x192xf32>
    %5 = arith.addf %2, %4 : vector<16x192xf32>
    %6 = arith.truncf %5 : vector<16x192xf32> to vector<16x192xbf16>
    %c0_5 = arith.constant 0 : index
    %c0_6 = arith.constant 0 : index
    %7 = vector.load %arg5[%c0_5, %c0_6] : memref<16x192xbf16, #tpu.memory_space<vmem>>, vector<16x192xbf16>
    tpu.vector_store %arg5[%c0_5, %c0_6], %6 {strides = array<i32>} : memref<16x192xbf16, #tpu.memory_space<vmem>>, vector<16x192xbf16>,
    return
  }
  func.func @transform_0(%arg0: i32, %arg1: i32) -> (i32, i32) {
    %c0_i32 = arith.constant 0 : i32
    %c0_i32_0 = arith.constant 0 : i32
    return %arg0, %c0_i32 : i32, i32
  }
  func.func @transform_1(%arg0: i32, %arg1: i32) -> (i32, i32) {
    %c0_i32 = arith.constant 0 : i32
    %c0_i32_0 = arith.constant 0 : i32
    return %c0_i32, %arg1 : i32, i32
  }
  func.func @transform_2(%arg0: i32, %arg1: i32) -> (i32, i32) {
    %c0_i32 = arith.constant 0 : i32
    %c0_i32_0 = arith.constant 0 : i32
    return %c0_i32, %arg1 : i32, i32
  }
  func.func @transform_3(%arg0: i32, %arg1: i32) -> (i32, i32) {
    %c0_i32 = arith.constant 0 : i32
    return %arg0, %arg1 : i32, i32
  }
}

module attributes {stable_mosaic.version = 11 : i64} {
  func.func @_self_attn_kernel(%arg0: i32, %arg1: i32, %arg2: memref<1x8x192xbf16, #tpu.memory_space<vmem>>, %arg3: memref<1x1x8xf32, #tpu.memory_space<vmem>>, %arg4: memref<1x8x64xbf16, #tpu.memory_space<vmem>>) attributes {dimension_semantics = [#tpu.dimension_semantics<parallel>, #tpu.dimension_semantics<parallel>], iteration_bounds = array<i64: 2, 1>, scalar_prefetch = 0 : i64, scratch_operands = 0 : i64, tpu.core_type = #tpu.core_type<tc>, window_params = [{transform_indices = @transform_0, window_bounds = array<i64: 1, 8, 192>}, {transform_indices = @transform_1, window_bounds = array<i64: 1, 1, 8>}, {transform_indices = @transform_2, window_bounds = array<i64: 1, 8, 64>}]} {
    %c8_i32 = arith.constant 8 : i32
    %0 = arith.muli %arg1, %c8_i32 : i32
    %1 = tpu.assume_multiple %0, 8 : i32
    %c0 = arith.constant 0 : index
    %c0_0 = arith.constant 0 : index
    %c0_1 = arith.constant 0 : index
    %2 = vector.load %arg3[%c0, %c0_0, %c0_1] : memref<1x1x8xf32, #tpu.memory_space<vmem>>, vector<1x1x8xf32>
    %3 = vector.shape_cast %2 : vector<1x1x8xf32> to vector<1x8xf32>
    %4 = tpu.iota {dimensions = array<i32: 0>} : vector<8x8xi32>
    %5 = vector.broadcast %1 : i32 to vector<8x8xi32>
    %6 = arith.addi %4, %5 : vector<8x8xi32>
    %7 = tpu.iota {dimensions = array<i32: 1>} : vector<8x8xi32>
    %8 = arith.cmpi sgt, %7, %6 : vector<8x8xi32>
    %cst = arith.constant -3.40282347E+38 : f32
    %9 = vector.broadcast %cst : f32 to vector<8x8xf32>
    %10 = vector.shape_cast %3 : vector<1x8xf32> to vector<1x8xf32>
    %11 = vector.broadcast %10 : vector<1x8xf32> to vector<8x8xf32>
    %12 = arith.select %8, %9, %11 : vector<8x8xi1>, vector<8x8xf32>
    %c0_2 = arith.constant 0 : index
    %13 = arith.index_cast %1 : i32 to index
    %c0_3 = arith.constant 0 : index
    %14 = vector.load %arg2[%c0_2, %13, %c0_3] : memref<1x8x192xbf16, #tpu.memory_space<vmem>>, vector<1x8x16xbf16>
    %15 = vector.shape_cast %14 : vector<1x8x16xbf16> to vector<8x16xbf16>
    %c0_4 = arith.constant 0 : index
    %c0_5 = arith.constant 0 : index
    %c64 = arith.constant 64 : index
    %16 = vector.load %arg2[%c0_4, %c0_5, %c64] : memref<1x8x192xbf16, #tpu.memory_space<vmem>>, vector<1x8x16xbf16>
    %17 = vector.shape_cast %16 : vector<1x8x16xbf16> to vector<8x16xbf16>
    %cst_6 = arith.constant dense<0.000000e+00> : vector<8x8xf32>
    %18 = tpu.matmul %15, %17, %cst_6 {dimension_numbers = #tpu.dot_dimension_numbers<[1], [1], [0], [0], [0, 0, 1, 0], [], []>} : vector<8x16xbf16>, vector<8x16xbf16>, vector<8x8xf32> -> vector<8x8xf32>
    %19 = arith.addf %18, %12 : vector<8x8xf32>
    %cst_7 = arith.constant dense<0xFF800000> : vector<8xf32>
    %20 = vector.multi_reduction <maximumf>, %19, %cst_7 [1] : vector<8x8xf32> to vector<8xf32>
    %21 = vector.shape_cast %20 : vector<8xf32> to vector<8x1xf32>
    %22 = vector.broadcast %21 : vector<8x1xf32> to vector<8x8xf32>
    %23 = arith.subf %19, %22 : vector<8x8xf32>
    %24 = math.exp %23 : vector<8x8xf32>
    %cst_8 = arith.constant dense<0.000000e+00> : vector<8xf32>
    %25 = vector.multi_reduction <add>, %24, %cst_8 [1] : vector<8x8xf32> to vector<8xf32>
    %26 = vector.shape_cast %25 : vector<8xf32> to vector<8x1xf32>
    %27 = tpu.reciprocal %26 {approx = true} : vector<8x1xf32> -> vector<8x1xf32>
    %28 = vector.broadcast %27 : vector<8x1xf32> to vector<8x8xf32>
    %29 = arith.mulf %24, %28 : vector<8x8xf32>
    %30 = arith.truncf %29 : vector<8x8xf32> to vector<8x8xbf16>
    %c0_9 = arith.constant 0 : index
    %c0_10 = arith.constant 0 : index
    %c128 = arith.constant 128 : index
    %31 = vector.load %arg2[%c0_9, %c0_10, %c128] : memref<1x8x192xbf16, #tpu.memory_space<vmem>>, vector<1x8x16xbf16>
    %32 = vector.shape_cast %31 : vector<1x8x16xbf16> to vector<8x16xbf16>
    %cst_11 = arith.constant dense<0.000000e+00> : vector<8x16xf32>
    %33 = tpu.matmul %30, %32, %cst_11 {dimension_numbers = #tpu.dot_dimension_numbers<[1], [0], [0], [1], [0, 0, 1, 1], [], []>} : vector<8x8xbf16>, vector<8x16xbf16>, vector<8x16xf32> -> vector<8x16xf32>
    %34 = arith.truncf %33 : vector<8x16xf32> to vector<8x16xbf16>
    %c0_12 = arith.constant 0 : index
    %c0_13 = arith.constant 0 : index
    %c0_14 = arith.constant 0 : index
    %35 = vector.load %arg4[%c0_12, %c0_13, %c0_14] : memref<1x8x64xbf16, #tpu.memory_space<vmem>>, vector<1x8x16xbf16>
    %36 = vector.shape_cast %35 : vector<1x8x16xbf16> to vector<8x16xbf16>
    %37 = vector.shape_cast %34 : vector<8x16xbf16> to vector<1x8x16xbf16>
    tpu.vector_store %arg4[%c0_12, %c0_13, %c0_14], %37 {strides = array<i32>} : memref<1x8x64xbf16, #tpu.memory_space<vmem>>, vector<1x8x16xbf16>,
    %c0_15 = arith.constant 0 : index
    %38 = arith.index_cast %1 : i32 to index
    %c16 = arith.constant 16 : index
    %39 = vector.load %arg2[%c0_15, %38, %c16] : memref<1x8x192xbf16, #tpu.memory_space<vmem>>, vector<1x8x16xbf16>
    %40 = vector.shape_cast %39 : vector<1x8x16xbf16> to vector<8x16xbf16>
    %c0_16 = arith.constant 0 : index
    %c0_17 = arith.constant 0 : index
    %c80 = arith.constant 80 : index
    %41 = vector.load %arg2[%c0_16, %c0_17, %c80] : memref<1x8x192xbf16, #tpu.memory_space<vmem>>, vector<1x8x16xbf16>
    %42 = vector.shape_cast %41 : vector<1x8x16xbf16> to vector<8x16xbf16>
    %cst_18 = arith.constant dense<0.000000e+00> : vector<8x8xf32>
    %43 = tpu.matmul %40, %42, %cst_18 {dimension_numbers = #tpu.dot_dimension_numbers<[1], [1], [0], [0], [0, 0, 1, 0], [], []>} : vector<8x16xbf16>, vector<8x16xbf16>, vector<8x8xf32> -> vector<8x8xf32>
    %44 = arith.addf %43, %12 : vector<8x8xf32>
    %cst_19 = arith.constant dense<0xFF800000> : vector<8xf32>
    %45 = vector.multi_reduction <maximumf>, %44, %cst_19 [1] : vector<8x8xf32> to vector<8xf32>
    %46 = vector.shape_cast %45 : vector<8xf32> to vector<8x1xf32>
    %47 = vector.broadcast %46 : vector<8x1xf32> to vector<8x8xf32>
    %48 = arith.subf %44, %47 : vector<8x8xf32>
    %49 = math.exp %48 : vector<8x8xf32>
    %cst_20 = arith.constant dense<0.000000e+00> : vector<8xf32>
    %50 = vector.multi_reduction <add>, %49, %cst_20 [1] : vector<8x8xf32> to vector<8xf32>
    %51 = vector.shape_cast %50 : vector<8xf32> to vector<8x1xf32>
    %52 = tpu.reciprocal %51 {approx = true} : vector<8x1xf32> -> vector<8x1xf32>
    %53 = vector.broadcast %52 : vector<8x1xf32> to vector<8x8xf32>
    %54 = arith.mulf %49, %53 : vector<8x8xf32>
    %55 = arith.truncf %54 : vector<8x8xf32> to vector<8x8xbf16>
    %c0_21 = arith.constant 0 : index
    %c0_22 = arith.constant 0 : index
    %c144 = arith.constant 144 : index
    %56 = vector.load %arg2[%c0_21, %c0_22, %c144] : memref<1x8x192xbf16, #tpu.memory_space<vmem>>, vector<1x8x16xbf16>
    %57 = vector.shape_cast %56 : vector<1x8x16xbf16> to vector<8x16xbf16>
    %cst_23 = arith.constant dense<0.000000e+00> : vector<8x16xf32>
    %58 = tpu.matmul %55, %57, %cst_23 {dimension_numbers = #tpu.dot_dimension_numbers<[1], [0], [0], [1], [0, 0, 1, 1], [], []>} : vector<8x8xbf16>, vector<8x16xbf16>, vector<8x16xf32> -> vector<8x16xf32>
    %59 = arith.truncf %58 : vector<8x16xf32> to vector<8x16xbf16>
    %c0_24 = arith.constant 0 : index
    %c0_25 = arith.constant 0 : index
    %c16_26 = arith.constant 16 : index
    %60 = vector.load %arg4[%c0_24, %c0_25, %c16_26] : memref<1x8x64xbf16, #tpu.memory_space<vmem>>, vector<1x8x16xbf16>
    %61 = vector.shape_cast %60 : vector<1x8x16xbf16> to vector<8x16xbf16>
    %62 = vector.shape_cast %59 : vector<8x16xbf16> to vector<1x8x16xbf16>
    tpu.vector_store %arg4[%c0_24, %c0_25, %c16_26], %62 {strides = array<i32>} : memref<1x8x64xbf16, #tpu.memory_space<vmem>>, vector<1x8x16xbf16>,
    %c0_27 = arith.constant 0 : index
    %63 = arith.index_cast %1 : i32 to index
    %c32 = arith.constant 32 : index
    %64 = vector.load %arg2[%c0_27, %63, %c32] : memref<1x8x192xbf16, #tpu.memory_space<vmem>>, vector<1x8x16xbf16>
    %65 = vector.shape_cast %64 : vector<1x8x16xbf16> to vector<8x16xbf16>
    %c0_28 = arith.constant 0 : index
    %c0_29 = arith.constant 0 : index
    %c96 = arith.constant 96 : index
    %66 = vector.load %arg2[%c0_28, %c0_29, %c96] : memref<1x8x192xbf16, #tpu.memory_space<vmem>>, vector<1x8x16xbf16>
    %67 = vector.shape_cast %66 : vector<1x8x16xbf16> to vector<8x16xbf16>
    %cst_30 = arith.constant dense<0.000000e+00> : vector<8x8xf32>
    %68 = tpu.matmul %65, %67, %cst_30 {dimension_numbers = #tpu.dot_dimension_numbers<[1], [1], [0], [0], [0, 0, 1, 0], [], []>} : vector<8x16xbf16>, vector<8x16xbf16>, vector<8x8xf32> -> vector<8x8xf32>
    %69 = arith.addf %68, %12 : vector<8x8xf32>
    %cst_31 = arith.constant dense<0xFF800000> : vector<8xf32>
    %70 = vector.multi_reduction <maximumf>, %69, %cst_31 [1] : vector<8x8xf32> to vector<8xf32>
    %71 = vector.shape_cast %70 : vector<8xf32> to vector<8x1xf32>
    %72 = vector.broadcast %71 : vector<8x1xf32> to vector<8x8xf32>
    %73 = arith.subf %69, %72 : vector<8x8xf32>
    %74 = math.exp %73 : vector<8x8xf32>
    %cst_32 = arith.constant dense<0.000000e+00> : vector<8xf32>
    %75 = vector.multi_reduction <add>, %74, %cst_32 [1] : vector<8x8xf32> to vector<8xf32>
    %76 = vector.shape_cast %75 : vector<8xf32> to vector<8x1xf32>
    %77 = tpu.reciprocal %76 {approx = true} : vector<8x1xf32> -> vector<8x1xf32>
    %78 = vector.broadcast %77 : vector<8x1xf32> to vector<8x8xf32>
    %79 = arith.mulf %74, %78 : vector<8x8xf32>
    %80 = arith.truncf %79 : vector<8x8xf32> to vector<8x8xbf16>
    %c0_33 = arith.constant 0 : index
    %c0_34 = arith.constant 0 : index
    %c160 = arith.constant 160 : index
    %81 = vector.load %arg2[%c0_33, %c0_34, %c160] : memref<1x8x192xbf16, #tpu.memory_space<vmem>>, vector<1x8x16xbf16>
    %82 = vector.shape_cast %81 : vector<1x8x16xbf16> to vector<8x16xbf16>
    %cst_35 = arith.constant dense<0.000000e+00> : vector<8x16xf32>
    %83 = tpu.matmul %80, %82, %cst_35 {dimension_numbers = #tpu.dot_dimension_numbers<[1], [0], [0], [1], [0, 0, 1, 1], [], []>} : vector<8x8xbf16>, vector<8x16xbf16>, vector<8x16xf32> -> vector<8x16xf32>
    %84 = arith.truncf %83 : vector<8x16xf32> to vector<8x16xbf16>
    %c0_36 = arith.constant 0 : index
    %c0_37 = arith.constant 0 : index
    %c32_38 = arith.constant 32 : index
    %85 = vector.load %arg4[%c0_36, %c0_37, %c32_38] : memref<1x8x64xbf16, #tpu.memory_space<vmem>>, vector<1x8x16xbf16>
    %86 = vector.shape_cast %85 : vector<1x8x16xbf16> to vector<8x16xbf16>
    %87 = vector.shape_cast %84 : vector<8x16xbf16> to vector<1x8x16xbf16>
    tpu.vector_store %arg4[%c0_36, %c0_37, %c32_38], %87 {strides = array<i32>} : memref<1x8x64xbf16, #tpu.memory_space<vmem>>, vector<1x8x16xbf16>,
    %c0_39 = arith.constant 0 : index
    %88 = arith.index_cast %1 : i32 to index
    %c48 = arith.constant 48 : index
    %89 = vector.load %arg2[%c0_39, %88, %c48] : memref<1x8x192xbf16, #tpu.memory_space<vmem>>, vector<1x8x16xbf16>
    %90 = vector.shape_cast %89 : vector<1x8x16xbf16> to vector<8x16xbf16>
    %c0_40 = arith.constant 0 : index
    %c0_41 = arith.constant 0 : index
    %c112 = arith.constant 112 : index
    %91 = vector.load %arg2[%c0_40, %c0_41, %c112] : memref<1x8x192xbf16, #tpu.memory_space<vmem>>, vector<1x8x16xbf16>
    %92 = vector.shape_cast %91 : vector<1x8x16xbf16> to vector<8x16xbf16>
    %cst_42 = arith.constant dense<0.000000e+00> : vector<8x8xf32>
    %93 = tpu.matmul %90, %92, %cst_42 {dimension_numbers = #tpu.dot_dimension_numbers<[1], [1], [0], [0], [0, 0, 1, 0], [], []>} : vector<8x16xbf16>, vector<8x16xbf16>, vector<8x8xf32> -> vector<8x8xf32>
    %94 = arith.addf %93, %12 : vector<8x8xf32>
    %cst_43 = arith.constant dense<0xFF800000> : vector<8xf32>
    %95 = vector.multi_reduction <maximumf>, %94, %cst_43 [1] : vector<8x8xf32> to vector<8xf32>
    %96 = vector.shape_cast %95 : vector<8xf32> to vector<8x1xf32>
    %97 = vector.broadcast %96 : vector<8x1xf32> to vector<8x8xf32>
    %98 = arith.subf %94, %97 : vector<8x8xf32>
    %99 = math.exp %98 : vector<8x8xf32>
    %cst_44 = arith.constant dense<0.000000e+00> : vector<8xf32>
    %100 = vector.multi_reduction <add>, %99, %cst_44 [1] : vector<8x8xf32> to vector<8xf32>
    %101 = vector.shape_cast %100 : vector<8xf32> to vector<8x1xf32>
    %102 = tpu.reciprocal %101 {approx = true} : vector<8x1xf32> -> vector<8x1xf32>
    %103 = vector.broadcast %102 : vector<8x1xf32> to vector<8x8xf32>
    %104 = arith.mulf %99, %103 : vector<8x8xf32>
    %105 = arith.truncf %104 : vector<8x8xf32> to vector<8x8xbf16>
    %c0_45 = arith.constant 0 : index
    %c0_46 = arith.constant 0 : index
    %c176 = arith.constant 176 : index
    %106 = vector.load %arg2[%c0_45, %c0_46, %c176] : memref<1x8x192xbf16, #tpu.memory_space<vmem>>, vector<1x8x16xbf16>
    %107 = vector.shape_cast %106 : vector<1x8x16xbf16> to vector<8x16xbf16>
    %cst_47 = arith.constant dense<0.000000e+00> : vector<8x16xf32>
    %108 = tpu.matmul %105, %107, %cst_47 {dimension_numbers = #tpu.dot_dimension_numbers<[1], [0], [0], [1], [0, 0, 1, 1], [], []>} : vector<8x8xbf16>, vector<8x16xbf16>, vector<8x16xf32> -> vector<8x16xf32>
    %109 = arith.truncf %108 : vector<8x16xf32> to vector<8x16xbf16>
    %c0_48 = arith.constant 0 : index
    %c0_49 = arith.constant 0 : index
    %c48_50 = arith.constant 48 : index
    %110 = vector.load %arg4[%c0_48, %c0_49, %c48_50] : memref<1x8x64xbf16, #tpu.memory_space<vmem>>, vector<1x8x16xbf16>
    %111 = vector.shape_cast %110 : vector<1x8x16xbf16> to vector<8x16xbf16>
    %112 = vector.shape_cast %109 : vector<8x16xbf16> to vector<1x8x16xbf16>
    tpu.vector_store %arg4[%c0_48, %c0_49, %c48_50], %112 {strides = array<i32>} : memref<1x8x64xbf16, #tpu.memory_space<vmem>>, vector<1x8x16xbf16>,
    return
  }
  func.func @transform_0(%arg0: i32, %arg1: i32) -> (i32, i32, i32) {
    %c0_i32 = arith.constant 0 : i32
    %c0_i32_0 = arith.constant 0 : i32
    %c0_i32_1 = arith.constant 0 : i32
    return %arg0, %c0_i32, %c0_i32_0 : i32, i32, i32
  }
  func.func @transform_1(%arg0: i32, %arg1: i32) -> (i32, i32, i32) {
    %c0_i32 = arith.constant 0 : i32
    %c0_i32_0 = arith.constant 0 : i32
    %c0_i32_1 = arith.constant 0 : i32
    return %arg0, %c0_i32, %c0_i32_0 : i32, i32, i32
  }
  func.func @transform_2(%arg0: i32, %arg1: i32) -> (i32, i32, i32) {
    %c0_i32 = arith.constant 0 : i32
    %c0_i32_0 = arith.constant 0 : i32
    return %arg0, %arg1, %c0_i32 : i32, i32, i32
  }
}

module attributes {stable_mosaic.version = 11 : i64} {
  func.func @_resid_oproj_ln_kernel(%arg0: i32, %arg1: memref<16x64xbf16, #tpu.memory_space<vmem>>, %arg2: memref<16x64xbf16, #tpu.memory_space<vmem>>, %arg3: memref<64x64xbf16, #tpu.memory_space<vmem>>, %arg4: memref<1x64xf32, #tpu.memory_space<vmem>>, %arg5: memref<1x64xf32, #tpu.memory_space<vmem>>, %arg6: memref<1x64xf32, #tpu.memory_space<vmem>>, %arg7: memref<16x64xbf16, #tpu.memory_space<vmem>>) attributes {dimension_semantics = [#tpu.dimension_semantics<parallel>], iteration_bounds = array<i64: 1>, scalar_prefetch = 0 : i64, scratch_operands = 0 : i64, tpu.core_type = #tpu.core_type<tc>, window_params = [{transform_indices = @transform_0, window_bounds = array<i64: 16, 64>}, {transform_indices = @transform_1, window_bounds = array<i64: 16, 64>}, {pipeline_mode = #tpu.pipeline_mode<synchronous>, transform_indices = @transform_2, window_bounds = array<i64: 64, 64>}, {pipeline_mode = #tpu.pipeline_mode<synchronous>, transform_indices = @transform_3, window_bounds = array<i64: 1, 64>}, {pipeline_mode = #tpu.pipeline_mode<synchronous>, transform_indices = @transform_4, window_bounds = array<i64: 1, 64>}, {pipeline_mode = #tpu.pipeline_mode<synchronous>, transform_indices = @transform_5, window_bounds = array<i64: 1, 64>}, {transform_indices = @transform_6, window_bounds = array<i64: 16, 64>}]} {
    %c0 = arith.constant 0 : index
    %c0_0 = arith.constant 0 : index
    %0 = vector.load %arg1[%c0, %c0_0] : memref<16x64xbf16, #tpu.memory_space<vmem>>, vector<16x64xbf16>
    %c0_1 = arith.constant 0 : index
    %c0_2 = arith.constant 0 : index
    %1 = vector.load %arg3[%c0_1, %c0_2] : memref<64x64xbf16, #tpu.memory_space<vmem>>, vector<64x64xbf16>
    %cst = arith.constant dense<0.000000e+00> : vector<16x64xf32>
    %2 = tpu.matmul %0, %1, %cst {dimension_numbers = #tpu.dot_dimension_numbers<[1], [0], [0], [1], [0, 0, 1, 1], [], []>} : vector<16x64xbf16>, vector<64x64xbf16>, vector<16x64xf32> -> vector<16x64xf32>
    %c0_3 = arith.constant 0 : index
    %c0_4 = arith.constant 0 : index
    %3 = vector.load %arg4[%c0_3, %c0_4] : memref<1x64xf32, #tpu.memory_space<vmem>>, vector<1x64xf32>
    %4 = vector.broadcast %3 : vector<1x64xf32> to vector<16x64xf32>
    %5 = arith.addf %2, %4 : vector<16x64xf32>
    %c0_5 = arith.constant 0 : index
    %c0_6 = arith.constant 0 : index
    %6 = vector.load %arg2[%c0_5, %c0_6] : memref<16x64xbf16, #tpu.memory_space<vmem>>, vector<16x64xbf16>
    %7 = arith.extf %6 : vector<16x64xbf16> to vector<16x64xf32>
    %8 = arith.addf %5, %7 : vector<16x64xf32>
    %cst_7 = arith.constant dense<0.000000e+00> : vector<16xf32>
    %9 = vector.multi_reduction <add>, %8, %cst_7 [1] : vector<16x64xf32> to vector<16xf32>
    %10 = vector.shape_cast %9 : vector<16xf32> to vector<16x1xf32>
    %cst_8 = arith.constant 6.400000e+01 : f32
    %11 = vector.broadcast %cst_8 : f32 to vector<16x1xf32>
    %12 = arith.divf %10, %11 : vector<16x1xf32>
    %13 = vector.broadcast %12 : vector<16x1xf32> to vector<16x64xf32>
    %14 = arith.subf %8, %13 : vector<16x64xf32>
    %15 = arith.mulf %14, %14 : vector<16x64xf32>
    %cst_9 = arith.constant dense<0.000000e+00> : vector<16xf32>
    %16 = vector.multi_reduction <add>, %15, %cst_9 [1] : vector<16x64xf32> to vector<16xf32>
    %17 = vector.shape_cast %16 : vector<16xf32> to vector<16x1xf32>
    %cst_10 = arith.constant 6.400000e+01 : f32
    %18 = vector.broadcast %cst_10 : f32 to vector<16x1xf32>
    %19 = arith.divf %17, %18 : vector<16x1xf32>
    %cst_11 = arith.constant 9.99999974E-6 : f32
    %20 = vector.broadcast %cst_11 : f32 to vector<16x1xf32>
    %21 = arith.addf %19, %20 : vector<16x1xf32>
    %22 = math.rsqrt %21 : vector<16x1xf32>
    %23 = vector.broadcast %22 : vector<16x1xf32> to vector<16x64xf32>
    %24 = arith.mulf %14, %23 : vector<16x64xf32>
    %c0_12 = arith.constant 0 : index
    %c0_13 = arith.constant 0 : index
    %25 = vector.load %arg5[%c0_12, %c0_13] : memref<1x64xf32, #tpu.memory_space<vmem>>, vector<1x64xf32>
    %26 = vector.broadcast %25 : vector<1x64xf32> to vector<16x64xf32>
    %27 = arith.mulf %24, %26 : vector<16x64xf32>
    %c0_14 = arith.constant 0 : index
    %c0_15 = arith.constant 0 : index
    %28 = vector.load %arg6[%c0_14, %c0_15] : memref<1x64xf32, #tpu.memory_space<vmem>>, vector<1x64xf32>
    %29 = vector.broadcast %28 : vector<1x64xf32> to vector<16x64xf32>
    %30 = arith.addf %27, %29 : vector<16x64xf32>
    %31 = arith.truncf %30 : vector<16x64xf32> to vector<16x64xbf16>
    %c0_16 = arith.constant 0 : index
    %c0_17 = arith.constant 0 : index
    %32 = vector.load %arg7[%c0_16, %c0_17] : memref<16x64xbf16, #tpu.memory_space<vmem>>, vector<16x64xbf16>
    tpu.vector_store %arg7[%c0_16, %c0_17], %31 {strides = array<i32>} : memref<16x64xbf16, #tpu.memory_space<vmem>>, vector<16x64xbf16>,
    return
  }
  func.func @transform_0(%arg0: i32) -> (i32, i32) {
    %c0_i32 = arith.constant 0 : i32
    %c0_i32_0 = arith.constant 0 : i32
    return %arg0, %c0_i32 : i32, i32
  }
  func.func @transform_1(%arg0: i32) -> (i32, i32) {
    %c0_i32 = arith.constant 0 : i32
    %c0_i32_0 = arith.constant 0 : i32
    return %arg0, %c0_i32 : i32, i32
  }
  func.func @transform_2(%arg0: i32) -> (i32, i32) {
    %c0_i32 = arith.constant 0 : i32
    %c0_i32_0 = arith.constant 0 : i32
    %c0_i32_1 = arith.constant 0 : i32
    return %c0_i32, %c0_i32_0 : i32, i32
  }
  func.func @transform_3(%arg0: i32) -> (i32, i32) {
    %c0_i32 = arith.constant 0 : i32
    %c0_i32_0 = arith.constant 0 : i32
    %c0_i32_1 = arith.constant 0 : i32
    return %c0_i32, %c0_i32_0 : i32, i32
  }
  func.func @transform_4(%arg0: i32) -> (i32, i32) {
    %c0_i32 = arith.constant 0 : i32
    %c0_i32_0 = arith.constant 0 : i32
    %c0_i32_1 = arith.constant 0 : i32
    return %c0_i32, %c0_i32_0 : i32, i32
  }
  func.func @transform_5(%arg0: i32) -> (i32, i32) {
    %c0_i32 = arith.constant 0 : i32
    %c0_i32_0 = arith.constant 0 : i32
    %c0_i32_1 = arith.constant 0 : i32
    return %c0_i32, %c0_i32_0 : i32, i32
  }
  func.func @transform_6(%arg0: i32) -> (i32, i32) {
    %c0_i32 = arith.constant 0 : i32
    %c0_i32_0 = arith.constant 0 : i32
    return %arg0, %c0_i32 : i32, i32
  }
}

module attributes {stable_mosaic.version = 11 : i64} {
  func.func @_linear_kernel(%arg0: i32, %arg1: i32, %arg2: memref<16x64xbf16, #tpu.memory_space<vmem>>, %arg3: memref<64x64xbf16, #tpu.memory_space<vmem>>, %arg4: memref<1x64xf32, #tpu.memory_space<vmem>>, %arg5: memref<16x64xbf16, #tpu.memory_space<vmem>>) attributes {dimension_semantics = [#tpu.dimension_semantics<parallel>, #tpu.dimension_semantics<parallel>], iteration_bounds = array<i64: 1, 1>, scalar_prefetch = 0 : i64, scratch_operands = 0 : i64, tpu.core_type = #tpu.core_type<tc>, window_params = [{transform_indices = @transform_0, window_bounds = array<i64: 16, 64>}, {transform_indices = @transform_1, window_bounds = array<i64: 64, 64>}, {transform_indices = @transform_2, window_bounds = array<i64: 1, 64>}, {transform_indices = @transform_3, window_bounds = array<i64: 16, 64>}]} {
    %c0 = arith.constant 0 : index
    %c0_0 = arith.constant 0 : index
    %0 = vector.load %arg2[%c0, %c0_0] : memref<16x64xbf16, #tpu.memory_space<vmem>>, vector<16x64xbf16>
    %c0_1 = arith.constant 0 : index
    %c0_2 = arith.constant 0 : index
    %1 = vector.load %arg3[%c0_1, %c0_2] : memref<64x64xbf16, #tpu.memory_space<vmem>>, vector<64x64xbf16>
    %cst = arith.constant dense<0.000000e+00> : vector<16x64xf32>
    %2 = tpu.matmul %0, %1, %cst {dimension_numbers = #tpu.dot_dimension_numbers<[1], [0], [0], [1], [0, 0, 1, 1], [], []>} : vector<16x64xbf16>, vector<64x64xbf16>, vector<16x64xf32> -> vector<16x64xf32>
    %c0_3 = arith.constant 0 : index
    %c0_4 = arith.constant 0 : index
    %3 = vector.load %arg4[%c0_3, %c0_4] : memref<1x64xf32, #tpu.memory_space<vmem>>, vector<1x64xf32>
    %4 = vector.broadcast %3 : vector<1x64xf32> to vector<16x64xf32>
    %5 = arith.addf %2, %4 : vector<16x64xf32>
    %6 = arith.truncf %5 : vector<16x64xf32> to vector<16x64xbf16>
    %c0_5 = arith.constant 0 : index
    %c0_6 = arith.constant 0 : index
    %7 = vector.load %arg5[%c0_5, %c0_6] : memref<16x64xbf16, #tpu.memory_space<vmem>>, vector<16x64xbf16>
    tpu.vector_store %arg5[%c0_5, %c0_6], %6 {strides = array<i32>} : memref<16x64xbf16, #tpu.memory_space<vmem>>, vector<16x64xbf16>,
    return
  }
  func.func @transform_0(%arg0: i32, %arg1: i32) -> (i32, i32) {
    %c0_i32 = arith.constant 0 : i32
    %c0_i32_0 = arith.constant 0 : i32
    return %arg0, %c0_i32 : i32, i32
  }
  func.func @transform_1(%arg0: i32, %arg1: i32) -> (i32, i32) {
    %c0_i32 = arith.constant 0 : i32
    %c0_i32_0 = arith.constant 0 : i32
    return %c0_i32, %arg1 : i32, i32
  }
  func.func @transform_2(%arg0: i32, %arg1: i32) -> (i32, i32) {
    %c0_i32 = arith.constant 0 : i32
    %c0_i32_0 = arith.constant 0 : i32
    return %c0_i32, %arg1 : i32, i32
  }
  func.func @transform_3(%arg0: i32, %arg1: i32) -> (i32, i32) {
    %c0_i32 = arith.constant 0 : i32
    return %arg0, %arg1 : i32, i32
  }
}

module attributes {stable_mosaic.version = 11 : i64} {
  func.func @_cross_attn_kernel(%arg0: i32, %arg1: i32, %arg2: memref<1x8x64xbf16, #tpu.memory_space<vmem>>, %arg3: memref<1x16x128xbf16, #tpu.memory_space<vmem>>, %arg4: memref<1x1x16xf32, #tpu.memory_space<vmem>>, %arg5: memref<1x8x64xbf16, #tpu.memory_space<vmem>>) attributes {dimension_semantics = [#tpu.dimension_semantics<parallel>, #tpu.dimension_semantics<parallel>], iteration_bounds = array<i64: 2, 1>, scalar_prefetch = 0 : i64, scratch_operands = 0 : i64, tpu.core_type = #tpu.core_type<tc>, window_params = [{transform_indices = @transform_0, window_bounds = array<i64: 1, 8, 64>}, {transform_indices = @transform_1, window_bounds = array<i64: 1, 16, 128>}, {transform_indices = @transform_2, window_bounds = array<i64: 1, 1, 16>}, {transform_indices = @transform_3, window_bounds = array<i64: 1, 8, 64>}]} {
    %c0 = arith.constant 0 : index
    %c0_0 = arith.constant 0 : index
    %c0_1 = arith.constant 0 : index
    %0 = vector.load %arg4[%c0, %c0_0, %c0_1] : memref<1x1x16xf32, #tpu.memory_space<vmem>>, vector<1x1x16xf32>
    %1 = vector.shape_cast %0 : vector<1x1x16xf32> to vector<1x16xf32>
    %c0_2 = arith.constant 0 : index
    %c0_3 = arith.constant 0 : index
    %c0_4 = arith.constant 0 : index
    %2 = vector.load %arg2[%c0_2, %c0_3, %c0_4] : memref<1x8x64xbf16, #tpu.memory_space<vmem>>, vector<1x8x16xbf16>
    %3 = vector.shape_cast %2 : vector<1x8x16xbf16> to vector<8x16xbf16>
    %c0_5 = arith.constant 0 : index
    %c0_6 = arith.constant 0 : index
    %c0_7 = arith.constant 0 : index
    %4 = vector.load %arg3[%c0_5, %c0_6, %c0_7] : memref<1x16x128xbf16, #tpu.memory_space<vmem>>, vector<1x16x16xbf16>
    %5 = vector.shape_cast %4 : vector<1x16x16xbf16> to vector<16x16xbf16>
    %cst = arith.constant dense<0.000000e+00> : vector<8x16xf32>
    %6 = tpu.matmul %3, %5, %cst {dimension_numbers = #tpu.dot_dimension_numbers<[1], [1], [0], [0], [0, 0, 1, 0], [], []>} : vector<8x16xbf16>, vector<16x16xbf16>, vector<8x16xf32> -> vector<8x16xf32>
    %7 = vector.broadcast %1 : vector<1x16xf32> to vector<8x16xf32>
    %8 = arith.addf %6, %7 : vector<8x16xf32>
    %cst_8 = arith.constant dense<0xFF800000> : vector<8xf32>
    %9 = vector.multi_reduction <maximumf>, %8, %cst_8 [1] : vector<8x16xf32> to vector<8xf32>
    %10 = vector.shape_cast %9 : vector<8xf32> to vector<8x1xf32>
    %11 = vector.broadcast %10 : vector<8x1xf32> to vector<8x16xf32>
    %12 = arith.subf %8, %11 : vector<8x16xf32>
    %13 = math.exp %12 : vector<8x16xf32>
    %cst_9 = arith.constant dense<0.000000e+00> : vector<8xf32>
    %14 = vector.multi_reduction <add>, %13, %cst_9 [1] : vector<8x16xf32> to vector<8xf32>
    %15 = vector.shape_cast %14 : vector<8xf32> to vector<8x1xf32>
    %16 = tpu.reciprocal %15 {approx = true} : vector<8x1xf32> -> vector<8x1xf32>
    %17 = vector.broadcast %16 : vector<8x1xf32> to vector<8x16xf32>
    %18 = arith.mulf %13, %17 : vector<8x16xf32>
    %19 = arith.truncf %18 : vector<8x16xf32> to vector<8x16xbf16>
    %c0_10 = arith.constant 0 : index
    %c0_11 = arith.constant 0 : index
    %c64 = arith.constant 64 : index
    %20 = vector.load %arg3[%c0_10, %c0_11, %c64] : memref<1x16x128xbf16, #tpu.memory_space<vmem>>, vector<1x16x16xbf16>
    %21 = vector.shape_cast %20 : vector<1x16x16xbf16> to vector<16x16xbf16>
    %cst_12 = arith.constant dense<0.000000e+00> : vector<8x16xf32>
    %22 = tpu.matmul %19, %21, %cst_12 {dimension_numbers = #tpu.dot_dimension_numbers<[1], [0], [0], [1], [0, 0, 1, 1], [], []>} : vector<8x16xbf16>, vector<16x16xbf16>, vector<8x16xf32> -> vector<8x16xf32>
    %23 = arith.truncf %22 : vector<8x16xf32> to vector<8x16xbf16>
    %c0_13 = arith.constant 0 : index
    %c0_14 = arith.constant 0 : index
    %c0_15 = arith.constant 0 : index
    %24 = vector.load %arg5[%c0_13, %c0_14, %c0_15] : memref<1x8x64xbf16, #tpu.memory_space<vmem>>, vector<1x8x16xbf16>
    %25 = vector.shape_cast %24 : vector<1x8x16xbf16> to vector<8x16xbf16>
    %26 = vector.shape_cast %23 : vector<8x16xbf16> to vector<1x8x16xbf16>
    tpu.vector_store %arg5[%c0_13, %c0_14, %c0_15], %26 {strides = array<i32>} : memref<1x8x64xbf16, #tpu.memory_space<vmem>>, vector<1x8x16xbf16>,
    %c0_16 = arith.constant 0 : index
    %c0_17 = arith.constant 0 : index
    %c16 = arith.constant 16 : index
    %27 = vector.load %arg2[%c0_16, %c0_17, %c16] : memref<1x8x64xbf16, #tpu.memory_space<vmem>>, vector<1x8x16xbf16>
    %28 = vector.shape_cast %27 : vector<1x8x16xbf16> to vector<8x16xbf16>
    %c0_18 = arith.constant 0 : index
    %c0_19 = arith.constant 0 : index
    %c16_20 = arith.constant 16 : index
    %29 = vector.load %arg3[%c0_18, %c0_19, %c16_20] : memref<1x16x128xbf16, #tpu.memory_space<vmem>>, vector<1x16x16xbf16>
    %30 = vector.shape_cast %29 : vector<1x16x16xbf16> to vector<16x16xbf16>
    %cst_21 = arith.constant dense<0.000000e+00> : vector<8x16xf32>
    %31 = tpu.matmul %28, %30, %cst_21 {dimension_numbers = #tpu.dot_dimension_numbers<[1], [1], [0], [0], [0, 0, 1, 0], [], []>} : vector<8x16xbf16>, vector<16x16xbf16>, vector<8x16xf32> -> vector<8x16xf32>
    %32 = vector.broadcast %1 : vector<1x16xf32> to vector<8x16xf32>
    %33 = arith.addf %31, %32 : vector<8x16xf32>
    %cst_22 = arith.constant dense<0xFF800000> : vector<8xf32>
    %34 = vector.multi_reduction <maximumf>, %33, %cst_22 [1] : vector<8x16xf32> to vector<8xf32>
    %35 = vector.shape_cast %34 : vector<8xf32> to vector<8x1xf32>
    %36 = vector.broadcast %35 : vector<8x1xf32> to vector<8x16xf32>
    %37 = arith.subf %33, %36 : vector<8x16xf32>
    %38 = math.exp %37 : vector<8x16xf32>
    %cst_23 = arith.constant dense<0.000000e+00> : vector<8xf32>
    %39 = vector.multi_reduction <add>, %38, %cst_23 [1] : vector<8x16xf32> to vector<8xf32>
    %40 = vector.shape_cast %39 : vector<8xf32> to vector<8x1xf32>
    %41 = tpu.reciprocal %40 {approx = true} : vector<8x1xf32> -> vector<8x1xf32>
    %42 = vector.broadcast %41 : vector<8x1xf32> to vector<8x16xf32>
    %43 = arith.mulf %38, %42 : vector<8x16xf32>
    %44 = arith.truncf %43 : vector<8x16xf32> to vector<8x16xbf16>
    %c0_24 = arith.constant 0 : index
    %c0_25 = arith.constant 0 : index
    %c80 = arith.constant 80 : index
    %45 = vector.load %arg3[%c0_24, %c0_25, %c80] : memref<1x16x128xbf16, #tpu.memory_space<vmem>>, vector<1x16x16xbf16>
    %46 = vector.shape_cast %45 : vector<1x16x16xbf16> to vector<16x16xbf16>
    %cst_26 = arith.constant dense<0.000000e+00> : vector<8x16xf32>
    %47 = tpu.matmul %44, %46, %cst_26 {dimension_numbers = #tpu.dot_dimension_numbers<[1], [0], [0], [1], [0, 0, 1, 1], [], []>} : vector<8x16xbf16>, vector<16x16xbf16>, vector<8x16xf32> -> vector<8x16xf32>
    %48 = arith.truncf %47 : vector<8x16xf32> to vector<8x16xbf16>
    %c0_27 = arith.constant 0 : index
    %c0_28 = arith.constant 0 : index
    %c16_29 = arith.constant 16 : index
    %49 = vector.load %arg5[%c0_27, %c0_28, %c16_29] : memref<1x8x64xbf16, #tpu.memory_space<vmem>>, vector<1x8x16xbf16>
    %50 = vector.shape_cast %49 : vector<1x8x16xbf16> to vector<8x16xbf16>
    %51 = vector.shape_cast %48 : vector<8x16xbf16> to vector<1x8x16xbf16>
    tpu.vector_store %arg5[%c0_27, %c0_28, %c16_29], %51 {strides = array<i32>} : memref<1x8x64xbf16, #tpu.memory_space<vmem>>, vector<1x8x16xbf16>,
    %c0_30 = arith.constant 0 : index
    %c0_31 = arith.constant 0 : index
    %c32 = arith.constant 32 : index
    %52 = vector.load %arg2[%c0_30, %c0_31, %c32] : memref<1x8x64xbf16, #tpu.memory_space<vmem>>, vector<1x8x16xbf16>
    %53 = vector.shape_cast %52 : vector<1x8x16xbf16> to vector<8x16xbf16>
    %c0_32 = arith.constant 0 : index
    %c0_33 = arith.constant 0 : index
    %c32_34 = arith.constant 32 : index
    %54 = vector.load %arg3[%c0_32, %c0_33, %c32_34] : memref<1x16x128xbf16, #tpu.memory_space<vmem>>, vector<1x16x16xbf16>
    %55 = vector.shape_cast %54 : vector<1x16x16xbf16> to vector<16x16xbf16>
    %cst_35 = arith.constant dense<0.000000e+00> : vector<8x16xf32>
    %56 = tpu.matmul %53, %55, %cst_35 {dimension_numbers = #tpu.dot_dimension_numbers<[1], [1], [0], [0], [0, 0, 1, 0], [], []>} : vector<8x16xbf16>, vector<16x16xbf16>, vector<8x16xf32> -> vector<8x16xf32>
    %57 = vector.broadcast %1 : vector<1x16xf32> to vector<8x16xf32>
    %58 = arith.addf %56, %57 : vector<8x16xf32>
    %cst_36 = arith.constant dense<0xFF800000> : vector<8xf32>
    %59 = vector.multi_reduction <maximumf>, %58, %cst_36 [1] : vector<8x16xf32> to vector<8xf32>
    %60 = vector.shape_cast %59 : vector<8xf32> to vector<8x1xf32>
    %61 = vector.broadcast %60 : vector<8x1xf32> to vector<8x16xf32>
    %62 = arith.subf %58, %61 : vector<8x16xf32>
    %63 = math.exp %62 : vector<8x16xf32>
    %cst_37 = arith.constant dense<0.000000e+00> : vector<8xf32>
    %64 = vector.multi_reduction <add>, %63, %cst_37 [1] : vector<8x16xf32> to vector<8xf32>
    %65 = vector.shape_cast %64 : vector<8xf32> to vector<8x1xf32>
    %66 = tpu.reciprocal %65 {approx = true} : vector<8x1xf32> -> vector<8x1xf32>
    %67 = vector.broadcast %66 : vector<8x1xf32> to vector<8x16xf32>
    %68 = arith.mulf %63, %67 : vector<8x16xf32>
    %69 = arith.truncf %68 : vector<8x16xf32> to vector<8x16xbf16>
    %c0_38 = arith.constant 0 : index
    %c0_39 = arith.constant 0 : index
    %c96 = arith.constant 96 : index
    %70 = vector.load %arg3[%c0_38, %c0_39, %c96] : memref<1x16x128xbf16, #tpu.memory_space<vmem>>, vector<1x16x16xbf16>
    %71 = vector.shape_cast %70 : vector<1x16x16xbf16> to vector<16x16xbf16>
    %cst_40 = arith.constant dense<0.000000e+00> : vector<8x16xf32>
    %72 = tpu.matmul %69, %71, %cst_40 {dimension_numbers = #tpu.dot_dimension_numbers<[1], [0], [0], [1], [0, 0, 1, 1], [], []>} : vector<8x16xbf16>, vector<16x16xbf16>, vector<8x16xf32> -> vector<8x16xf32>
    %73 = arith.truncf %72 : vector<8x16xf32> to vector<8x16xbf16>
    %c0_41 = arith.constant 0 : index
    %c0_42 = arith.constant 0 : index
    %c32_43 = arith.constant 32 : index
    %74 = vector.load %arg5[%c0_41, %c0_42, %c32_43] : memref<1x8x64xbf16, #tpu.memory_space<vmem>>, vector<1x8x16xbf16>
    %75 = vector.shape_cast %74 : vector<1x8x16xbf16> to vector<8x16xbf16>
    %76 = vector.shape_cast %73 : vector<8x16xbf16> to vector<1x8x16xbf16>
    tpu.vector_store %arg5[%c0_41, %c0_42, %c32_43], %76 {strides = array<i32>} : memref<1x8x64xbf16, #tpu.memory_space<vmem>>, vector<1x8x16xbf16>,
    %c0_44 = arith.constant 0 : index
    %c0_45 = arith.constant 0 : index
    %c48 = arith.constant 48 : index
    %77 = vector.load %arg2[%c0_44, %c0_45, %c48] : memref<1x8x64xbf16, #tpu.memory_space<vmem>>, vector<1x8x16xbf16>
    %78 = vector.shape_cast %77 : vector<1x8x16xbf16> to vector<8x16xbf16>
    %c0_46 = arith.constant 0 : index
    %c0_47 = arith.constant 0 : index
    %c48_48 = arith.constant 48 : index
    %79 = vector.load %arg3[%c0_46, %c0_47, %c48_48] : memref<1x16x128xbf16, #tpu.memory_space<vmem>>, vector<1x16x16xbf16>
    %80 = vector.shape_cast %79 : vector<1x16x16xbf16> to vector<16x16xbf16>
    %cst_49 = arith.constant dense<0.000000e+00> : vector<8x16xf32>
    %81 = tpu.matmul %78, %80, %cst_49 {dimension_numbers = #tpu.dot_dimension_numbers<[1], [1], [0], [0], [0, 0, 1, 0], [], []>} : vector<8x16xbf16>, vector<16x16xbf16>, vector<8x16xf32> -> vector<8x16xf32>
    %82 = vector.broadcast %1 : vector<1x16xf32> to vector<8x16xf32>
    %83 = arith.addf %81, %82 : vector<8x16xf32>
    %cst_50 = arith.constant dense<0xFF800000> : vector<8xf32>
    %84 = vector.multi_reduction <maximumf>, %83, %cst_50 [1] : vector<8x16xf32> to vector<8xf32>
    %85 = vector.shape_cast %84 : vector<8xf32> to vector<8x1xf32>
    %86 = vector.broadcast %85 : vector<8x1xf32> to vector<8x16xf32>
    %87 = arith.subf %83, %86 : vector<8x16xf32>
    %88 = math.exp %87 : vector<8x16xf32>
    %cst_51 = arith.constant dense<0.000000e+00> : vector<8xf32>
    %89 = vector.multi_reduction <add>, %88, %cst_51 [1] : vector<8x16xf32> to vector<8xf32>
    %90 = vector.shape_cast %89 : vector<8xf32> to vector<8x1xf32>
    %91 = tpu.reciprocal %90 {approx = true} : vector<8x1xf32> -> vector<8x1xf32>
    %92 = vector.broadcast %91 : vector<8x1xf32> to vector<8x16xf32>
    %93 = arith.mulf %88, %92 : vector<8x16xf32>
    %94 = arith.truncf %93 : vector<8x16xf32> to vector<8x16xbf16>
    %c0_52 = arith.constant 0 : index
    %c0_53 = arith.constant 0 : index
    %c112 = arith.constant 112 : index
    %95 = vector.load %arg3[%c0_52, %c0_53, %c112] : memref<1x16x128xbf16, #tpu.memory_space<vmem>>, vector<1x16x16xbf16>
    %96 = vector.shape_cast %95 : vector<1x16x16xbf16> to vector<16x16xbf16>
    %cst_54 = arith.constant dense<0.000000e+00> : vector<8x16xf32>
    %97 = tpu.matmul %94, %96, %cst_54 {dimension_numbers = #tpu.dot_dimension_numbers<[1], [0], [0], [1], [0, 0, 1, 1], [], []>} : vector<8x16xbf16>, vector<16x16xbf16>, vector<8x16xf32> -> vector<8x16xf32>
    %98 = arith.truncf %97 : vector<8x16xf32> to vector<8x16xbf16>
    %c0_55 = arith.constant 0 : index
    %c0_56 = arith.constant 0 : index
    %c48_57 = arith.constant 48 : index
    %99 = vector.load %arg5[%c0_55, %c0_56, %c48_57] : memref<1x8x64xbf16, #tpu.memory_space<vmem>>, vector<1x8x16xbf16>
    %100 = vector.shape_cast %99 : vector<1x8x16xbf16> to vector<8x16xbf16>
    %101 = vector.shape_cast %98 : vector<8x16xbf16> to vector<1x8x16xbf16>
    tpu.vector_store %arg5[%c0_55, %c0_56, %c48_57], %101 {strides = array<i32>} : memref<1x8x64xbf16, #tpu.memory_space<vmem>>, vector<1x8x16xbf16>,
    return
  }
  func.func @transform_0(%arg0: i32, %arg1: i32) -> (i32, i32, i32) {
    %c0_i32 = arith.constant 0 : i32
    %c0_i32_0 = arith.constant 0 : i32
    return %arg0, %arg1, %c0_i32 : i32, i32, i32
  }
  func.func @transform_1(%arg0: i32, %arg1: i32) -> (i32, i32, i32) {
    %c0_i32 = arith.constant 0 : i32
    %c0_i32_0 = arith.constant 0 : i32
    %c0_i32_1 = arith.constant 0 : i32
    return %arg0, %c0_i32, %c0_i32_0 : i32, i32, i32
  }
  func.func @transform_2(%arg0: i32, %arg1: i32) -> (i32, i32, i32) {
    %c0_i32 = arith.constant 0 : i32
    %c0_i32_0 = arith.constant 0 : i32
    %c0_i32_1 = arith.constant 0 : i32
    return %arg0, %c0_i32, %c0_i32_0 : i32, i32, i32
  }
  func.func @transform_3(%arg0: i32, %arg1: i32) -> (i32, i32, i32) {
    %c0_i32 = arith.constant 0 : i32
    %c0_i32_0 = arith.constant 0 : i32
    return %arg0, %arg1, %c0_i32 : i32, i32, i32
  }
}

module attributes {stable_mosaic.version = 11 : i64} {
  func.func @_ffn_res_ln_kernel(%arg0: i32, %arg1: i32, %arg2: memref<16x64xbf16, #tpu.memory_space<vmem>>, %arg3: memref<64x128xbf16, #tpu.memory_space<vmem>>, %arg4: memref<1x128xf32, #tpu.memory_space<vmem>>, %arg5: memref<128x64xbf16, #tpu.memory_space<vmem>>, %arg6: memref<1x64xf32, #tpu.memory_space<vmem>>, %arg7: memref<1x64xf32, #tpu.memory_space<vmem>>, %arg8: memref<1x64xf32, #tpu.memory_space<vmem>>, %arg9: memref<16x64xbf16, #tpu.memory_space<vmem>>, %arg10: memref<16x64xf32, #tpu.memory_space<vmem>>) attributes {dimension_semantics = [#tpu.dimension_semantics<parallel>, #tpu.dimension_semantics<arbitrary>], iteration_bounds = array<i64: 1, 1>, scalar_prefetch = 0 : i64, scratch_operands = 1 : i64, tpu.core_type = #tpu.core_type<tc>, window_params = [{transform_indices = @transform_0, window_bounds = array<i64: 16, 64>}, {transform_indices = @transform_1, window_bounds = array<i64: 64, 128>}, {transform_indices = @transform_2, window_bounds = array<i64: 1, 128>}, {transform_indices = @transform_3, window_bounds = array<i64: 128, 64>}, {pipeline_mode = #tpu.pipeline_mode<synchronous>, transform_indices = @transform_4, window_bounds = array<i64: 1, 64>}, {pipeline_mode = #tpu.pipeline_mode<synchronous>, transform_indices = @transform_5, window_bounds = array<i64: 1, 64>}, {pipeline_mode = #tpu.pipeline_mode<synchronous>, transform_indices = @transform_6, window_bounds = array<i64: 1, 64>}, {transform_indices = @transform_7, window_bounds = array<i64: 16, 64>}]} {
    %c0_i32 = arith.constant 0 : i32
    %0 = arith.cmpi eq, %arg1, %c0_i32 : i32
    %1 = arith.extui %0 : i1 to i32
    %c0_i32_0 = arith.constant 0 : i32
    %2 = arith.cmpi ne, %1, %c0_i32_0 : i32
    scf.if %2 {
      %cst_19 = arith.constant 0.000000e+00 : f32
      %31 = vector.broadcast %cst_19 : f32 to vector<16x64xf32>
      %c0_20 = arith.constant 0 : index
      %c0_21 = arith.constant 0 : index
      %32 = vector.load %arg10[%c0_20, %c0_21] : memref<16x64xf32, #tpu.memory_space<vmem>>, vector<16x64xf32>
      tpu.vector_store %arg10[%c0_20, %c0_21], %31 {strides = array<i32>} : memref<16x64xf32, #tpu.memory_space<vmem>>, vector<16x64xf32>,
    } else {
    }
    %c0 = arith.constant 0 : index
    %c0_1 = arith.constant 0 : index
    %3 = vector.load %arg2[%c0, %c0_1] : memref<16x64xbf16, #tpu.memory_space<vmem>>, vector<16x64xbf16>
    %c0_2 = arith.constant 0 : index
    %c0_3 = arith.constant 0 : index
    %4 = vector.load %arg3[%c0_2, %c0_3] : memref<64x128xbf16, #tpu.memory_space<vmem>>, vector<64x128xbf16>
    %cst = arith.constant dense<0.000000e+00> : vector<16x128xf32>
    %5 = tpu.matmul %3, %4, %cst {dimension_numbers = #tpu.dot_dimension_numbers<[1], [0], [0], [1], [0, 0, 1, 1], [], []>} : vector<16x64xbf16>, vector<64x128xbf16>, vector<16x128xf32> -> vector<16x128xf32>
    %c0_4 = arith.constant 0 : index
    %c0_5 = arith.constant 0 : index
    %6 = vector.load %arg4[%c0_4, %c0_5] : memref<1x128xf32, #tpu.memory_space<vmem>>, vector<1x128xf32>
    %7 = vector.broadcast %6 : vector<1x128xf32> to vector<16x128xf32>
    %8 = arith.addf %5, %7 : vector<16x128xf32>
    %9 = arith.mulf %8, %8 : vector<16x128xf32>
    %10 = arith.mulf %8, %9 : vector<16x128xf32>
    %cst_6 = arith.constant 4.471500e-02 : f32
    %11 = vector.broadcast %cst_6 : f32 to vector<16x128xf32>
    %12 = arith.mulf %11, %10 : vector<16x128xf32>
    %13 = arith.addf %8, %12 : vector<16x128xf32>
    %cst_7 = arith.constant 0.797884583 : f32
    %14 = vector.broadcast %cst_7 : f32 to vector<16x128xf32>
    %15 = arith.mulf %14, %13 : vector<16x128xf32>
    %16 = math.tanh %15 : vector<16x128xf32>
    %cst_8 = arith.constant 1.000000e+00 : f32
    %17 = vector.broadcast %cst_8 : f32 to vector<16x128xf32>
    %18 = arith.addf %17, %16 : vector<16x128xf32>
    %cst_9 = arith.constant 5.000000e-01 : f32
    %19 = vector.broadcast %cst_9 : f32 to vector<16x128xf32>
    %20 = arith.mulf %19, %18 : vector<16x128xf32>
    %21 = arith.mulf %8, %20 : vector<16x128xf32>
    %c0_10 = arith.constant 0 : index
    %c0_11 = arith.constant 0 : index
    %22 = vector.load %arg10[%c0_10, %c0_11] : memref<16x64xf32, #tpu.memory_space<vmem>>, vector<16x64xf32>
    %23 = arith.truncf %21 : vector<16x128xf32> to vector<16x128xbf16>
    %c0_12 = arith.constant 0 : index
    %c0_13 = arith.constant 0 : index
    %24 = vector.load %arg5[%c0_12, %c0_13] : memref<128x64xbf16, #tpu.memory_space<vmem>>, vector<128x64xbf16>
    %cst_14 = arith.constant dense<0.000000e+00> : vector<16x64xf32>
    %25 = tpu.matmul %23, %24, %cst_14 {dimension_numbers = #tpu.dot_dimension_numbers<[1], [0], [0], [1], [0, 0, 1, 1], [], []>} : vector<16x128xbf16>, vector<128x64xbf16>, vector<16x64xf32> -> vector<16x64xf32>
    %26 = arith.addf %22, %25 : vector<16x64xf32>
    %c0_15 = arith.constant 0 : index
    %c0_16 = arith.constant 0 : index
    %27 = vector.load %arg10[%c0_15, %c0_16] : memref<16x64xf32, #tpu.memory_space<vmem>>, vector<16x64xf32>
    tpu.vector_store %arg10[%c0_15, %c0_16], %26 {strides = array<i32>} : memref<16x64xf32, #tpu.memory_space<vmem>>, vector<16x64xf32>,
    %c0_i32_17 = arith.constant 0 : i32
    %28 = arith.cmpi eq, %arg1, %c0_i32_17 : i32
    %29 = arith.extui %28 : i1 to i32
    %c0_i32_18 = arith.constant 0 : i32
    %30 = arith.cmpi ne, %29, %c0_i32_18 : i32
    scf.if %30 {
      %c0_19 = arith.constant 0 : index
      %c0_20 = arith.constant 0 : index
      %31 = vector.load %arg10[%c0_19, %c0_20] : memref<16x64xf32, #tpu.memory_space<vmem>>, vector<16x64xf32>
      %c0_21 = arith.constant 0 : index
      %c0_22 = arith.constant 0 : index
      %32 = vector.load %arg6[%c0_21, %c0_22] : memref<1x64xf32, #tpu.memory_space<vmem>>, vector<1x64xf32>
      %33 = vector.broadcast %32 : vector<1x64xf32> to vector<16x64xf32>
      %34 = arith.addf %31, %33 : vector<16x64xf32>
      %c0_23 = arith.constant 0 : index
      %c0_24 = arith.constant 0 : index
      %35 = vector.load %arg2[%c0_23, %c0_24] : memref<16x64xbf16, #tpu.memory_space<vmem>>, vector<16x64xbf16>
      %36 = arith.extf %35 : vector<16x64xbf16> to vector<16x64xf32>
      %37 = arith.addf %34, %36 : vector<16x64xf32>
      %cst_25 = arith.constant dense<0.000000e+00> : vector<16xf32>
      %38 = vector.multi_reduction <add>, %37, %cst_25 [1] : vector<16x64xf32> to vector<16xf32>
      %39 = vector.shape_cast %38 : vector<16xf32> to vector<16x1xf32>
      %cst_26 = arith.constant 6.400000e+01 : f32
      %40 = vector.broadcast %cst_26 : f32 to vector<16x1xf32>
      %41 = arith.divf %39, %40 : vector<16x1xf32>
      %42 = vector.broadcast %41 : vector<16x1xf32> to vector<16x64xf32>
      %43 = arith.subf %37, %42 : vector<16x64xf32>
      %44 = arith.mulf %43, %43 : vector<16x64xf32>
      %cst_27 = arith.constant dense<0.000000e+00> : vector<16xf32>
      %45 = vector.multi_reduction <add>, %44, %cst_27 [1] : vector<16x64xf32> to vector<16xf32>
      %46 = vector.shape_cast %45 : vector<16xf32> to vector<16x1xf32>
      %cst_28 = arith.constant 6.400000e+01 : f32
      %47 = vector.broadcast %cst_28 : f32 to vector<16x1xf32>
      %48 = arith.divf %46, %47 : vector<16x1xf32>
      %cst_29 = arith.constant 9.99999974E-6 : f32
      %49 = vector.broadcast %cst_29 : f32 to vector<16x1xf32>
      %50 = arith.addf %48, %49 : vector<16x1xf32>
      %51 = math.rsqrt %50 : vector<16x1xf32>
      %52 = vector.broadcast %51 : vector<16x1xf32> to vector<16x64xf32>
      %53 = arith.mulf %43, %52 : vector<16x64xf32>
      %c0_30 = arith.constant 0 : index
      %c0_31 = arith.constant 0 : index
      %54 = vector.load %arg7[%c0_30, %c0_31] : memref<1x64xf32, #tpu.memory_space<vmem>>, vector<1x64xf32>
      %55 = vector.broadcast %54 : vector<1x64xf32> to vector<16x64xf32>
      %56 = arith.mulf %53, %55 : vector<16x64xf32>
      %c0_32 = arith.constant 0 : index
      %c0_33 = arith.constant 0 : index
      %57 = vector.load %arg8[%c0_32, %c0_33] : memref<1x64xf32, #tpu.memory_space<vmem>>, vector<1x64xf32>
      %58 = vector.broadcast %57 : vector<1x64xf32> to vector<16x64xf32>
      %59 = arith.addf %56, %58 : vector<16x64xf32>
      %60 = arith.truncf %59 : vector<16x64xf32> to vector<16x64xbf16>
      %c0_34 = arith.constant 0 : index
      %c0_35 = arith.constant 0 : index
      %61 = vector.load %arg9[%c0_34, %c0_35] : memref<16x64xbf16, #tpu.memory_space<vmem>>, vector<16x64xbf16>
      tpu.vector_store %arg9[%c0_34, %c0_35], %60 {strides = array<i32>} : memref<16x64xbf16, #tpu.memory_space<vmem>>, vector<16x64xbf16>,
    } else {
    }
    return
  }
  func.func @transform_0(%arg0: i32, %arg1: i32) -> (i32, i32) {
    %c0_i32 = arith.constant 0 : i32
    %c0_i32_0 = arith.constant 0 : i32
    return %arg0, %c0_i32 : i32, i32
  }
  func.func @transform_1(%arg0: i32, %arg1: i32) -> (i32, i32) {
    %c0_i32 = arith.constant 0 : i32
    %c0_i32_0 = arith.constant 0 : i32
    return %c0_i32, %arg1 : i32, i32
  }
  func.func @transform_2(%arg0: i32, %arg1: i32) -> (i32, i32) {
    %c0_i32 = arith.constant 0 : i32
    %c0_i32_0 = arith.constant 0 : i32
    return %c0_i32, %arg1 : i32, i32
  }
  func.func @transform_3(%arg0: i32, %arg1: i32) -> (i32, i32) {
    %c0_i32 = arith.constant 0 : i32
    %c0_i32_0 = arith.constant 0 : i32
    return %arg1, %c0_i32 : i32, i32
  }
  func.func @transform_4(%arg0: i32, %arg1: i32) -> (i32, i32) {
    %c0_i32 = arith.constant 0 : i32
    %c0_i32_0 = arith.constant 0 : i32
    %c0_i32_1 = arith.constant 0 : i32
    return %c0_i32, %c0_i32_0 : i32, i32
  }
  func.func @transform_5(%arg0: i32, %arg1: i32) -> (i32, i32) {
    %c0_i32 = arith.constant 0 : i32
    %c0_i32_0 = arith.constant 0 : i32
    %c0_i32_1 = arith.constant 0 : i32
    return %c0_i32, %c0_i32_0 : i32, i32
  }
  func.func @transform_6(%arg0: i32, %arg1: i32) -> (i32, i32) {
    %c0_i32 = arith.constant 0 : i32
    %c0_i32_0 = arith.constant 0 : i32
    %c0_i32_1 = arith.constant 0 : i32
    return %c0_i32, %c0_i32_0 : i32, i32
  }
  func.func @transform_7(%arg0: i32, %arg1: i32) -> (i32, i32) {
    %c0_i32 = arith.constant 0 : i32
    %c0_i32_0 = arith.constant 0 : i32
    return %arg0, %c0_i32 : i32, i32
  }
}

module attributes {stable_mosaic.version = 11 : i64} {
  func.func @_add_lmhead_kernel(%arg0: i32, %arg1: memref<16x64xbf16, #tpu.memory_space<vmem>>, %arg2: memref<16x64xbf16, #tpu.memory_space<vmem>>, %arg3: memref<64x128xbf16, #tpu.memory_space<vmem>>, %arg4: memref<16x128xf32, #tpu.memory_space<vmem>>) attributes {dimension_semantics = [#tpu.dimension_semantics<parallel>], iteration_bounds = array<i64: 1>, scalar_prefetch = 0 : i64, scratch_operands = 0 : i64, tpu.core_type = #tpu.core_type<tc>, window_params = [{pipeline_mode = #tpu.pipeline_mode<synchronous>, transform_indices = @transform_0, window_bounds = array<i64: 16, 64>}, {pipeline_mode = #tpu.pipeline_mode<synchronous>, transform_indices = @transform_1, window_bounds = array<i64: 16, 64>}, {transform_indices = @transform_2, window_bounds = array<i64: 64, 128>}, {transform_indices = @transform_3, window_bounds = array<i64: 16, 128>}]} {
    %c0 = arith.constant 0 : index
    %c0_0 = arith.constant 0 : index
    %0 = vector.load %arg1[%c0, %c0_0] : memref<16x64xbf16, #tpu.memory_space<vmem>>, vector<16x64xbf16>
    %c0_1 = arith.constant 0 : index
    %c0_2 = arith.constant 0 : index
    %1 = vector.load %arg2[%c0_1, %c0_2] : memref<16x64xbf16, #tpu.memory_space<vmem>>, vector<16x64xbf16>
    %2 = arith.addf %0, %1 : vector<16x64xbf16>
    %c0_3 = arith.constant 0 : index
    %c0_4 = arith.constant 0 : index
    %3 = vector.load %arg3[%c0_3, %c0_4] : memref<64x128xbf16, #tpu.memory_space<vmem>>, vector<64x128xbf16>
    %cst = arith.constant dense<0.000000e+00> : vector<16x128xf32>
    %4 = tpu.matmul %2, %3, %cst {dimension_numbers = #tpu.dot_dimension_numbers<[1], [0], [0], [1], [0, 0, 1, 1], [], []>} : vector<16x64xbf16>, vector<64x128xbf16>, vector<16x128xf32> -> vector<16x128xf32>
    %c0_5 = arith.constant 0 : index
    %c0_6 = arith.constant 0 : index
    %5 = vector.load %arg4[%c0_5, %c0_6] : memref<16x128xf32, #tpu.memory_space<vmem>>, vector<16x128xf32>
    tpu.vector_store %arg4[%c0_5, %c0_6], %4 {strides = array<i32>} : memref<16x128xf32, #tpu.memory_space<vmem>>, vector<16x128xf32>,
    return
  }
  func.func @transform_0(%arg0: i32) -> (i32, i32) {
    %c0_i32 = arith.constant 0 : i32
    %c0_i32_0 = arith.constant 0 : i32
    %c0_i32_1 = arith.constant 0 : i32
    return %c0_i32, %c0_i32_0 : i32, i32
  }
  func.func @transform_1(%arg0: i32) -> (i32, i32) {
    %c0_i32 = arith.constant 0 : i32
    %c0_i32_0 = arith.constant 0 : i32
    %c0_i32_1 = arith.constant 0 : i32
    return %c0_i32, %c0_i32_0 : i32, i32
  }
  func.func @transform_2(%arg0: i32) -> (i32, i32) {
    %c0_i32 = arith.constant 0 : i32
    %c0_i32_0 = arith.constant 0 : i32
    return %c0_i32, %arg0 : i32, i32
  }
  func.func @transform_3(%arg0: i32) -> (i32, i32) {
    %c0_i32 = arith.constant 0 : i32
    %c0_i32_0 = arith.constant 0 : i32
    return %c0_i32, %arg0 : i32, i32
  }
}

</mosaic_0001>

<bundles_post_ra>
// kernel: student_grafomer_forward.25
= control target key start
LH: loop header
LB: loop body
LE: loop exit
PB: predicated region body
PF: predicated region fallthrough
CT: control target
= control target key end

     0   :  { %v227_v1 = vmov 0   ;;  %vm89_vm0 = vcmask 523264   ;;  %v29_v11 = vlaneseq  ;;  %vm173_vm1 = vcmask 1043456   ;;  %s293_s1 = inlined_call_operand.vmem [shape: bf16[64,192], index: 1, kind: input, shape index: {}]   ;;  %s294_s0 = inlined_call_operand.vmem [shape: bf16[32,64], index: 0, kind: input, shape index: {}]   ;;  %s295_s2 = inlined_call_operand.vmem [shape: f32[1,192], index: 2, kind: input, shape index: {}]   ;;  %s296_s3 = inlined_call_operand.vmem [shape: bf16[32,192], index: 3, kind: output, shape index: {}]  }
   0x1   :  { %v213_v0 = vld [vmem:[%s293_s1 + $0x4] ss:$8 sps:$4 sm:$0xff]   ;;  %128 = vmatprep.mubr.bf16.mxu0 %v227_v1  ;;  %138 = vmatprep.mubr.bf16.mxu1 %v227_v1  ;;  %v215_v2 = vld [vmem:[%s293_s1] ss:$8 sps:$4 sm:$0xff]   ;;  %v216_v3 = vld [vmem:[%s293_s1 + $0x14] ss:$8 sps:$4 sm:$0xff]  }
   0x2   :  { %96 = vmatprep.subr.bf16.mxu0 %v213_v0  ;;  %204 = vmatprep.subr.bf16.mxu1 %v213_v0  ;;  %v218_v4 = vld [vmem:[%s293_s1 + $0x10] ss:$8 sps:$4 sm:$0xff]   ;;  %v219_v5 = vld [vmem:[%s293_s1 + $0x24] ss:$8 sps:$4 sm:$0xff]   ;;  %v221_v6 = vld [vmem:[%s293_s1 + $0x20] ss:$8 sps:$4 sm:$0xff]  }
   0x3   :  { %97 = vmatpush1.bf16.msra.mxu0 %v215_v2  ;;  %208 = vmatpush1.bf16.msra.mxu1 %v215_v2  ;;  %v222_v7 = vld [vmem:[%s293_s1 + $0x34] ss:$8 sps:$4 sm:$0xff]   ;;  %v224_v8 = vld [vmem:[%s293_s1 + $0x30] ss:$8 sps:$4 sm:$0xff]   ;;  %v225_v9 = vld [vmem:[%s294_s0] sm:$0xff]   ;;  %v30_v12 = vshrl.u32 %v29_v11, 7 }
   0x4   :  { %98 = vmatprep.subr.bf16.mxu0 %v216_v3  ;;  %205 = vmatprep.subr.bf16.mxu1 %v216_v3  ;;  %v226_v10 = vld [vmem:[%s294_s0 + $0x8] sm:$0xff]   ;;  %v27_v14 = vld [vmem:[%s295_s2] sm:$0x3]  ;;  %vm174_vm2 = vcmask 523268  }
   0x5   :  { %v31_v13 = vsub.s32 0, %v30_v12  ;;  %v35_v15 = vsub.s32 1, %v30_v12  ;;  %vm175_vm3 = vmor %vm174_vm2, %vm173_vm1 }
   0x7   :  { %99 = vmatpush1.bf16.msra.mxu0 %v218_v4  ;;  %209 = vmatpush1.bf16.msra.mxu1 %v218_v4  ;;  %v32_v16 = vrot.slane %v27_v14, %v31_v13  ;;  %v36_v17 = vrot.slane %v27_v14, %v35_v15 }
   0x8   :  { %100 = vmatprep.subr.bf16.mxu0 %v219_v5  ;;  %206 = vmatprep.subr.bf16.mxu1 %v219_v5 }
   0xb   :  { %101 = vmatpush1.bf16.msra.mxu0 %v221_v6  ;;  %210 = vmatpush1.bf16.msra.mxu1 %v221_v6 }
   0xc   :  { %102 = vmatprep.subr.bf16.mxu0 %v222_v7  ;;  %207 = vmatprep.subr.bf16.mxu1 %v222_v7 }
   0xf   :  { %103 = vmatpush1.bf16.msra.mxu0 %v224_v8  ;;  %211 = vmatpush1.bf16.msra.mxu1 %v224_v8 }
  0x12   :  { %194 = vmatmul.mubr.msk.bf16.vlgmr.msra.gmra.mrb[0].mxu0 %vm89_vm0, %v225_v9  ;;  %195 = vmatmul.mubr.msk.bf16.vlgmr.msra.gmra.mrb[0].mxu1 %vm89_vm0, %v226_v10 }
  0xe5   :  { %v130_v18 = vpop.f32.mrb[0].mxu0  ;;  %v140_v19 = vpop.f32.mrb[0].mxu1 }
  0xe6   :  { %v131_v20 = vadd.f32 %v130_v18, %v32_v16  ;;  %v141_v21 = vadd.f32 %v140_v19, %v32_v16  ;;  %v132_v22 = vpop.f32.mrb[1].mxu0  ;;  %v142_v23 = vpop.f32.mrb[1].mxu1 }
  0xe7   :  { %v133_v24 = vadd.f32 %v132_v22, %v36_v17  ;;  %v143_v25 = vadd.f32 %v142_v23, %v36_v17  ;;  %v134_v26 = vpop.f32.mrb[2].mxu0  ;;  %v144_v27 = vpop.f32.mrb[2].mxu1 }
  0xe8   :  { %v135_v28 = vadd.f32 %v134_v26, %v32_v16  ;;  %v145_v29 = vadd.f32 %v144_v27, %v32_v16  ;;  %v136_v30 = vpop.f32.mrb[3].mxu0  ;;  %v146_v31 = vpop.f32.mrb[3].mxu1 }
  0xe9   :  { %v200_v32 = vpack.c.bf16 %v133_v24, %v131_v20  ;;  %v202_v33 = vpack.c.bf16 %v143_v25, %v141_v21  ;;  %v137_v34 = vadd.f32 %v136_v30, %v36_v17  ;;  %v147_v35 = vadd.f32 %v146_v31, %v36_v17 }
  0xeb   :  { %176 = vst.msk [vmem:[%s296_s3] sm:$0xff] %vm175_vm3, %v200_v32  ;;  %178 = vst.msk [vmem:[%s296_s3 + $0x10] sm:$0xff] %vm175_vm3, %v202_v33  ;;  %v201_v36 = vpack.c.bf16 %v137_v34, %v135_v28  ;;  %v203_v37 = vpack.c.bf16 %v147_v35, %v145_v29 }
  0xed   :  { %177 = vst.msk [vmem:[%s296_s3 + $0x8] sm:$0xff] %vm175_vm3, %v201_v36  ;;  %179 = vst.msk [vmem:[%s296_s3 + $0x18] sm:$0xff] %vm175_vm3, %v203_v37 }

// kernel: student_grafomer_forward.27
= control target key start
LH: loop header
LB: loop body
LE: loop exit
PB: predicated region body
PF: predicated region fallthrough
CT: control target
= control target key end

     0   :  { %vm77_vm0 = vcmask 523264   ;;  %vm236_vm1 = vcmask 519168   ;;  %s399_s2 = inlined_call_operand.vmem [shape: bf16[64,64], index: 2, kind: input, shape index: {}]   ;;  %s400_s0 = inlined_call_operand.vmem [shape: bf16[32,64], index: 0, kind: input, shape index: {}]   ;;  %s401_s1 = inlined_call_operand.vmem [shape: bf16[32,64], index: 1, kind: input, shape index: {}]   ;;  %s402_s3 = inlined_call_operand.vmem [shape: f32[1,64], index: 3, kind: input, shape index: {}]   ;;  %s403_s4 = inlined_call_operand.vmem [shape: f32[1,64], index: 4, kind: input, shape index: {}]   ;;  %s404_s5 = inlined_call_operand.vmem [shape: f32[1,64], index: 5, kind: input, shape index: {}]   ;;  %s405_s6 = inlined_call_operand.vmem [shape: bf16[32,64], index: 6, kind: output, shape index: {}]  }
   0x1   :  { %v291_v0 = vld [vmem:[%s399_s2] sm:$0xff]   ;;  %v292_v1 = vld [vmem:[%s399_s2 + $0x8] sm:$0xff]   ;;  %v293_v2 = vld [vmem:[%s399_s2 + $0x10] sm:$0xff]  }
   0x2   :  { %279 = vmatprep.subr.bf16.mxu0 %v291_v0  ;;  %v295_v3 = vld [vmem:[%s400_s0] sm:$0xff]   ;;  %v294_v4 = vld [vmem:[%s399_s2 + $0x18] sm:$0xff]   ;;  %v296_v5 = vld [vmem:[%s400_s0 + $0x8] sm:$0xff]  }
   0x3   :  { %280 = vmatpush3.bf16.msra.mxu0 %v291_v0  ;;  %287 = vmatprep.mubr.msk.bf16.mxu0 %vm77_vm0, %v295_v3  ;;  %v272_v6 = vld [vmem:[%s401_s1 + $0x8] sm:$0xff]   ;;  %v265_v7 = vld [vmem:[%s401_s1] sm:$0xff]  }
   0x4   :  { %281 = vmatprep.subr.bf16.mxu0 %v292_v1  ;;  %v245_v8 = vld [vmem:[%s402_s3] ss:$0 sm:$0xff]  ;;  %v270_v9 = vunpack.c.l.bf16 %v272_v6  ;;  %v266_v11 = vunpack.c.l.bf16 %v265_v7  ;;  %v271_v14 = vunpack.c.h.bf16 %v272_v6  ;;  %v267_v17 = vunpack.c.h.bf16 %v265_v7 }
   0x5   :  { %v254_v62 = vld [vmem:[%s403_s4] ss:$0 sm:$0xff] }
   0x6   :  { %v255_v0 = vld [vmem:[%s404_s5] ss:$0 sm:$0xff] }
   0x7   :  { %282 = vmatpush3.bf16.msra.mxu0 %v292_v1 }
   0x8   :  { %283 = vmatprep.subr.bf16.mxu0 %v293_v2 }
   0xb   :  { %284 = vmatpush3.bf16.msra.mxu0 %v293_v2 }
   0xc   :  { %285 = vmatprep.subr.bf16.mxu0 %v294_v4 }
   0xf   :  { %286 = vmatpush3.bf16.msra.mxu0 %v294_v4 }
  0x12   :  { %288 = vmatmul.mubr.msk.bf16.vlgmr.msra.gmra.mrb[0].mxu0 %vm77_vm0, %v296_v5 }
  0xe5   :  { %v289_v10 = vpop.f32.mrb[0].mxu0 }
  0xe6   :  { %v127_v12 = vadd.f32 %v289_v10, %v245_v8  ;;  %v118_v13 = vpop.f32.mrb[1].mxu0 }
  0xe7   :  { %v119_v15 = vadd.f32 %v245_v8, %v118_v13  ;;  %v290_v16 = vpop.f32.mrb[2].mxu0 }
  0xe8   :  { %v130_v18 = vadd.f32 %v290_v16, %v245_v8  ;;  %v121_v19 = vpop.f32.mrb[3].mxu0  ;;  %v143_v20 = vadd.f32 %v270_v9, %v127_v12 }
  0xe9   :  { %v122_v21 = vadd.f32 %v245_v8, %v121_v19  ;;  %v141_v22 = vadd.f32 %v266_v11, %v119_v15 }
  0xea   :  { %v151_v23 = vsel %vm77_vm0, %v143_v20, 0.0  ;;  %v144_v24 = vadd.f32 %v271_v14, %v130_v18 }
  0xeb   :  { %152 = vadd.xlane.f32.xlu1 %v151_v23  ;;  %v145_v25 = vsel %vm77_vm0, %v141_v22, 0.0  ;;  %v142_v26 = vadd.f32 %v267_v17, %v122_v21 }
  0xec   :  { %146 = vadd.xlane.f32.xlu0 %v145_v25  ;;  %v154_v27 = vsel %vm77_vm0, %v144_v24, 0.0 }
  0xed   :  { %v148_v28 = vsel %vm77_vm0, %v142_v26, 0.0 }
  0xef   :  { %155 = vadd.xlane.f32.xlu1 %v154_v27 }
  0xf0   :  { %149 = vadd.xlane.f32.xlu0 %v148_v28 }
 0x178   :  { %v153_v29 = vpop.xlane.xlu1 %152 }
 0x179   :  { %v160_v30 = vmul.f32 0.015625, %v153_v29  ;;  %v147_v31 = vpop.xlane.xlu0 %146 }
 0x17a   :  { %v158_v32 = vmul.f32 0.015625, %v147_v31 }
 0x17b   :  { %v164_v33 = vsub.f32 %v143_v20, %v160_v30 }
 0x17c   :  { %v162_v34 = vsub.f32 %v141_v22, %v158_v32  ;;  %v156_v35 = vpop.xlane.xlu1 %155 }
 0x17d   :  { %v161_v36 = vmul.f32 0.015625, %v156_v35  ;;  %v150_v37 = vpop.xlane.xlu0 %149  ;;  %v168_v43 = vmul.f32 %v164_v33, %v164_v33 }
 0x17e   :  { %v159_v38 = vmul.f32 0.015625, %v150_v37  ;;  %v166_v39 = vmul.f32 %v162_v34, %v162_v34 }
 0x17f   :  { %v165_v40 = vsub.f32 %v144_v24, %v161_v36  ;;  %v176_v45 = vsel %vm77_vm0, %v168_v43, 0.0 }
 0x180   :  { %v163_v41 = vsub.f32 %v142_v26, %v159_v38  ;;  %v170_v42 = vsel %vm77_vm0, %v166_v39, 0.0 }
 0x181   :  { %171 = vadd.xlane.f32.xlu0 %v170_v42  ;;  %v169_v47 = vmul.f32 %v165_v40, %v165_v40 }
 0x182   :  { %v167_v44 = vmul.f32 %v163_v41, %v163_v41 }
 0x183   :  { %v179_v48 = vsel %vm77_vm0, %v169_v47, 0.0 }
 0x184   :  { %v173_v46 = vsel %vm77_vm0, %v167_v44, 0.0 }
 0x185   :  { %177 = vadd.xlane.f32.xlu0 %v176_v45  ;;  %174 = vadd.xlane.f32.xlu1 %v173_v46 }
 0x189   :  { %180 = vadd.xlane.f32.xlu1 %v179_v48 }
 0x20e   :  { %v172_v49 = vpop.xlane.xlu0 %171 }
 0x20f   :  { %v182_v50 = vmul.f32 0.015625, %v172_v49 }
 0x211   :  { %v186_v51 = vadd.f32 1e-05, %v182_v50 }
 0x212   :  { %v175_v52 = vpop.xlane.xlu1 %174  ;;  %v178_v53 = vpop.xlane.xlu0 %177 }
 0x213   :  { %297 = vrsqrt.f32 %v186_v51  ;;  %v183_v54 = vmul.f32 0.015625, %v175_v52  ;;  %v184_v55 = vmul.f32 0.015625, %v178_v53 }
 0x215   :  { %v187_v56 = vadd.f32 1e-05, %v183_v54  ;;  %v188_v57 = vadd.f32 1e-05, %v184_v55 }
 0x216   :  { %v181_v58 = vpop.xlane.xlu1 %180 }
 0x217   :  { %299 = vrsqrt.f32 %v187_v56  ;;  %v185_v59 = vmul.f32 0.015625, %v181_v58 }
 0x218   :  { %301 = vrsqrt.f32 %v188_v57 }
 0x219   :  { %v189_v60 = vadd.f32 1e-05, %v185_v59 }
 0x21b   :  { %303 = vrsqrt.f32 %v189_v60 }
 0x21d   :  { %v298_v61 = vpop.eup %297 }
 0x21e   :  { %v194_v63 = vmul.f32 %v298_v61, %v162_v34 }
 0x220   :  { %v205_v1 = vmul.f32 %v254_v62, %v194_v63 }
 0x221   :  { %v300_v2 = vpop.eup %299 }
 0x222   :  { %v302_v3 = vpop.eup %301  ;;  %v216_v4 = vadd.f32 %v255_v0, %v205_v1  ;;  %v195_v5 = vmul.f32 %v300_v2, %v163_v41 }
 0x223   :  { %v196_v6 = vmul.f32 %v302_v3, %v164_v33 }
 0x224   :  { %v260_v7 = vpack.c.bf16 %v216_v4, %v216_v4  ;;  %v206_v8 = vmul.f32 %v254_v62, %v195_v5 }
 0x225   :  { %v304_v9 = vpop.eup %303  ;;  %v207_v10 = vmul.f32 %v254_v62, %v196_v6 }
 0x226   :  { %237 = vst.msk [vmem:[%s405_s6] sm:$0xf] %vm236_vm1, %v260_v7  ;;  %v217_v11 = vadd.f32 %v255_v0, %v206_v8  ;;  %v197_v12 = vmul.f32 %v304_v9, %v165_v40 }
 0x227   :  { %v218_v13 = vadd.f32 %v255_v0, %v207_v10 }
 0x228   :  { %v261_v14 = vpack.c.bf16 %v217_v11, %v217_v11  ;;  %v208_v15 = vmul.f32 %v254_v62, %v197_v12 }
 0x229   :  { %v262_v16 = vpack.c.bf16 %v218_v13, %v218_v13 }
 0x22a   :  { %238 = vst.msk [vmem:[%s405_s6 + $0x4] sm:$0xf] %vm236_vm1, %v261_v14  ;;  %v219_v17 = vadd.f32 %v255_v0, %v208_v15 }
 0x22b   :  { %239 = vst.msk [vmem:[%s405_s6 + $0x8] sm:$0xf] %vm236_vm1, %v262_v16 }
 0x22c   :  { %v263_v18 = vpack.c.bf16 %v219_v17, %v219_v17 }
 0x22e   :  { %240 = vst.msk [vmem:[%s405_s6 + $0xc] sm:$0xf] %vm236_vm1, %v263_v18 }

// kernel: student_grafomer_forward.26
= control target key start
LH: loop header
LB: loop body
LE: loop exit
PB: predicated region body
PF: predicated region fallthrough
CT: control target
= control target key end

     0   :  { %s1147_s9 = smov 0   ;;  %s1149_s10 = smov 0   ;;  %s1289_s0 = inlined_call_operand.vmem [shape: bf16[2,16,192], index: 0, kind: input, shape index: {}]   ;;  %s1290_s1 = inlined_call_operand.vmem [shape: f32[2,1,16], index: 1, kind: input, shape index: {}]   ;;  %s1291_s2 = inlined_call_operand.vmem [shape: bf16[2,16,64], index: 2, kind: output, shape index: {}]  }
   0x1   :  { %s1151_s11 = smov 0  }
   0x2 LB: > { %s24_s12 = sadd.s32 1, %s1117_s10  ;;  %p912_p0 = scmp.ge.s32.totalorder %s1121_s11, 1  ;;  %s1121_s11 = sphi %s1151_s11, %s12_s11   ;;  %s1117_s10 = sphi %s1149_s10, %s1293_s10   ;;  %s1113_s9 = sphi %s1147_s9, %s1292_s9  }
   0x3   : > { %p26_p1 = scmp.ge.s32.totalorder %s24_s12, 2  ;;  %p134_p2 = scmp.lt.s32.totalorder %s1121_s11, 3 }
   0x5   : > { %s1295_s12 = smov (%p26_p1, %s24_s12), 0  ;;  %p135_p3 = pnand %p912_p0, %p134_p2 }
   0x6   : > { %p163_p4 = scmp.lt.s32.totalorder (!%p135_p3), %s1113_s9, 1  ;;  %v1123_v0 = vmov (!%p135_p3), 0.0   ;;  %vm1124_vm0 = vmmov (!%p135_p3), 0   ;;  %s1125_s17 = smov (!%p135_p3), 64   ;;  %vm211_vm1 = vcmask (!%p135_p3), 130048   ;;  %vm342_vm2 = vcmask (!%p135_p3), 125952  }
   0x7   : > { %138 = sbr.rel (%p135_p3) target bundleno = 1610 (0x64a), region = 28  ;;  %974 = vmatprep.subr.bf16.mxu0 (!%p135_p3), %v1123_v0  ;;  %976 = vmatprep.mubr.msk.bf16.mxu0 (!%p135_p3), %vm1124_vm0, %v1123_v0  ;;  %s1126_s21 = smov (!%p135_p3), 48   ;;  %vm499_vm3 = vcmask (!%p135_p3), 257152   ;;  %vm656_vm4 = vcmask (!%p135_p3), 388352   ;;  %vm813_vm5 = vcmask (!%p135_p3), 519552  }
   0x8   : > { %980 = vmatprep.subr.bf16.mxu1 (!%p135_p3), %v1123_v0  ;;  %982 = vmatprep.mubr.msk.bf16.mxu1 (!%p135_p3), %vm1124_vm0, %v1123_v0  ;;  %s1127_s22 = smov (!%p135_p3), 96   ;;  %s1128_s23 = smov (!%p135_p3), 112  }
   0x9   : > { %s1129_s24 = smov (!%p135_p3), 32   ;;  %s1130_s25 = smov (!%p135_p3), 16  }
   0xa   : > { %s1131_s26 = smov (!%p135_p3), 80  }
   0xe   : > { %s1297_s9 = smov (!%p163_p4, %s1113_s9), 1 }
   0xf   : > { %s948_s13 = sshll.u32 %s1297_s9, 4  ;;  %s170_s20 = scalar_lea.vmem %s1290_s1, %s1297_s9 }
  0x10   : > { %s1177_s16 = scalar_lea.vmem %s1289_s0, %s948_s13  ;;  %v1190_v5 = vld [vmem:[%s170_s20] ss:$0 sm:$0xff]  ;;  %s949_s27 = sshll.u32 %s1297_s9, 3 }
  0x11   : > { %v1055_v1 = vld [vmem:[%s1177_s16] ss:$8 sps:$4 sm:$0xff]   ;;  %v1063_v27 = vld [vmem:[%s1177_s16 + $0x4] ss:$8 sps:$4 sm:$0xff]   ;;  %s1231_s30 = scalar_lea.vmem %s1291_s2, %s949_s27 }
  0x12   : > { %209 = vrot.lane.b32.xlu0 %v1055_v1, %s1125_s17  ;;  %v1056_v4 = vld [vmem:[%s1177_s16] ss:$8 sps:$4 sm:$0xff]   ;;  %981 = vmatpush3.bf16.msra.mxu1 %v1063_v27 }
  0x13   : > { %v1057_v14 = vld [vmem:[%s1177_s16] ss:$8 sps:$4 sm:$0xff]   ;;  %986 = vmatprep.subr.bf16.mxu1 %v1123_v0 }
  0x14   : > { %v1060_v15 = vld [vmem:[%s1177_s16] ss:$8 sps:$4 sm:$0xff]  }
  0x15   : > { %v1058_v26 = vld [vmem:[%s1177_s16] ss:$8 sps:$4 sm:$0xff]  }
  0x16   : > { %v1059_v28 = vld [vmem:[%s1177_s16] ss:$8 sps:$4 sm:$0xff]  }
  0x17   : > { %v1061_v29 = vld [vmem:[%s1177_s16] ss:$8 sps:$4 sm:$0xff]  }
  0x18   : > { %v1062_v30 = vld [vmem:[%s1177_s16] ss:$8 sps:$4 sm:$0xff]  }
  0x84   : > { %v210_v2 = vpop.permute.xlu0 %209 }
  0x85   : > { %v216_v3 = vsel %vm211_vm1, %v210_v2, 0 }
  0x86   : > { %975 = vmatpush3.bf16.xpose.msra.mxu0 %v216_v3 }
  0x87   : > { %992 = vmatprep.subr.bf16.mxu0 %v1123_v0 }
  0x8d   : > { %977 = vmatmul.mubr.msk.bf16.vlgmr.msra.gmra.mrb[0].mxu0 %vm211_vm1, %v1056_v4 }
  0x8e   : > { %994 = vmatprep.mubr.msk.bf16.mxu0 %vm1124_vm0, %v1123_v0 }
 0x160   : > { %v252_v6 = vpop.f32.mrb[0].mxu0 }
 0x161   : > { %v253_v7 = vadd.f32 %v1190_v5, %v252_v6  ;;  %v978_v8 = vpop.f32.mrb[1].mxu0 }
 0x162   : > { %v255_v9 = vpop.f32.mrb[2].mxu0 }
 0x163   : > { %v256_v10 = vadd.f32 %v1190_v5, %v255_v9  ;;  %v979_v11 = vpop.f32.mrb[3].mxu0  ;;  %v259_v12 = vsel %vm211_vm1, %v253_v7, -inf }
 0x164   : > { %260 = vmax.xlane.f32.xlu0 %v259_v12 }
 0x165   : > { %v262_v13 = vsel %vm211_vm1, %v256_v10, -inf }
 0x166   : > { %263 = vmax.xlane.f32.xlu1 %v262_v13 }
 0x177   : > { %361 = vrot.lane.b32.xlu1 %v1057_v14, %s1126_s21 }
 0x17a   : > { %511 = vrot.lane.b32.xlu0 %v1060_v15, %s1127_s22 }
 0x1f1   : > { %v261_v16 = vpop.xlane.xlu0 %260 }
 0x1f2   : > { %v265_v17 = vsub.f32 %v253_v7, %v261_v16 }
 0x1f3   : > { %v264_v18 = vpop.xlane.xlu1 %263 }
 0x1f4   : > { %v267_v19 = vmul.f32 1.442695, %v265_v17  ;;  %v266_v20 = vsub.f32 %v256_v10, %v264_v18 }
 0x1f5   : > { %v512_v44 = vpop.permute.xlu0 %511 }
 0x1f6   : > { %1067 = vpow2.f32 %v267_v19  ;;  %v269_v21 = vmul.f32 1.442695, %v266_v20 }
 0x1f7   : > { %v362_v31 = vpop.permute.xlu1 %361 }
 0x1f8   : > { %1069 = vpow2.f32 %v269_v21  ;;  %v367_v40 = vsel %vm211_vm1, %v362_v31, 0 }
 0x200   : > { %v1068_v22 = vpop.eup %1067 }
 0x201   : > { %v271_v23 = vsel %vm211_vm1, %v1068_v22, 0.0 }
 0x202   : > { %v1070_v24 = vpop.eup %1069  ;;  %272 = vadd.xlane.f32.xlu1 %v271_v23 }
 0x203   : > { %v274_v25 = vsel %vm211_vm1, %v1070_v24, 0.0 }
 0x206   : > { %275 = vadd.xlane.f32.xlu1 %v274_v25 }
 0x217   : > { %354 = vrot.lane.b32.xlu1 %v1058_v26, %s1128_s23 }
 0x21b   : > { %518 = vrot.lane.b32.xlu1 %v1059_v28, %s1129_s24 }
 0x21f   : > { %675 = vrot.lane.b32.xlu1 %v1061_v29, %s1130_s25 }
 0x223   : > { %668 = vrot.lane.b32.xlu1 %v1062_v30, %s1131_s26 }
 0x28f   : > { %v273_v32 = vpop.xlane.xlu1 %272 }
 0x290   : > { %1071 = vrcp.f32 %v273_v32 }
 0x293   : > { %v276_v33 = vpop.xlane.xlu1 %275 }
 0x294   : > { %1073 = vrcp.f32 %v276_v33 }
 0x297   : > { %v355_v38 = vpop.permute.xlu1 %354 }
 0x29a   : > { %v1072_v34 = vpop.eup %1071 }
 0x29b   : > { %v279_v36 = vmul.f32 %v1072_v34, %v1068_v22  ;;  %v519_v41 = vpop.permute.xlu1 %518 }
 0x29c   : > { %v524_v42 = vsel %vm211_vm1, %v519_v41, 0 }
 0x29e   : > { %v1074_v35 = vpop.eup %1073 }
 0x29f   : > { %v280_v37 = vmul.f32 %v1074_v35, %v1070_v24  ;;  %v676_v43 = vpop.permute.xlu1 %675 }
 0x2a0   : > { %v681_v45 = vsel %vm211_vm1, %v676_v43, 0 }
 0x2a1   : > { %v281_v39 = vpack.c.bf16 %v280_v37, %v279_v36 }
 0x2a3   : > { %983 = vmatmul.mubr.msk.bf16.vlgmr.msra.gmra.mrb[0].mxu1 %vm211_vm1, %v281_v39  ;;  %v669_v46 = vpop.permute.xlu1 %668  ;;  %v1064_v39 = vld [vmem:[%s1177_s16 + $0x4] ss:$8 sps:$4 sm:$0xff]  }
 0x2a4   : > { %987 = vmatpush3.bf16.xpose.msra.mxu1 %v367_v40  ;;  %988 = vmatprep.mubr.msk.bf16.mxu1 %vm1124_vm0, %v1123_v0  ;;  %v1065_v40 = vld [vmem:[%s1177_s16 + $0x4] ss:$8 sps:$4 sm:$0xff]  }
 0x2a5   : > { %998 = vmatprep.subr.bf16.mxu1 %v1123_v0 }
 0x2ab   : > { %989 = vmatmul.mubr.msk.bf16.vlgmr.msra.gmra.mrb[4].mxu1 %vm211_vm1, %v355_v38 }
 0x2ac   : > { %999 = vmatpush3.bf16.xpose.msra.mxu1 %v524_v42  ;;  %1000 = vmatprep.mubr.msk.bf16.mxu1 %vm1124_vm0, %v1123_v0 }
 0x2ad   : > { %1010 = vmatprep.subr.bf16.mxu1 %v1123_v0 }
 0x2b3   : > { %1001 = vmatmul.mubr.msk.bf16.vlgmr.msra.gmra.mrb[8].mxu1 %vm211_vm1, %v512_v44 }
 0x2b4   : > { %1011 = vmatpush3.bf16.xpose.msra.mxu1 %v681_v45  ;;  %1012 = vmatprep.mubr.msk.bf16.mxu1 %vm1124_vm0, %v1123_v0 }
 0x2bb   : > { %1013 = vmatmul.mubr.msk.bf16.vlgmr.msra.gmra.mrb[12].mxu1 %vm211_vm1, %v669_v46  ;;  %v1066_v46 = vld [vmem:[%s1177_s16 + $0x4] ss:$8 sps:$4 sm:$0xff]  }
 0x376   : > { %v327_v47 = vpop.f32.mrb[0].mxu1 }
 0x377   : > { %v950_v48 = vpack.c.bf16 %v327_v47, %v327_v47  ;;  %v984_v49 = vpop.f32.mrb[1].mxu1 }
 0x378   : > { %v330_v50 = vpop.f32.mrb[2].mxu1 }
 0x379   : > { %343 = vst.msk [vmem:[%s1231_s30] sm:$0xf] %vm342_vm2, %v950_v48  ;;  %v951_v51 = vpack.c.bf16 %v330_v50, %v330_v50  ;;  %v985_v52 = vpop.f32.mrb[3].mxu1 }
 0x37b   : > { %344 = vst.msk [vmem:[%s1231_s30 + $0x4] sm:$0xf] %vm342_vm2, %v951_v51 }
 0x37e   : > { %v403_v53 = vpop.f32.mrb[4].mxu1 }
 0x37f   : > { %v404_v54 = vadd.f32 %v1190_v5, %v403_v53  ;;  %v990_v55 = vpop.f32.mrb[5].mxu1 }
 0x380   : > { %v406_v56 = vpop.f32.mrb[6].mxu1 }
 0x381   : > { %v407_v57 = vadd.f32 %v1190_v5, %v406_v56  ;;  %v991_v58 = vpop.f32.mrb[7].mxu1  ;;  %v410_v59 = vsel %vm211_vm1, %v404_v54, -inf }
 0x382   : > { %411 = vmax.xlane.f32.xlu1 %v410_v59 }
 0x383   : > { %v413_v60 = vsel %vm211_vm1, %v407_v57, -inf }
 0x384   : > { %414 = vmax.xlane.f32.xlu0 %v413_v60 }
 0x386   : > { %v560_v61 = vpop.f32.mrb[8].mxu1 }
 0x387   : > { %v561_v62 = vadd.f32 %v1190_v5, %v560_v61  ;;  %v1002_v63 = vpop.f32.mrb[9].mxu1 }
 0x388   : > { %v563_v1 = vpop.f32.mrb[10].mxu1 }
 0x389   : > { %v564_v2 = vadd.f32 %v1190_v5, %v563_v1  ;;  %v1003_v3 = vpop.f32.mrb[11].mxu1  ;;  %v567_v4 = vsel %vm211_vm1, %v561_v62, -inf }
 0x38a   : > { %568 = vmax.xlane.f32.xlu1 %v567_v4 }
 0x38b   : > { %v570_v6 = vsel %vm211_vm1, %v564_v2, -inf }
 0x38e   : > { %571 = vmax.xlane.f32.xlu1 %v570_v6  ;;  %v717_v7 = vpop.f32.mrb[12].mxu1 }
 0x38f   : > { %v718_v8 = vadd.f32 %v1190_v5, %v717_v7  ;;  %v1014_v9 = vpop.f32.mrb[13].mxu1 }
 0x390   : > { %v720_v10 = vpop.f32.mrb[14].mxu1 }
 0x391   : > { %v721_v11 = vadd.f32 %v1190_v5, %v720_v10  ;;  %v724_v12 = vsel %vm211_vm1, %v718_v8, -inf  ;;  %v1015_v13 = vpop.f32.mrb[15].mxu1 }
 0x392   : > { %725 = vmax.xlane.f32.xlu0 %v724_v12 }
 0x393   : > { %v727_v14 = vsel %vm211_vm1, %v721_v11, -inf }
 0x394   : > { %728 = vmax.xlane.f32.xlu1 %v727_v14 }
 0x40f   : > { %v412_v15 = vpop.xlane.xlu1 %411 }
 0x410   : > { %v416_v16 = vsub.f32 %v404_v54, %v412_v15 }
 0x411   : > { %v415_v17 = vpop.xlane.xlu0 %414 }
 0x412   : > { %v418_v18 = vmul.f32 1.442695, %v416_v16  ;;  %v417_v19 = vsub.f32 %v407_v57, %v415_v17 }
 0x414   : > { %1075 = vpow2.f32 %v418_v18  ;;  %v420_v20 = vmul.f32 1.442695, %v417_v19 }
 0x416   : > { %1077 = vpow2.f32 %v420_v20 }
 0x417   : > { %v569_v21 = vpop.xlane.xlu1 %568 }
 0x418   : > { %v573_v22 = vsub.f32 %v561_v62, %v569_v21 }
 0x41a   : > { %v575_v23 = vmul.f32 1.442695, %v573_v22 }
 0x41b   : > { %v572_v24 = vpop.xlane.xlu1 %571 }
 0x41c   : > { %1079 = vpow2.f32 %v575_v23  ;;  %v574_v5 = vsub.f32 %v564_v2, %v572_v24 }
 0x41e   : > { %v1076_v25 = vpop.eup %1075  ;;  %v577_v26 = vmul.f32 1.442695, %v574_v5 }
 0x41f   : > { %v726_v27 = vpop.xlane.xlu0 %725  ;;  %v422_v28 = vsel %vm211_vm1, %v1076_v25, 0.0 }
 0x420   : > { %v1078_v29 = vpop.eup %1077  ;;  %1081 = vpow2.f32 %v577_v26  ;;  %v730_v30 = vsub.f32 %v718_v8, %v726_v27  ;;  %423 = vadd.xlane.f32.xlu0 %v422_v28 }
 0x421   : > { %v425_v31 = vsel %vm211_vm1, %v1078_v29, 0.0  ;;  %v729_v41 = vpop.xlane.xlu1 %728 }
 0x422   : > { %v732_v32 = vmul.f32 1.442695, %v730_v30  ;;  %426 = vadd.xlane.f32.xlu1 %v425_v31  ;;  %v731_v42 = vsub.f32 %v721_v11, %v729_v41 }
 0x424   : > { %1083 = vpow2.f32 %v732_v32  ;;  %v734_v43 = vmul.f32 1.442695, %v731_v42 }
 0x426   : > { %v1080_v33 = vpop.eup %1079  ;;  %1085 = vpow2.f32 %v734_v43 }
 0x427   : > { %v579_v34 = vsel %vm211_vm1, %v1080_v33, 0.0 }
 0x428   : > { %580 = vadd.xlane.f32.xlu0 %v579_v34 }
 0x42a   : > { %v1082_v35 = vpop.eup %1081 }
 0x42b   : > { %v582_v36 = vsel %vm211_vm1, %v1082_v35, 0.0 }
 0x42c   : > { %583 = vadd.xlane.f32.xlu1 %v582_v36 }
 0x42e   : > { %v1084_v37 = vpop.eup %1083 }
 0x42f   : > { %v736_v38 = vsel %vm211_vm1, %v1084_v37, 0.0 }
 0x430   : > { %737 = vadd.xlane.f32.xlu0 %v736_v38  ;;  %v1086_v44 = vpop.eup %1085 }
 0x431   : > { %v739_v45 = vsel %vm211_vm1, %v1086_v44, 0.0 }
 0x43d   : > { %597 = vrot.lane.b32.xlu1 %v1064_v39, %s1127_s22 }
 0x446   : > { %440 = vrot.lane.b32.xlu0 %v1065_v40, %s1128_s23 }
 0x461   : > { %740 = vadd.xlane.f32.xlu1 %v739_v45 }
 0x472   : > { %754 = vrot.lane.b32.xlu1 %v1066_v46, %s1131_s26 }
 0x4ad   : > { %v424_v48 = vpop.xlane.xlu0 %423 }
 0x4af   : > { %v427_v47 = vpop.xlane.xlu1 %426 }
 0x4b0   : > { %1087 = vrcp.f32 %v427_v47 }
 0x4b1   : > { %1089 = vrcp.f32 %v424_v48 }
 0x4b5   : > { %v581_v49 = vpop.xlane.xlu0 %580 }
 0x4b9   : > { %v584_v50 = vpop.xlane.xlu1 %583 }
 0x4ba   : > { %1091 = vrcp.f32 %v584_v50  ;;  %v1088_v51 = vpop.eup %1087 }
 0x4bb   : > { %1093 = vrcp.f32 %v581_v49  ;;  %v1090_v53 = vpop.eup %1089  ;;  %v431_v54 = vmul.f32 %v1088_v51, %v1078_v29 }
 0x4bc   : > { %v430_v55 = vmul.f32 %v1090_v53, %v1076_v25 }
 0x4bd   : > { %v738_v52 = vpop.xlane.xlu0 %737  ;;  %v598_v59 = vpop.permute.xlu1 %597 }
 0x4be   : > { %v432_v57 = vpack.c.bf16 %v431_v54, %v430_v55  ;;  %1095 = vrcp.f32 %v738_v52 }
 0x4c1   : > { %v441_v56 = vpop.permute.xlu0 %440 }
 0x4c2   : > { %993 = vmatpush3.bf16.msra.mxu0 %v441_v56 }
 0x4c3   : > { %1004 = vmatprep.subr.bf16.mxu0 %v1123_v0 }
 0x4c4   : > { %v1092_v58 = vpop.eup %1091 }
 0x4c5   : > { %995 = vmatmul.mubr.msk.bf16.vlgmr.msra.gmra.mrb[4].mxu0 %vm211_vm1, %v432_v57  ;;  %v1094_v60 = vpop.eup %1093  ;;  %v588_v61 = vmul.f32 %v1092_v58, %v1082_v35 }
 0x4c6   : > { %1005 = vmatpush3.bf16.msra.mxu0 %v598_v59  ;;  %1006 = vmatprep.mubr.msk.bf16.mxu0 %vm1124_vm0, %v1123_v0  ;;  %v587_v62 = vmul.f32 %v1094_v60, %v1080_v33 }
 0x4c7   : > { %1016 = vmatprep.subr.bf16.mxu0 %v1123_v0 }
 0x4c8   : > { %v589_v63 = vpack.c.bf16 %v588_v61, %v587_v62  ;;  %v1096_v3 = vpop.eup %1095 }
 0x4c9   : > { %v744_v6 = vmul.f32 %v1096_v3, %v1084_v37 }
 0x4cd   : > { %1007 = vmatmul.mubr.msk.bf16.vlgmr.msra.gmra.mrb[8].mxu0 %vm211_vm1, %v589_v63 }
 0x4ce   : > { %1018 = vmatprep.mubr.msk.bf16.mxu0 %vm1124_vm0, %v1123_v0 }
 0x4ee   : > { %v741_v1 = vpop.xlane.xlu1 %740 }
 0x4ef   : > { %1097 = vrcp.f32 %v741_v1 }
 0x4f2   : > { %v755_v2 = vpop.permute.xlu1 %754 }
 0x4f3   : > { %1017 = vmatpush3.bf16.msra.mxu0 %v755_v2 }
 0x4f9   : > { %v1098_v4 = vpop.eup %1097 }
 0x4fa   : > { %v745_v7 = vmul.f32 %v1098_v4, %v1086_v44 }
 0x4fc   : > { %v746_v8 = vpack.c.bf16 %v745_v7, %v744_v6 }
 0x4fe   : > { %1019 = vmatmul.mubr.msk.bf16.vlgmr.msra.gmra.mrb[12].mxu0 %vm211_vm1, %v746_v8 }
 0x598   : > { %v480_v9 = vpop.f32.mrb[4].mxu0 }
 0x599   : > { %v952_v10 = vpack.c.bf16 %v480_v9, %v480_v9  ;;  %v996_v11 = vpop.f32.mrb[5].mxu0 }
 0x59a   : > { %v483_v12 = vpop.f32.mrb[6].mxu0 }
 0x59b   : > { %v953_v13 = vpack.c.bf16 %v483_v12, %v483_v12  ;;  %493 = vrot.lane.b32.xlu0 %v952_v10, %s1130_s25  ;;  %v997_v0 = vpop.f32.mrb[7].mxu0 }
 0x59d   : > { %495 = vrot.lane.b32.xlu1 %v953_v13, %s1130_s25 }
 0x5a0   : > { %v637_v14 = vpop.f32.mrb[8].mxu0 }
 0x5a1   : > { %v954_v15 = vpack.c.bf16 %v637_v14, %v637_v14  ;;  %v1008_v16 = vpop.f32.mrb[9].mxu0 }
 0x5a2   : > { %v640_v17 = vpop.f32.mrb[10].mxu0 }
 0x5a3   : > { %v955_v18 = vpack.c.bf16 %v640_v17, %v640_v17  ;;  %650 = vrot.lane.b32.xlu0 %v954_v15, %s1129_s24  ;;  %v1009_v19 = vpop.f32.mrb[11].mxu0 }
 0x5a5   : > { %652 = vrot.lane.b32.xlu1 %v955_v18, %s1129_s24 }
 0x5d1   : > { %v794_v20 = vpop.f32.mrb[12].mxu0 }
 0x5d2   : > { %v956_v21 = vpack.c.bf16 %v794_v20, %v794_v20  ;;  %v1020_v22 = vpop.f32.mrb[13].mxu0 }
 0x5d3   : > { %v797_v23 = vpop.f32.mrb[14].mxu0 }
 0x5d4   : > { %v957_v24 = vpack.c.bf16 %v797_v23, %v797_v23  ;;  %807 = vrot.lane.b32.xlu0 %v956_v21, %s1126_s21  ;;  %v1021_v5 = vpop.f32.mrb[15].mxu0 }
 0x5d6   : > { %809 = vrot.lane.b32.xlu1 %v957_v24, %s1126_s21 }
 0x60d   : > { %v494_v25 = vpop.permute.xlu0 %493 }
 0x60e   : > { %500 = vst.msk [vmem:[%s1231_s30] sm:$0xf] %vm499_vm3, %v494_v25 }
 0x60f   : > { %v496_v26 = vpop.permute.xlu1 %495 }
 0x610   : > { %501 = vst.msk [vmem:[%s1231_s30 + $0x4] sm:$0xf] %vm499_vm3, %v496_v26 }
 0x615   : > { %v651_v27 = vpop.permute.xlu0 %650 }
 0x616   : > { %657 = vst.msk [vmem:[%s1231_s30] sm:$0xf] %vm656_vm4, %v651_v27 }
 0x617   : > { %v653_v28 = vpop.permute.xlu1 %652 }
 0x618   : > { %658 = vst.msk [vmem:[%s1231_s30 + $0x4] sm:$0xf] %vm656_vm4, %v653_v28 }
 0x646   : > { %v808_v29 = vpop.permute.xlu0 %807 }
 0x647   : > { %814 = vst.msk [vmem:[%s1231_s30] sm:$0xf] %vm813_vm5, %v808_v29 }
 0x648   : > { %v810_v30 = vpop.permute.xlu1 %809 }
 0x649   : > { %815 = vst.msk [vmem:[%s1231_s30 + $0x4] sm:$0xf] %vm813_vm5, %v810_v30 }
 0x64a PF: > { %s12_s11 = sadd.s32 1, %s1121_s11   ;;  %s1292_s9 = smov %s1117_s10 }
 0x64b   : > { %p9_p5 = scmp.ge.s32.totalorder %s12_s11, 4   ;;  %s1293_s10 = smov %s1295_s12 }
 0x64d   :  { %11 = sbr.rel (!%p9_p5) target bundleno = 2 (0x2), region = 62 }

// kernel: student_grafomer_forward.28
= control target key start
LH: loop header
LB: loop body
LE: loop exit
PB: predicated region body
PF: predicated region fallthrough
CT: control target
= control target key end

     0   :  { %vm31_vm0 = vcmask 523264   ;;  %v554_v14 = vmov 0.0   ;;  %vm429_vm1 = vcmask 519168   ;;  %s689_s1 = inlined_call_operand.vmem [shape: bf16[64,128], index: 1, kind: input, shape index: {}]   ;;  %s690_s0 = inlined_call_operand.vmem [shape: bf16[32,64], index: 0, kind: input, shape index: {}]   ;;  %s691_s3 = inlined_call_operand.vmem [shape: bf16[128,64], index: 3, kind: input, shape index: {}]   ;;  %s692_s2 = inlined_call_operand.vmem [shape: f32[1,128], index: 2, kind: input, shape index: {}]   ;;  %s693_s4 = inlined_call_operand.vmem [shape: f32[1,64], index: 4, kind: input, shape index: {}]   ;;  %s694_s5 = inlined_call_operand.vmem [shape: f32[1,64], index: 5, kind: input, shape index: {}]   ;;  %s695_s6 = inlined_call_operand.vmem [shape: f32[1,64], index: 6, kind: input, shape index: {}]   ;;  %s696_s7 = inlined_call_operand.vmem [shape: bf16[32,64], index: 7, kind: output, shape index: {}]  }
   0x1   :  { %v524_v0 = vld [vmem:[%s689_s1] sm:$0xff]   ;;  %v525_v1 = vld [vmem:[%s689_s1 + $0x8] sm:$0xff]   ;;  %v526_v2 = vld [vmem:[%s689_s1 + $0x10] sm:$0xff]   ;;  %34 = vst.msk [vmem:[#allocation2 + $0x10] sm:$0xff] %vm31_vm0, %v554_v14 }
   0x2   :  { %491 = vmatprep.subr.bf16.mxu0 %v524_v0  ;;  %v528_v3 = vld [vmem:[%s690_s0] sm:$0xff]   ;;  %v527_v4 = vld [vmem:[%s689_s1 + $0x18] sm:$0xff]   ;;  %v529_v5 = vld [vmem:[%s690_s0 + $0x8] sm:$0xff]   ;;  %32 = vst.msk [vmem:[#allocation2] sm:$0xff] %vm31_vm0, %v554_v14 }
   0x3   :  { %492 = vmatpush3.bf16.msra.mxu0 %v524_v0  ;;  %499 = vmatprep.mubr.msk.bf16.mxu0 %vm31_vm0, %v528_v3  ;;  %v530_v6 = vld [vmem:[%s691_s3] sm:$0xff]   ;;  %v531_v7 = vld [vmem:[%s691_s3 + $0x8] sm:$0xff]   ;;  %v532_v8 = vld [vmem:[%s691_s3 + $0x10] sm:$0xff]   ;;  %33 = vst.msk [vmem:[#allocation2 + $0x8] sm:$0xff] %vm31_vm0, %v554_v14 }
   0x4   :  { %493 = vmatprep.subr.bf16.mxu0 %v525_v1  ;;  %503 = vmatprep.subr.bf16.mxu1 %v530_v6  ;;  %v533_v9 = vld [vmem:[%s691_s3 + $0x18] sm:$0xff]   ;;  %v534_v10 = vld [vmem:[%s691_s3 + $0x20] sm:$0xff]   ;;  %v535_v11 = vld [vmem:[%s691_s3 + $0x28] sm:$0xff]   ;;  %35 = vst.msk [vmem:[#allocation2 + $0x18] sm:$0xff] %vm31_vm0, %v554_v14 }
   0x5   :  { %504 = vmatpush3.bf16.msra.mxu1 %v530_v6  ;;  %v536_v12 = vld [vmem:[%s691_s3 + $0x30] sm:$0xff]   ;;  %v537_v13 = vld [vmem:[%s691_s3 + $0x38] sm:$0xff]   ;;  %v438_v15 = vld [vmem:[%s692_s2] ss:$0 sm:$0xff] }
   0x6   :  { %505 = vmatprep.subr.bf16.mxu1 %v531_v7 }
   0x7   :  { %494 = vmatpush3.bf16.msra.mxu0 %v525_v1 }
   0x8   :  { %495 = vmatprep.subr.bf16.mxu0 %v526_v2  ;;  %v183_v62 = vld [vmem:[#allocation2 + $0x10] sm:$0xff] }
   0x9   :  { %506 = vmatpush3.bf16.msra.mxu1 %v531_v7  ;;  %v181_v63 = vld [vmem:[#allocation2] sm:$0xff] }
   0xa   :  { %507 = vmatprep.subr.bf16.mxu1 %v532_v8 }
   0xb   :  { %496 = vmatpush3.bf16.msra.mxu0 %v526_v2  ;;  %v184_v1 = vld [vmem:[#allocation2 + $0x18] sm:$0xff] }
   0xc   :  { %497 = vmatprep.subr.bf16.mxu0 %v527_v4 }
   0xd   :  { %508 = vmatpush3.bf16.msra.mxu1 %v532_v8 }
   0xe   :  { %509 = vmatprep.subr.bf16.mxu1 %v533_v9 }
   0xf   :  { %498 = vmatpush3.bf16.msra.mxu0 %v527_v4  ;;  %v182_v4 = vld [vmem:[#allocation2 + $0x8] sm:$0xff] }
  0x11   :  { %510 = vmatpush3.bf16.msra.mxu1 %v533_v9 }
  0x12   :  { %500 = vmatmul.mubr.msk.bf16.vlgmr.msra.gmra.mrb[0].mxu0 %vm31_vm0, %v529_v5  ;;  %511 = vmatprep.subr.bf16.mxu1 %v534_v10 }
  0x15   :  { %512 = vmatpush3.bf16.msra.mxu1 %v534_v10  ;;  %v474_v10 = vld [vmem:[%s690_s0 + $0x8] sm:$0xff]  }
  0x16   :  { %513 = vmatprep.subr.bf16.mxu1 %v535_v11 }
  0x19   :  { %514 = vmatpush3.bf16.msra.mxu1 %v535_v11  ;;  %v467_v11 = vld [vmem:[%s690_s0] sm:$0xff]  }
  0x1a   :  { %515 = vmatprep.subr.bf16.mxu1 %v536_v12 }
  0x1d   :  { %516 = vmatpush3.bf16.msra.mxu1 %v536_v12  ;;  %v455_v12 = vld [vmem:[%s693_s4] ss:$0 sm:$0xff] }
  0x1e   :  { %517 = vmatprep.subr.bf16.mxu1 %v537_v13 }
  0x21   :  { %518 = vmatpush3.bf16.msra.mxu1 %v537_v13  ;;  %v472_v13 = vunpack.c.l.bf16 %v474_v10 }
  0xe5   :  { %v501_v16 = vpop.f32.mrb[0].mxu0 }
  0xe6   :  { %v139_v17 = vadd.f32 %v501_v16, %v438_v15  ;;  %v130_v18 = vpop.f32.mrb[1].mxu0 }
  0xe7   :  { %v131_v19 = vadd.f32 %v438_v15, %v130_v18  ;;  %v502_v20 = vpop.f32.mrb[2].mxu0  ;;  %v473_v18 = vunpack.c.h.bf16 %v474_v10 }
  0xe8   :  { %v147_v21 = vmul.f32 %v139_v17, %v139_v17  ;;  %v142_v22 = vadd.f32 %v502_v20, %v438_v15  ;;  %v133_v23 = vpop.f32.mrb[3].mxu0 }
  0xe9   :  { %v145_v24 = vmul.f32 %v131_v19, %v131_v19  ;;  %v134_v25 = vadd.f32 %v438_v15, %v133_v23  ;;  %v468_v15 = vunpack.c.l.bf16 %v467_v11 }
  0xea   :  { %v151_v26 = vmul.f32 %v147_v21, %v139_v17  ;;  %v148_v27 = vmul.f32 %v142_v22, %v142_v22  ;;  %v469_v21 = vunpack.c.h.bf16 %v467_v11 }
  0xeb   :  { %v149_v28 = vmul.f32 %v145_v24, %v131_v19  ;;  %v146_v29 = vmul.f32 %v134_v25, %v134_v25 }
  0xec   :  { %v155_v30 = vmul.f32 0.044715, %v151_v26  ;;  %v152_v31 = vmul.f32 %v148_v27, %v142_v22 }
  0xed   :  { %v153_v32 = vmul.f32 0.044715, %v149_v28  ;;  %v150_v33 = vmul.f32 %v146_v29, %v134_v25 }
  0xee   :  { %v159_v34 = vadd.f32 %v155_v30, %v139_v17  ;;  %v156_v35 = vmul.f32 0.044715, %v152_v31 }
  0xef   :  { %v154_v36 = vmul.f32 0.044715, %v150_v33  ;;  %v157_v37 = vadd.f32 %v153_v32, %v131_v19 }
  0xf0   :  { %v163_v38 = vmul.f32 0.7978846, %v159_v34  ;;  %v160_v39 = vadd.f32 %v156_v35, %v142_v22 }
  0xf1   :  { %v158_v40 = vadd.f32 %v154_v36, %v134_v25  ;;  %v161_v41 = vmul.f32 0.7978846, %v157_v37 }
  0xf2   :  { %538 = vtanh.f32 %v163_v38  ;;  %v164_v42 = vmul.f32 0.7978846, %v160_v39 }
  0xf3   :  { %v162_v43 = vmul.f32 0.7978846, %v158_v40  ;;  %540 = vtanh.f32 %v161_v41 }
  0xf4   :  { %542 = vtanh.f32 %v164_v42 }
  0xf5   :  { %544 = vtanh.f32 %v162_v43 }
  0xfc   :  { %v539_v44 = vpop.eup %538 }
  0xfd   :  { %v541_v45 = vpop.eup %540  ;;  %v171_v46 = vadd.f32 1.0, %v539_v44 }
  0xfe   :  { %v543_v47 = vpop.eup %542  ;;  %v169_v48 = vadd.f32 1.0, %v541_v45 }
  0xff   :  { %v545_v49 = vpop.eup %544  ;;  %v172_v50 = vadd.f32 1.0, %v543_v47  ;;  %v175_v51 = vmul.f32 0.5, %v171_v46 }
 0x100   :  { %v170_v52 = vadd.f32 1.0, %v545_v49  ;;  %v173_v53 = vmul.f32 0.5, %v169_v48 }
 0x101   :  { %v176_v54 = vmul.f32 0.5, %v172_v50  ;;  %v179_v56 = vmul.f32 %v175_v51, %v139_v17 }
 0x102   :  { %v174_v55 = vmul.f32 0.5, %v170_v52  ;;  %v177_v58 = vmul.f32 %v173_v53, %v131_v19 }
 0x103   :  { %v180_v57 = vmul.f32 %v176_v54, %v142_v22 }
 0x104   :  { %v178_v59 = vmul.f32 %v174_v55, %v134_v25 }
 0x105   :  { %v186_v60 = vpack.c.bf16 %v180_v57, %v179_v56 }
 0x106   :  { %v185_v61 = vpack.c.bf16 %v178_v59, %v177_v58 }
 0x108   :  { %519 = vmatprep.mubr.bf16.mxu1 %v185_v61 }
 0x109   :  { %520 = vmatmul.mubr.bf16.vlgmr.msra.gmra.mrb[0].mxu1 %v186_v60 }
 0x1dc   :  { %v521_v0 = vpop.f32.mrb[0].mxu1 }
 0x1dd   :  { %v302_v2 = vadd.f32 %v521_v0, %v183_v62  ;;  %v285_v3 = vpop.f32.mrb[1].mxu1 }
 0x1de   :  { %v300_v5 = vadd.f32 %v285_v3, %v181_v63  ;;  %v522_v6 = vpop.f32.mrb[2].mxu1 }
 0x1df   :  { %306 = vst.msk [vmem:[#allocation2 + $0x10] sm:$0xff] %vm31_vm0, %v302_v2  ;;  %v303_v7 = vadd.f32 %v522_v6, %v184_v1  ;;  %v288_v8 = vpop.f32.mrb[3].mxu1  ;;  %v456_v2 = vld [vmem:[%s694_s5] ss:$0 sm:$0xff] }
 0x1e0   :  { %304 = vst.msk [vmem:[#allocation2] sm:$0xff] %vm31_vm0, %v300_v5  ;;  %v301_v9 = vadd.f32 %v288_v8, %v182_v4  ;;  %v457_v4 = vld [vmem:[%s695_s6] ss:$0 sm:$0xff] }
 0x1e1   :  { %307 = vst.msk [vmem:[#allocation2 + $0x18] sm:$0xff] %vm31_vm0, %v303_v7 }
 0x1e2   :  { %305 = vst.msk [vmem:[#allocation2 + $0x8] sm:$0xff] %vm31_vm0, %v301_v9 }
 0x1e6   :  { %v313_v14 = vld [vmem:[#allocation2 + $0x10] sm:$0xff] }
 0x1e7   :  { %v324_v16 = vadd.f32 %v455_v12, %v313_v14  ;;  %v311_v17 = vld [vmem:[#allocation2] sm:$0xff] }
 0x1e8   :  { %v322_v19 = vadd.f32 %v455_v12, %v311_v17  ;;  %v314_v20 = vld [vmem:[#allocation2 + $0x18] sm:$0xff] }
 0x1e9   :  { %v336_v22 = vadd.f32 %v472_v13, %v324_v16  ;;  %v325_v23 = vadd.f32 %v455_v12, %v314_v20  ;;  %v312_v24 = vld [vmem:[#allocation2 + $0x8] sm:$0xff] }
 0x1ea   :  { %v334_v25 = vadd.f32 %v468_v15, %v322_v19  ;;  %v323_v26 = vadd.f32 %v455_v12, %v312_v24 }
 0x1eb   :  { %v344_v27 = vsel %vm31_vm0, %v336_v22, 0.0  ;;  %v337_v28 = vadd.f32 %v473_v18, %v325_v23 }
 0x1ec   :  { %345 = vadd.xlane.f32.xlu1 %v344_v27  ;;  %v338_v29 = vsel %vm31_vm0, %v334_v25, 0.0  ;;  %v335_v30 = vadd.f32 %v469_v21, %v323_v26 }
 0x1ed   :  { %339 = vadd.xlane.f32.xlu0 %v338_v29  ;;  %v347_v31 = vsel %vm31_vm0, %v337_v28, 0.0 }
 0x1ee   :  { %v341_v32 = vsel %vm31_vm0, %v335_v30, 0.0 }
 0x1f0   :  { %348 = vadd.xlane.f32.xlu1 %v347_v31 }
 0x1f1   :  { %342 = vadd.xlane.f32.xlu0 %v341_v32 }
 0x279   :  { %v346_v33 = vpop.xlane.xlu1 %345 }
 0x27a   :  { %v353_v34 = vmul.f32 0.015625, %v346_v33  ;;  %v340_v35 = vpop.xlane.xlu0 %339 }
 0x27b   :  { %v351_v36 = vmul.f32 0.015625, %v340_v35 }
 0x27c   :  { %v357_v37 = vsub.f32 %v336_v22, %v353_v34 }
 0x27d   :  { %v355_v38 = vsub.f32 %v334_v25, %v351_v36  ;;  %v349_v39 = vpop.xlane.xlu1 %348 }
 0x27e   :  { %v354_v40 = vmul.f32 0.015625, %v349_v39  ;;  %v343_v41 = vpop.xlane.xlu0 %342  ;;  %v361_v47 = vmul.f32 %v357_v37, %v357_v37 }
 0x27f   :  { %v352_v42 = vmul.f32 0.015625, %v343_v41  ;;  %v359_v43 = vmul.f32 %v355_v38, %v355_v38 }
 0x280   :  { %v358_v44 = vsub.f32 %v337_v28, %v354_v40  ;;  %v369_v49 = vsel %vm31_vm0, %v361_v47, 0.0 }
 0x281   :  { %v356_v45 = vsub.f32 %v335_v30, %v352_v42  ;;  %v363_v46 = vsel %vm31_vm0, %v359_v43, 0.0 }
 0x282   :  { %364 = vadd.xlane.f32.xlu0 %v363_v46  ;;  %v362_v51 = vmul.f32 %v358_v44, %v358_v44 }
 0x283   :  { %v360_v48 = vmul.f32 %v356_v45, %v356_v45 }
 0x284   :  { %v372_v52 = vsel %vm31_vm0, %v362_v51, 0.0 }
 0x285   :  { %v366_v50 = vsel %vm31_vm0, %v360_v48, 0.0 }
 0x286   :  { %370 = vadd.xlane.f32.xlu0 %v369_v49  ;;  %367 = vadd.xlane.f32.xlu1 %v366_v50 }
 0x28a   :  { %373 = vadd.xlane.f32.xlu1 %v372_v52 }
 0x30f   :  { %v365_v53 = vpop.xlane.xlu0 %364 }
 0x310   :  { %v375_v54 = vmul.f32 0.015625, %v365_v53 }
 0x312   :  { %v379_v55 = vadd.f32 1e-05, %v375_v54 }
 0x313   :  { %v368_v56 = vpop.xlane.xlu1 %367  ;;  %v371_v57 = vpop.xlane.xlu0 %370 }
 0x314   :  { %546 = vrsqrt.f32 %v379_v55  ;;  %v376_v58 = vmul.f32 0.015625, %v368_v56  ;;  %v377_v59 = vmul.f32 0.015625, %v371_v57 }
 0x316   :  { %v380_v60 = vadd.f32 1e-05, %v376_v58  ;;  %v381_v61 = vadd.f32 1e-05, %v377_v59 }
 0x317   :  { %v374_v62 = vpop.xlane.xlu1 %373 }
 0x318   :  { %548 = vrsqrt.f32 %v380_v60  ;;  %v378_v63 = vmul.f32 0.015625, %v374_v62 }
 0x319   :  { %550 = vrsqrt.f32 %v381_v61 }
 0x31a   :  { %v382_v0 = vadd.f32 1e-05, %v378_v63 }
 0x31c   :  { %552 = vrsqrt.f32 %v382_v0 }
 0x31e   :  { %v547_v1 = vpop.eup %546 }
 0x31f   :  { %v387_v3 = vmul.f32 %v547_v1, %v355_v38 }
 0x321   :  { %v398_v5 = vmul.f32 %v456_v2, %v387_v3 }
 0x322   :  { %v549_v6 = vpop.eup %548 }
 0x323   :  { %v551_v7 = vpop.eup %550  ;;  %v409_v8 = vadd.f32 %v457_v4, %v398_v5  ;;  %v388_v9 = vmul.f32 %v549_v6, %v356_v45 }
 0x324   :  { %v389_v10 = vmul.f32 %v551_v7, %v357_v37 }
 0x325   :  { %v462_v11 = vpack.c.bf16 %v409_v8, %v409_v8  ;;  %v399_v12 = vmul.f32 %v456_v2, %v388_v9 }
 0x326   :  { %v553_v13 = vpop.eup %552  ;;  %v400_v14 = vmul.f32 %v456_v2, %v389_v10 }
 0x327   :  { %430 = vst.msk [vmem:[%s696_s7] sm:$0xf] %vm429_vm1, %v462_v11  ;;  %v410_v15 = vadd.f32 %v457_v4, %v399_v12  ;;  %v390_v16 = vmul.f32 %v553_v13, %v358_v44 }
 0x328   :  { %v411_v17 = vadd.f32 %v457_v4, %v400_v14 }
 0x329   :  { %v463_v18 = vpack.c.bf16 %v410_v15, %v410_v15  ;;  %v401_v19 = vmul.f32 %v456_v2, %v390_v16 }
 0x32a   :  { %v464_v20 = vpack.c.bf16 %v411_v17, %v411_v17 }
 0x32b   :  { %431 = vst.msk [vmem:[%s696_s7 + $0x4] sm:$0xf] %vm429_vm1, %v463_v18  ;;  %v412_v21 = vadd.f32 %v457_v4, %v401_v19 }
 0x32c   :  { %432 = vst.msk [vmem:[%s696_s7 + $0x8] sm:$0xf] %vm429_vm1, %v464_v20 }
 0x32d   :  { %v465_v22 = vpack.c.bf16 %v412_v21, %v412_v21 }
 0x32f   :  { %433 = vst.msk [vmem:[%s696_s7 + $0xc] sm:$0xf] %vm429_vm1, %v465_v22 }

// kernel: student_grafomer_forward.37
= control target key start
LH: loop header
LB: loop body
LE: loop exit
PB: predicated region body
PF: predicated region fallthrough
CT: control target
= control target key end

     0   :  { %vm68_vm0 = vcmask 523264   ;;  %s247_s1 = inlined_call_operand.vmem [shape: bf16[64,128], index: 1, kind: input, shape index: {}]   ;;  %s248_s0 = inlined_call_operand.vmem [shape: bf16[32,64], index: 0, kind: input, shape index: {}]   ;;  %s249_s2 = inlined_call_operand.vmem [shape: f32[1,128], index: 2, kind: input, shape index: {}]   ;;  %s250_s3 = inlined_call_operand.vmem [shape: bf16[32,128], index: 3, kind: output, shape index: {}]  }
   0x1   :  { %v194_v0 = vld [vmem:[%s247_s1] sm:$0xff]   ;;  %v195_v1 = vld [vmem:[%s247_s1 + $0x8] sm:$0xff]   ;;  %v196_v2 = vld [vmem:[%s247_s1 + $0x10] sm:$0xff]  }
   0x2   :  { %182 = vmatprep.subr.bf16.mxu0 %v194_v0  ;;  %v198_v3 = vld [vmem:[%s248_s0] sm:$0xff]   ;;  %v197_v4 = vld [vmem:[%s247_s1 + $0x18] sm:$0xff]   ;;  %v199_v5 = vld [vmem:[%s248_s0 + $0x8] sm:$0xff]  }
   0x3   :  { %183 = vmatpush3.bf16.msra.mxu0 %v194_v0  ;;  %190 = vmatprep.mubr.msk.bf16.mxu0 %vm68_vm0, %v198_v3  ;;  %v148_v7 = vld [vmem:[%s249_s2] ss:$0 sm:$0xff] }
   0x4   :  { %184 = vmatprep.subr.bf16.mxu0 %v195_v1 }
   0x7   :  { %185 = vmatpush3.bf16.msra.mxu0 %v195_v1 }
   0x8   :  { %186 = vmatprep.subr.bf16.mxu0 %v196_v2 }
   0xb   :  { %187 = vmatpush3.bf16.msra.mxu0 %v196_v2 }
   0xc   :  { %188 = vmatprep.subr.bf16.mxu0 %v197_v4 }
   0xf   :  { %189 = vmatpush3.bf16.msra.mxu0 %v197_v4 }
  0x12   :  { %191 = vmatmul.mubr.msk.bf16.vlgmr.msra.gmra.mrb[0].mxu0 %vm68_vm0, %v199_v5 }
  0xe5   :  { %v192_v6 = vpop.f32.mrb[0].mxu0 }
  0xe6   :  { %v109_v8 = vpop.f32.mrb[1].mxu0  ;;  %v118_v10 = vadd.f32 %v192_v6, %v148_v7 }
  0xe7   :  { %v193_v9 = vpop.f32.mrb[2].mxu0  ;;  %v110_v13 = vadd.f32 %v148_v7, %v109_v8 }
  0xe8   :  { %v121_v11 = vadd.f32 %v193_v9, %v148_v7  ;;  %v112_v12 = vpop.f32.mrb[3].mxu0 }
  0xe9   :  { %v113_v14 = vadd.f32 %v148_v7, %v112_v12 }
  0xea   :  { %v173_v15 = vpack.c.bf16 %v121_v11, %v118_v10 }
  0xeb   :  { %v168_v16 = vpack.c.bf16 %v113_v14, %v110_v13 }
  0xec   :  { %175 = vst [vmem:[%s250_s3 + $0x8] sm:$0xff] %v173_v15  }
  0xed   :  { %169 = vst [vmem:[%s250_s3] sm:$0xff] %v168_v16  }

// kernel: student_grafomer_forward.33
= control target key start
LH: loop header
LB: loop body
LE: loop exit
PB: predicated region body
PF: predicated region fallthrough
CT: control target
= control target key end

     0   :  { %v178_v1 = vmov 0   ;;  %vm82_vm0 = vcmask 523264   ;;  %v27_v10 = vlaneseq  ;;  %vm141_vm1 = vcmask 1043456   ;;  %s235_s1 = inlined_call_operand.vmem [shape: bf16[64,192], index: 1, kind: input, shape index: {}]   ;;  %s236_s0 = inlined_call_operand.vmem [shape: bf16[16,64], index: 0, kind: input, shape index: {}]   ;;  %s237_s2 = inlined_call_operand.vmem [shape: f32[1,192], index: 2, kind: input, shape index: {}]   ;;  %s238_s3 = inlined_call_operand.vmem [shape: bf16[16,192], index: 3, kind: output, shape index: {}]  }
   0x1   :  { %v165_v0 = vld [vmem:[%s235_s1 + $0x4] ss:$8 sps:$4 sm:$0xff]   ;;  %118 = vmatprep.mubr.bf16.mxu0 %v178_v1  ;;  %v167_v2 = vld [vmem:[%s235_s1] ss:$8 sps:$4 sm:$0xff]   ;;  %v168_v3 = vld [vmem:[%s235_s1 + $0x14] ss:$8 sps:$4 sm:$0xff]  }
   0x2   :  { %86 = vmatprep.subr.bf16.mxu0 %v165_v0  ;;  %v170_v4 = vld [vmem:[%s235_s1 + $0x10] ss:$8 sps:$4 sm:$0xff]   ;;  %v171_v5 = vld [vmem:[%s235_s1 + $0x24] ss:$8 sps:$4 sm:$0xff]   ;;  %v173_v6 = vld [vmem:[%s235_s1 + $0x20] ss:$8 sps:$4 sm:$0xff]  }
   0x3   :  { %87 = vmatpush1.bf16.msra.mxu0 %v167_v2  ;;  %v174_v7 = vld [vmem:[%s235_s1 + $0x34] ss:$8 sps:$4 sm:$0xff]   ;;  %v176_v8 = vld [vmem:[%s235_s1 + $0x30] ss:$8 sps:$4 sm:$0xff]   ;;  %v177_v9 = vld [vmem:[%s236_s0] sm:$0xff]   ;;  %v28_v11 = vshrl.u32 %v27_v10, 7 }
   0x4   :  { %88 = vmatprep.subr.bf16.mxu0 %v168_v3  ;;  %v25_v13 = vld [vmem:[%s237_s2] sm:$0x3]  ;;  %vm142_vm2 = vcmask 523268  }
   0x5   :  { %v29_v12 = vsub.s32 0, %v28_v11  ;;  %v33_v14 = vsub.s32 1, %v28_v11  ;;  %vm143_vm3 = vmor %vm142_vm2, %vm141_vm1 }
   0x7   :  { %89 = vmatpush1.bf16.msra.mxu0 %v170_v4  ;;  %v30_v15 = vrot.slane %v25_v13, %v29_v12  ;;  %v34_v16 = vrot.slane %v25_v13, %v33_v14 }
   0x8   :  { %90 = vmatprep.subr.bf16.mxu0 %v171_v5 }
   0xb   :  { %91 = vmatpush1.bf16.msra.mxu0 %v173_v6 }
   0xc   :  { %92 = vmatprep.subr.bf16.mxu0 %v174_v7 }
   0xf   :  { %93 = vmatpush1.bf16.msra.mxu0 %v176_v8 }
  0x12   :  { %159 = vmatmul.mubr.msk.bf16.vlgmr.msra.gmra.mrb[0].mxu0 %vm82_vm0, %v177_v9 }
  0xe5   :  { %v120_v17 = vpop.f32.mrb[0].mxu0 }
  0xe6   :  { %v121_v18 = vadd.f32 %v120_v17, %v30_v15  ;;  %v122_v19 = vpop.f32.mrb[1].mxu0 }
  0xe7   :  { %v123_v20 = vadd.f32 %v122_v19, %v34_v16  ;;  %v124_v21 = vpop.f32.mrb[2].mxu0 }
  0xe8   :  { %v125_v22 = vadd.f32 %v124_v21, %v30_v15  ;;  %v126_v23 = vpop.f32.mrb[3].mxu0 }
  0xe9   :  { %v162_v24 = vpack.c.bf16 %v123_v20, %v121_v18  ;;  %v127_v25 = vadd.f32 %v126_v23, %v34_v16 }
  0xeb   :  { %144 = vst.msk [vmem:[%s238_s3] sm:$0xff] %vm143_vm3, %v162_v24  ;;  %v163_v26 = vpack.c.bf16 %v127_v25, %v125_v22 }
  0xed   :  { %145 = vst.msk [vmem:[%s238_s3 + $0x8] sm:$0xff] %vm143_vm3, %v163_v26 }

// kernel: student_grafomer_forward.36
= control target key start
LH: loop header
LB: loop body
LE: loop exit
PB: predicated region body
PF: predicated region fallthrough
CT: control target
= control target key end

     0   :  { %v156_v0 = vmov 0.0   ;;  %vm157_vm0 = vmmov 0   ;;  %vm61_vm1 = vcmask 523264   ;;  %vm114_vm2 = vcmask 519168   ;;  %s202_s1 = inlined_call_operand.vmem [shape: bf16[64,64], index: 1, kind: input, shape index: {}]   ;;  %s203_s0 = inlined_call_operand.vmem [shape: bf16[16,64], index: 0, kind: input, shape index: {}]   ;;  %s204_s2 = inlined_call_operand.vmem [shape: f32[1,64], index: 2, kind: input, shape index: {}]   ;;  %s205_s3 = inlined_call_operand.vmem [shape: bf16[16,64], index: 3, kind: output, shape index: {}]  }
   0x1   :  { %137 = vmatprep.subr.bf16.mxu0 %v156_v0  ;;  %v151_v1 = vld [vmem:[%s202_s1] sm:$0xff]   ;;  %145 = vmatprep.mubr.msk.bf16.mxu0 %vm157_vm0, %v156_v0  ;;  %v152_v2 = vld [vmem:[%s202_s1 + $0x8] sm:$0xff]   ;;  %v153_v3 = vld [vmem:[%s202_s1 + $0x10] sm:$0xff]  }
   0x2   :  { %138 = vmatpush3.bf16.msra.mxu0 %v151_v1  ;;  %v154_v4 = vld [vmem:[%s202_s1 + $0x18] sm:$0xff]   ;;  %v155_v5 = vld [vmem:[%s203_s0] sm:$0xff]  }
   0x3   :  { %139 = vmatprep.subr.bf16.mxu0 %v156_v0  ;;  %v121_v6 = vld [vmem:[%s204_s2] ss:$0 sm:$0xff] }
   0x6   :  { %140 = vmatpush3.bf16.msra.mxu0 %v152_v2 }
   0x7   :  { %141 = vmatprep.subr.bf16.mxu0 %v156_v0 }
   0xa   :  { %142 = vmatpush3.bf16.msra.mxu0 %v153_v3 }
   0xb   :  { %143 = vmatprep.subr.bf16.mxu0 %v156_v0 }
   0xe   :  { %144 = vmatpush3.bf16.msra.mxu0 %v154_v4 }
  0x11   :  { %146 = vmatmul.mubr.msk.bf16.vlgmr.msra.gmra.mrb[0].mxu0 %vm61_vm1, %v155_v5 }
  0xe4   :  { %v99_v7 = vpop.f32.mrb[0].mxu0 }
  0xe5   :  { %v100_v8 = vadd.f32 %v121_v6, %v99_v7  ;;  %v147_v9 = vpop.f32.mrb[1].mxu0 }
  0xe6   :  { %v102_v10 = vpop.f32.mrb[2].mxu0 }
  0xe7   :  { %v130_v11 = vpack.c.bf16 %v100_v8, %v100_v8  ;;  %v103_v12 = vadd.f32 %v121_v6, %v102_v10  ;;  %v148_v13 = vpop.f32.mrb[3].mxu0 }
  0xe9   :  { %115 = vst.msk [vmem:[%s205_s3] sm:$0xf] %vm114_vm2, %v130_v11  ;;  %v131_v14 = vpack.c.bf16 %v103_v12, %v103_v12 }
  0xeb   :  { %116 = vst.msk [vmem:[%s205_s3 + $0x4] sm:$0xf] %vm114_vm2, %v131_v14 }

// kernel: student_grafomer_forward.35
= control target key start
LH: loop header
LB: loop body
LE: loop exit
PB: predicated region body
PF: predicated region fallthrough
CT: control target
= control target key end

     0   :  { %v226_v0 = vmov 0.0   ;;  %vm227_vm0 = vmmov 0   ;;  %vm70_vm1 = vcmask 523264   ;;  %vm174_vm2 = vcmask 519168   ;;  %s301_s2 = inlined_call_operand.vmem [shape: bf16[64,64], index: 2, kind: input, shape index: {}]   ;;  %s302_s0 = inlined_call_operand.vmem [shape: bf16[16,64], index: 0, kind: input, shape index: {}]   ;;  %s303_s1 = inlined_call_operand.vmem [shape: bf16[16,64], index: 1, kind: input, shape index: {}]   ;;  %s304_s3 = inlined_call_operand.vmem [shape: f32[1,64], index: 3, kind: input, shape index: {}]   ;;  %s305_s4 = inlined_call_operand.vmem [shape: f32[1,64], index: 4, kind: input, shape index: {}]   ;;  %s306_s5 = inlined_call_operand.vmem [shape: f32[1,64], index: 5, kind: input, shape index: {}]   ;;  %s307_s6 = inlined_call_operand.vmem [shape: bf16[16,64], index: 6, kind: output, shape index: {}]  }
   0x1   :  { %203 = vmatprep.subr.bf16.mxu0 %v226_v0  ;;  %v217_v1 = vld [vmem:[%s301_s2] sm:$0xff]   ;;  %211 = vmatprep.mubr.msk.bf16.mxu0 %vm227_vm0, %v226_v0  ;;  %v218_v2 = vld [vmem:[%s301_s2 + $0x8] sm:$0xff]   ;;  %v219_v3 = vld [vmem:[%s301_s2 + $0x10] sm:$0xff]  }
   0x2   :  { %204 = vmatpush3.bf16.msra.mxu0 %v217_v1  ;;  %v220_v4 = vld [vmem:[%s301_s2 + $0x18] sm:$0xff]   ;;  %v221_v5 = vld [vmem:[%s302_s0] sm:$0xff]  }
   0x3   :  { %205 = vmatprep.subr.bf16.mxu0 %v226_v0  ;;  %v195_v6 = vld [vmem:[%s303_s1] sm:$0xff]  }
   0x4   :  { %v181_v7 = vld [vmem:[%s304_s3] ss:$0 sm:$0xff]  ;;  %v196_v8 = vunpack.c.l.bf16 %v195_v6  ;;  %v197_v12 = vunpack.c.h.bf16 %v195_v6 }
   0x5   :  { %v188_v37 = vld [vmem:[%s305_s4] ss:$0 sm:$0xff] }
   0x6   :  { %206 = vmatpush3.bf16.msra.mxu0 %v218_v2  ;;  %v189_v39 = vld [vmem:[%s306_s5] ss:$0 sm:$0xff] }
   0x7   :  { %207 = vmatprep.subr.bf16.mxu0 %v226_v0 }
   0xa   :  { %208 = vmatpush3.bf16.msra.mxu0 %v219_v3 }
   0xb   :  { %209 = vmatprep.subr.bf16.mxu0 %v226_v0 }
   0xe   :  { %210 = vmatpush3.bf16.msra.mxu0 %v220_v4 }
  0x11   :  { %212 = vmatmul.mubr.msk.bf16.vlgmr.msra.gmra.mrb[0].mxu0 %vm70_vm1, %v221_v5 }
  0xe4   :  { %v108_v9 = vpop.f32.mrb[0].mxu0 }
  0xe5   :  { %v109_v10 = vadd.f32 %v181_v7, %v108_v9  ;;  %v213_v11 = vpop.f32.mrb[1].mxu0 }
  0xe6   :  { %v111_v13 = vpop.f32.mrb[2].mxu0 }
  0xe7   :  { %v112_v14 = vadd.f32 %v181_v7, %v111_v13  ;;  %v214_v15 = vpop.f32.mrb[3].mxu0  ;;  %v119_v16 = vadd.f32 %v196_v8, %v109_v10 }
  0xe9   :  { %v121_v17 = vsel %vm70_vm1, %v119_v16, 0.0  ;;  %v120_v18 = vadd.f32 %v197_v12, %v112_v14 }
  0xea   :  { %122 = vadd.xlane.f32.xlu0 %v121_v17 }
  0xeb   :  { %v124_v19 = vsel %vm70_vm1, %v120_v18, 0.0 }
  0xee   :  { %125 = vadd.xlane.f32.xlu0 %v124_v19 }
 0x177   :  { %v123_v20 = vpop.xlane.xlu0 %122 }
 0x178   :  { %v128_v21 = vmul.f32 0.015625, %v123_v20 }
 0x17a   :  { %v130_v22 = vsub.f32 %v119_v16, %v128_v21 }
 0x17b   :  { %v126_v23 = vpop.xlane.xlu0 %125 }
 0x17c   :  { %v129_v24 = vmul.f32 0.015625, %v126_v23  ;;  %v132_v25 = vmul.f32 %v130_v22, %v130_v22 }
 0x17e   :  { %v131_v26 = vsub.f32 %v120_v18, %v129_v24  ;;  %v134_v27 = vsel %vm70_vm1, %v132_v25, 0.0 }
 0x17f   :  { %135 = vadd.xlane.f32.xlu1 %v134_v27 }
 0x180   :  { %v133_v28 = vmul.f32 %v131_v26, %v131_v26 }
 0x182   :  { %v137_v29 = vsel %vm70_vm1, %v133_v28, 0.0 }
 0x183   :  { %138 = vadd.xlane.f32.xlu1 %v137_v29 }
 0x20c   :  { %v136_v30 = vpop.xlane.xlu1 %135 }
 0x20d   :  { %v140_v31 = vmul.f32 0.015625, %v136_v30 }
 0x20f   :  { %v142_v32 = vadd.f32 1e-05, %v140_v31 }
 0x210   :  { %v139_v33 = vpop.xlane.xlu1 %138 }
 0x211   :  { %222 = vrsqrt.f32 %v142_v32  ;;  %v141_v34 = vmul.f32 0.015625, %v139_v33 }
 0x213   :  { %v143_v35 = vadd.f32 1e-05, %v141_v34 }
 0x215   :  { %224 = vrsqrt.f32 %v143_v35 }
 0x21b   :  { %v223_v36 = vpop.eup %222 }
 0x21c   :  { %v146_v38 = vmul.f32 %v223_v36, %v130_v22 }
 0x21e   :  { %v155_v40 = vmul.f32 %v188_v37, %v146_v38 }
 0x21f   :  { %v225_v41 = vpop.eup %224 }
 0x220   :  { %v164_v42 = vadd.f32 %v189_v39, %v155_v40  ;;  %v147_v43 = vmul.f32 %v225_v41, %v131_v26 }
 0x222   :  { %v192_v44 = vpack.c.bf16 %v164_v42, %v164_v42  ;;  %v156_v45 = vmul.f32 %v188_v37, %v147_v43 }
 0x224   :  { %175 = vst.msk [vmem:[%s307_s6] sm:$0xf] %vm174_vm2, %v192_v44  ;;  %v165_v46 = vadd.f32 %v189_v39, %v156_v45 }
 0x226   :  { %v193_v47 = vpack.c.bf16 %v165_v46, %v165_v46 }
 0x228   :  { %176 = vst.msk [vmem:[%s307_s6 + $0x4] sm:$0xf] %vm174_vm2, %v193_v47 }

// kernel: student_grafomer_forward.34
= control target key start
LH: loop header
LB: loop body
LE: loop exit
PB: predicated region body
PF: predicated region fallthrough
CT: control target
= control target key end

     0   :  { %s998_s9 = smov 0   ;;  %s1000_s10 = smov 0   ;;  %s1125_s0 = inlined_call_operand.vmem [shape: bf16[2,8,192], index: 0, kind: input, shape index: {}]   ;;  %s1126_s1 = inlined_call_operand.vmem [shape: f32[2,1,8], index: 1, kind: input, shape index: {}]   ;;  %s1127_s2 = inlined_call_operand.vmem [shape: bf16[2,8,64], index: 2, kind: output, shape index: {}]  }
   0x1   :  { %s1002_s11 = smov 0  }
   0x2 LB: > { %s24_s12 = sadd.s32 1, %s968_s10  ;;  %p795_p0 = scmp.ge.s32.totalorder %s972_s11, 1  ;;  %s972_s11 = sphi %s1002_s11, %s12_s11   ;;  %s968_s10 = sphi %s1000_s10, %s1129_s10   ;;  %s964_s9 = sphi %s998_s9, %s1128_s9  }
   0x3   : > { %p26_p1 = scmp.ge.s32.totalorder %s24_s12, 2  ;;  %p134_p2 = scmp.lt.s32.totalorder %s972_s11, 3 }
   0x5   : > { %s1131_s12 = smov (%p26_p1, %s24_s12), 0  ;;  %p135_p3 = pnand %p795_p0, %p134_p2 }
   0x6   : > { %p161_p4 = scmp.lt.s32.totalorder (!%p135_p3), %s964_s9, 1  ;;  %v974_v0 = vmov (!%p135_p3), 0.0   ;;  %vm975_vm0 = vmmov (!%p135_p3), 0   ;;  %s976_s17 = smov (!%p135_p3), 64   ;;  %vm205_vm1 = vcmask (!%p135_p3), 130048   ;;  %v179_v6 = vlaneseq (!%p135_p3) }
   0x7   : > { %138 = sbr.rel (%p135_p3) target bundleno = 1555 (0x613), region = 28  ;;  %843 = vmatprep.subr.bf16.mxu0 (!%p135_p3), %v974_v0  ;;  %845 = vmatprep.mubr.msk.bf16.mxu0 (!%p135_p3), %vm975_vm0, %v974_v0  ;;  %s977_s18 = smov (!%p135_p3), 48   ;;  %vm252_vm3 = vcmask (!%p135_p3), 64512   ;;  %vm269_vm4 = vcmask (!%p135_p3), 1043456   ;;  %vm314_vm5 = vcmask (!%p135_p3), 125952   ;;  %vm445_vm6 = vcmask (!%p135_p3), 257152  }
   0x8   : > { %849 = vmatprep.subr.bf16.mxu1 (!%p135_p3), %v974_v0  ;;  %851 = vmatprep.mubr.msk.bf16.mxu1 (!%p135_p3), %vm975_vm0, %v974_v0  ;;  %v180_v7 = vshrl.u32 (!%p135_p3), %v179_v6, 7  ;;  %v184_v8 = vand.u32 (!%p135_p3), 127, %v179_v6  ;;  %s978_s22 = smov (!%p135_p3), 80   ;;  %s979_s23 = smov (!%p135_p3), 112   ;;  %vm576_vm7 = vcmask (!%p135_p3), 388352   ;;  %vm707_vm8 = vcmask (!%p135_p3), 519552  }
   0x9   : > { %s980_s24 = smov (!%p135_p3), 32   ;;  %s981_s25 = smov (!%p135_p3), 96  }
   0xa   : > { %vm185_vm2 = vcmp.gt.s32.totalorder (!%p135_p3), %v184_v8, %v180_v7  ;;  %s982_s26 = smov (!%p135_p3), 16  }
   0xe   : > { %s1133_s9 = smov (!%p161_p4, %s964_s9), 1 }
   0xf   : > { %s823_s13 = sshll.u32 %s1133_s9, 3  ;;  %s168_s21 = scalar_lea.vmem %s1126_s1, %s1133_s9 }
  0x10   : > { %s1028_s16 = scalar_lea.vmem %s1125_s0, %s823_s13  ;;  %v799_v9 = vld [vmem:[%s168_s21] ss:$0 sm:$0xff]  ;;  %s798_s27 = sshll.u32 %s1133_s9, 2 }
  0x11   : > { %v924_v1 = vld [vmem:[%s1028_s16] ss:$0 sps:$4 sm:$0xff]   ;;  %v1043_v10 = vsel %vm185_vm2, -3.4028235e+38, %v799_v9  ;;  %v265_v24 = vld [vmem:[%s1028_s16 + $0x4] sm:$0xf]  ;;  %s1080_s30 = scalar_lea.vmem %s1127_s2, %s798_s27 }
  0x12   : > { %203 = vrot.lane.b32.xlu0 %v924_v1, %s976_s17  ;;  %v198_v4 = vld [vmem:[%s1028_s16] sm:$0xf]  ;;  %v271_v25 = vsel %vm269_vm4, %v265_v24, 0 }
  0x13   : > { %v925_v5 = vld [vmem:[%s1028_s16] ss:$0 sps:$4 sm:$0xff]   ;;  %850 = vmatpush3.bf16.msra.mxu1 %v271_v25 }
  0x14   : > { %326 = vrot.lane.b32.xlu1 %v925_v5, %s977_s18  ;;  %v930_v17 = vld [vmem:[%s1028_s16] ss:$0 sps:$4 sm:$0xff]   ;;  %855 = vmatprep.subr.bf16.mxu1 %v974_v0 }
  0x15   : > { %v926_v23 = vld [vmem:[%s1028_s16] ss:$0 sps:$4 sm:$0xff]  }
  0x16   : > { %v927_v26 = vld [vmem:[%s1028_s16] ss:$0 sps:$4 sm:$0xff]  }
  0x17   : > { %v928_v27 = vld [vmem:[%s1028_s16] ss:$0 sps:$4 sm:$0xff]  }
  0x18   : > { %v929_v28 = vld [vmem:[%s1028_s16] ss:$0 sps:$4 sm:$0xff]  }
  0x84   : > { %v204_v2 = vpop.permute.xlu0 %203 }
  0x85   : > { %v210_v3 = vsel %vm205_vm1, %v204_v2, 0  ;;  %v931_v2 = vld [vmem:[%s1028_s16 + $0x4] ss:$0 sps:$4 sm:$0xff]  }
  0x86   : > { %844 = vmatpush3.bf16.xpose.msra.mxu0 %v210_v3  ;;  %v327_v29 = vpop.permute.xlu1 %326  ;;  %v932_v3 = vld [vmem:[%s1028_s16 + $0x4] ss:$0 sps:$4 sm:$0xff]  }
  0x87   : > { %861 = vmatprep.subr.bf16.mxu0 %v974_v0  ;;  %v332_v36 = vsel %vm205_vm1, %v327_v29, 0 }
  0x8d   : > { %846 = vmatmul.mubr.msk.bf16.vlgmr.msra.gmra.mrb[0].mxu0 %vm205_vm1, %v198_v4 }
  0x8e   : > { %863 = vmatprep.mubr.msk.bf16.mxu0 %vm975_vm0, %v974_v0 }
 0x160   : > { %v246_v11 = vpop.f32.mrb[0].mxu0 }
 0x161   : > { %v247_v12 = vadd.f32 %v246_v11, %v1043_v10  ;;  %v847_v13 = vpop.f32.mrb[1].mxu0 }
 0x162   : > { %v249_v14 = vpop.f32.mrb[2].mxu0 }
 0x163   : > { %v848_v15 = vpop.f32.mrb[3].mxu0  ;;  %v253_v16 = vsel %vm252_vm3, %v247_v12, -inf }
 0x164   : > { %254 = vmax.xlane.f32.xlu0 %v253_v16 }
 0x17a   : > { %583 = vrot.lane.b32.xlu0 %v930_v17, %s978_s22 }
 0x1f1   : > { %v255_v18 = vpop.xlane.xlu0 %254 }
 0x1f2   : > { %v256_v19 = vsub.f32 %v247_v12, %v255_v18 }
 0x1f4   : > { %v257_v20 = vmul.f32 1.442695, %v256_v19 }
 0x1f5   : > { %v584_v41 = vpop.permute.xlu0 %583 }
 0x1f6   : > { %934 = vpow2.f32 %v257_v20 }
 0x200   : > { %v935_v21 = vpop.eup %934 }
 0x201   : > { %v259_v22 = vsel %vm252_vm3, %v935_v21, 0.0 }
 0x202   : > { %260 = vadd.xlane.f32.xlu1 %v259_v22 }
 0x213   : > { %321 = vrot.lane.b32.xlu1 %v926_v23, %s979_s23 }
 0x217   : > { %457 = vrot.lane.b32.xlu1 %v927_v26, %s980_s24 }
 0x21b   : > { %452 = vrot.lane.b32.xlu1 %v928_v27, %s981_s25 }
 0x21f   : > { %588 = vrot.lane.b32.xlu1 %v929_v28, %s982_s26 }
 0x28f   : > { %v261_v30 = vpop.xlane.xlu1 %260 }
 0x290   : > { %936 = vrcp.f32 %v261_v30 }
 0x293   : > { %v322_v31 = vpop.permute.xlu1 %321 }
 0x297   : > { %v458_v35 = vpop.permute.xlu1 %457 }
 0x298   : > { %v463_v38 = vsel %vm205_vm1, %v458_v35, 0 }
 0x29a   : > { %v937_v32 = vpop.eup %936 }
 0x29b   : > { %v263_v33 = vmul.f32 %v937_v32, %v935_v21  ;;  %v453_v37 = vpop.permute.xlu1 %452  ;;  %v933_v21 = vld [vmem:[%s1028_s16 + $0x4] ss:$0 sps:$4 sm:$0xff]  }
 0x29d   : > { %v264_v34 = vpack.c.bf16 %v263_v33, %v263_v33 }
 0x29f   : > { %852 = vmatmul.mubr.msk.bf16.vlgmr.msra.gmra.mrb[0].mxu1 %vm252_vm3, %v264_v34  ;;  %v589_v39 = vpop.permute.xlu1 %588 }
 0x2a0   : > { %856 = vmatpush3.bf16.xpose.msra.mxu1 %v332_v36  ;;  %857 = vmatprep.mubr.msk.bf16.mxu1 %vm975_vm0, %v974_v0  ;;  %v594_v40 = vsel %vm205_vm1, %v589_v39, 0 }
 0x2a1   : > { %867 = vmatprep.subr.bf16.mxu1 %v974_v0 }
 0x2a7   : > { %858 = vmatmul.mubr.msk.bf16.vlgmr.msra.gmra.mrb[4].mxu1 %vm205_vm1, %v322_v31 }
 0x2a8   : > { %868 = vmatpush3.bf16.xpose.msra.mxu1 %v463_v38  ;;  %869 = vmatprep.mubr.msk.bf16.mxu1 %vm975_vm0, %v974_v0 }
 0x2a9   : > { %879 = vmatprep.subr.bf16.mxu1 %v974_v0 }
 0x2af   : > { %870 = vmatmul.mubr.msk.bf16.vlgmr.msra.gmra.mrb[8].mxu1 %vm205_vm1, %v453_v37 }
 0x2b0   : > { %880 = vmatpush3.bf16.xpose.msra.mxu1 %v594_v40  ;;  %881 = vmatprep.mubr.msk.bf16.mxu1 %vm975_vm0, %v974_v0 }
 0x2b7   : > { %882 = vmatmul.mubr.msk.bf16.vlgmr.msra.gmra.mrb[12].mxu1 %vm205_vm1, %v584_v41 }
 0x372   : > { %v307_v42 = vpop.f32.mrb[0].mxu1 }
 0x373   : > { %v313_v43 = vpack.c.bf16 %v307_v42, %v307_v42  ;;  %v853_v44 = vpop.f32.mrb[1].mxu1 }
 0x374   : > { %v310_v45 = vpop.f32.mrb[2].mxu1 }
 0x375   : > { %315 = vst.msk [vmem:[%s1080_s30] sm:$0xf] %vm314_vm5, %v313_v43  ;;  %v854_v46 = vpop.f32.mrb[3].mxu1 }
 0x37a   : > { %v368_v47 = vpop.f32.mrb[4].mxu1 }
 0x37b   : > { %v369_v48 = vadd.f32 %v368_v47, %v1043_v10  ;;  %v859_v49 = vpop.f32.mrb[5].mxu1 }
 0x37c   : > { %v371_v50 = vpop.f32.mrb[6].mxu1 }
 0x37d   : > { %v860_v51 = vpop.f32.mrb[7].mxu1  ;;  %v374_v52 = vsel %vm252_vm3, %v369_v48, -inf }
 0x37e   : > { %375 = vmax.xlane.f32.xlu1 %v374_v52 }
 0x382   : > { %v499_v53 = vpop.f32.mrb[8].mxu1 }
 0x383   : > { %v500_v54 = vadd.f32 %v499_v53, %v1043_v10  ;;  %v871_v55 = vpop.f32.mrb[9].mxu1 }
 0x384   : > { %v502_v56 = vpop.f32.mrb[10].mxu1 }
 0x385   : > { %v872_v57 = vpop.f32.mrb[11].mxu1  ;;  %v505_v58 = vsel %vm252_vm3, %v500_v54, -inf }
 0x386   : > { %506 = vmax.xlane.f32.xlu0 %v505_v58 }
 0x38a   : > { %v630_v59 = vpop.f32.mrb[12].mxu1 }
 0x38b   : > { %v631_v60 = vadd.f32 %v630_v59, %v1043_v10  ;;  %v883_v61 = vpop.f32.mrb[13].mxu1 }
 0x38c   : > { %v633_v62 = vpop.f32.mrb[14].mxu1 }
 0x38d   : > { %v884_v63 = vpop.f32.mrb[15].mxu1  ;;  %v636_v1 = vsel %vm252_vm3, %v631_v60, -inf }
 0x38e   : > { %637 = vmax.xlane.f32.xlu1 %v636_v1 }
 0x39c   : > { %390 = vrot.lane.b32.xlu0 %v932_v3, %s979_s23 }
 0x39f   : > { %521 = vrot.lane.b32.xlu1 %v931_v2, %s981_s25 }
 0x40b   : > { %v376_v4 = vpop.xlane.xlu1 %375 }
 0x40c   : > { %v377_v5 = vsub.f32 %v369_v48, %v376_v4 }
 0x40e   : > { %v378_v6 = vmul.f32 1.442695, %v377_v5 }
 0x410   : > { %938 = vpow2.f32 %v378_v6 }
 0x413   : > { %v507_v7 = vpop.xlane.xlu0 %506 }
 0x414   : > { %v508_v8 = vsub.f32 %v500_v54, %v507_v7 }
 0x416   : > { %v509_v9 = vmul.f32 1.442695, %v508_v8 }
 0x417   : > { %v391_v19 = vpop.permute.xlu0 %390 }
 0x418   : > { %940 = vpow2.f32 %v509_v9  ;;  %v396_v20 = vsel %vm269_vm4, %v391_v19, 0 }
 0x419   : > { %862 = vmatpush3.bf16.msra.mxu0 %v396_v20 }
 0x41a   : > { %v939_v10 = vpop.eup %938  ;;  %873 = vmatprep.subr.bf16.mxu0 %v974_v0 }
 0x41b   : > { %v638_v11 = vpop.xlane.xlu1 %637  ;;  %v380_v12 = vsel %vm252_vm3, %v939_v10, 0.0 }
 0x41c   : > { %v639_v13 = vsub.f32 %v631_v60, %v638_v11  ;;  %381 = vadd.xlane.f32.xlu1 %v380_v12 }
 0x41e   : > { %v640_v14 = vmul.f32 1.442695, %v639_v13 }
 0x41f   : > { %v522_v22 = vpop.permute.xlu1 %521 }
 0x420   : > { %942 = vpow2.f32 %v640_v14  ;;  %v527_v28 = vsel %vm269_vm4, %v522_v22, 0 }
 0x422   : > { %v941_v15 = vpop.eup %940 }
 0x423   : > { %v511_v16 = vsel %vm252_vm3, %v941_v15, 0.0 }
 0x424   : > { %512 = vadd.xlane.f32.xlu1 %v511_v16 }
 0x42a   : > { %v943_v17 = vpop.eup %942 }
 0x42b   : > { %v642_v18 = vsel %vm252_vm3, %v943_v17, 0.0 }
 0x42c   : > { %643 = vadd.xlane.f32.xlu1 %v642_v18 }
 0x43d   : > { %652 = vrot.lane.b32.xlu1 %v933_v21, %s978_s22 }
 0x4a9   : > { %v382_v23 = vpop.xlane.xlu1 %381 }
 0x4aa   : > { %944 = vrcp.f32 %v382_v23 }
 0x4b1   : > { %v513_v24 = vpop.xlane.xlu1 %512 }
 0x4b2   : > { %946 = vrcp.f32 %v513_v24 }
 0x4b4   : > { %v945_v25 = vpop.eup %944 }
 0x4b5   : > { %v384_v26 = vmul.f32 %v945_v25, %v939_v10 }
 0x4b7   : > { %v385_v27 = vpack.c.bf16 %v384_v26, %v384_v26 }
 0x4b9   : > { %v644_v29 = vpop.xlane.xlu1 %643  ;;  %864 = vmatmul.mubr.msk.bf16.vlgmr.msra.gmra.mrb[4].mxu0 %vm252_vm3, %v385_v27 }
 0x4ba   : > { %948 = vrcp.f32 %v644_v29  ;;  %874 = vmatpush3.bf16.msra.mxu0 %v527_v28  ;;  %875 = vmatprep.mubr.msk.bf16.mxu0 %vm975_vm0, %v974_v0 }
 0x4bb   : > { %885 = vmatprep.subr.bf16.mxu0 %v974_v0 }
 0x4bc   : > { %v947_v30 = vpop.eup %946 }
 0x4bd   : > { %v515_v31 = vmul.f32 %v947_v30, %v941_v15  ;;  %v653_v32 = vpop.permute.xlu1 %652 }
 0x4be   : > { %v658_v33 = vsel %vm269_vm4, %v653_v32, 0 }
 0x4bf   : > { %v516_v34 = vpack.c.bf16 %v515_v31, %v515_v31 }
 0x4c1   : > { %876 = vmatmul.mubr.msk.bf16.vlgmr.msra.gmra.mrb[8].mxu0 %vm252_vm3, %v516_v34 }
 0x4c2   : > { %886 = vmatpush3.bf16.msra.mxu0 %v658_v33  ;;  %887 = vmatprep.mubr.msk.bf16.mxu0 %vm975_vm0, %v974_v0 }
 0x4c4   : > { %v949_v35 = vpop.eup %948 }
 0x4c5   : > { %v646_v36 = vmul.f32 %v949_v35, %v943_v17 }
 0x4c7   : > { %v647_v37 = vpack.c.bf16 %v646_v36, %v646_v36 }
 0x4c9   : > { %888 = vmatmul.mubr.msk.bf16.vlgmr.msra.gmra.mrb[12].mxu0 %vm252_vm3, %v647_v37 }
 0x58c   : > { %v432_v38 = vpop.f32.mrb[4].mxu0 }
 0x58d   : > { %v824_v39 = vpack.c.bf16 %v432_v38, %v432_v38  ;;  %v865_v40 = vpop.f32.mrb[5].mxu0 }
 0x58e   : > { %v435_v41 = vpop.f32.mrb[6].mxu0 }
 0x58f   : > { %442 = vrot.lane.b32.xlu0 %v824_v39, %s982_s26  ;;  %v866_v42 = vpop.f32.mrb[7].mxu0 }
 0x594   : > { %v563_v43 = vpop.f32.mrb[8].mxu0 }
 0x595   : > { %v825_v44 = vpack.c.bf16 %v563_v43, %v563_v43  ;;  %v877_v45 = vpop.f32.mrb[9].mxu0 }
 0x596   : > { %v566_v46 = vpop.f32.mrb[10].mxu0 }
 0x597   : > { %573 = vrot.lane.b32.xlu1 %v825_v44, %s980_s24  ;;  %v878_v0 = vpop.f32.mrb[11].mxu0 }
 0x59c   : > { %v694_v47 = vpop.f32.mrb[12].mxu0 }
 0x59d   : > { %v826_v48 = vpack.c.bf16 %v694_v47, %v694_v47  ;;  %v889_v49 = vpop.f32.mrb[13].mxu0 }
 0x59e   : > { %v697_v50 = vpop.f32.mrb[14].mxu0 }
 0x59f   : > { %704 = vrot.lane.b32.xlu0 %v826_v48, %s977_s18  ;;  %v890_v51 = vpop.f32.mrb[15].mxu0 }
 0x601   : > { %v443_v52 = vpop.permute.xlu0 %442 }
 0x602   : > { %446 = vst.msk [vmem:[%s1080_s30] sm:$0xf] %vm445_vm6, %v443_v52 }
 0x609   : > { %v574_v53 = vpop.permute.xlu1 %573 }
 0x60a   : > { %577 = vst.msk [vmem:[%s1080_s30] sm:$0xf] %vm576_vm7, %v574_v53 }
 0x611   : > { %v705_v54 = vpop.permute.xlu0 %704 }
 0x612   : > { %708 = vst.msk [vmem:[%s1080_s30] sm:$0xf] %vm707_vm8, %v705_v54 }
 0x613 PF: > { %s12_s11 = sadd.s32 1, %s972_s11   ;;  %s1128_s9 = smov %s968_s10 }
 0x614   : > { %p9_p5 = scmp.ge.s32.totalorder %s12_s11, 4   ;;  %s1129_s10 = smov %s1131_s12 }
 0x616   :  { %11 = sbr.rel (!%p9_p5) target bundleno = 2 (0x2), region = 62 }

// kernel: student_grafomer_forward.38
= control target key start
LH: loop header
LB: loop body
LE: loop exit
PB: predicated region body
PF: predicated region fallthrough
CT: control target
= control target key end

     0   :  { %s1041_s12 = smov 0   ;;  %s1043_s13 = smov 0   ;;  %s1175_s0 = inlined_call_operand.vmem [shape: bf16[2,8,64], index: 0, kind: input, shape index: {}]   ;;  %s1176_s1 = inlined_call_operand.vmem [shape: bf16[2,16,128], index: 1, kind: input, shape index: {}]   ;;  %s1177_s2 = inlined_call_operand.vmem [shape: f32[2,1,16], index: 2, kind: input, shape index: {}]   ;;  %s1178_s3 = inlined_call_operand.vmem [shape: bf16[2,8,64], index: 3, kind: output, shape index: {}]  }
   0x1   :  { %s1045_s14 = smov 0  }
   0x2 LB: > { %s25_s15 = sadd.s32 1, %s1006_s13  ;;  %p838_p0 = scmp.ge.s32.totalorder %s1010_s14, 1  ;;  %s1010_s14 = sphi %s1045_s14, %s13_s14   ;;  %s1006_s13 = sphi %s1043_s13, %s1180_s13   ;;  %s1002_s12 = sphi %s1041_s12, %s1179_s12  }
   0x3   : > { %p27_p1 = scmp.ge.s32.totalorder %s25_s15, 2  ;;  %p173_p2 = scmp.lt.s32.totalorder %s1010_s14, 3 }
   0x5   : > { %s1182_s15 = smov (%p27_p1, %s25_s15), 0  ;;  %p174_p3 = pnand %p838_p0, %p173_p2 }
   0x6   : > { %p209_p4 = scmp.lt.s32.totalorder (!%p174_p3), %s1002_s12, 1  ;;  %v1012_v0 = vmov (!%p174_p3), 0.0   ;;  %vm1013_vm0 = vmmov (!%p174_p3), 0   ;;  %vm247_vm1 = vcmask (!%p174_p3), 130048   ;;  %s1014_s27 = smov (!%p174_p3), 64   ;;  %vm353_vm2 = vcmask (!%p174_p3), 125952  }
   0x7   : > { %177 = sbr.rel (%p174_p3) target bundleno = 1440 (0x5a0), region = 32  ;;  %884 = vmatprep.subr.bf16.mxu0 (!%p174_p3), %v1012_v0  ;;  %886 = vmatprep.mubr.msk.bf16.mxu0 (!%p174_p3), %vm1013_vm0, %v1012_v0  ;;  %s1015_s28 = smov (!%p174_p3), 112   ;;  %vm481_vm3 = vcmask (!%p174_p3), 257152   ;;  %vm609_vm4 = vcmask (!%p174_p3), 388352   ;;  %vm737_vm5 = vcmask (!%p174_p3), 519552  }
   0x8   : > { %890 = vmatprep.subr.bf16.mxu1 (!%p174_p3), %v1012_v0  ;;  %892 = vmatprep.mubr.msk.bf16.mxu1 (!%p174_p3), %vm1013_vm0, %v1012_v0  ;;  %s1016_s29 = smov (!%p174_p3), 96   ;;  %s1017_s30 = smov (!%p174_p3), 80  }
   0x9   : > { %s1018_s7 = smov (!%p174_p3), 48   ;;  %s1019_s8 = smov (!%p174_p3), 16  }
   0xa   : > { %s1020_s9 = smov (!%p174_p3), 32  }
   0xe   : > { %s1184_s12 = smov (!%p209_p4, %s1002_s12), 1 }
   0xf   : > { %s864_s16 = sshll.u32 %s1184_s12, 3  ;;  %s839_s20 = sshll.u32 %s1184_s12, 2 }
  0x10   : > { %s1071_s19 = scalar_lea.vmem %s1176_s1, %s864_s16  ;;  %s1081_s23 = scalar_lea.vmem %s1175_s0, %s839_s20 }
  0x11   : > { %v965_v1 = vld [vmem:[%s1071_s19] sm:$0xff]   ;;  %s223_s26 = scalar_lea.vmem %s1177_s2, %s1184_s12  ;;  %s1133_s6 = scalar_lea.vmem %s1178_s3, %s839_s20 }
  0x12   : > { %v252_v2 = vsel %vm247_vm1, %v965_v1, 0  ;;  %v233_v3 = vld [vmem:[%s1081_s23] sm:$0xf]  ;;  %306 = vrot.lane.b32.xlu1 %v965_v1, %s1014_s27 }
  0x13   : > { %885 = vmatpush3.bf16.xpose.msra.mxu0 %v252_v2  ;;  %v1092_v4 = vld [vmem:[%s223_s26] ss:$0 sm:$0xff] }
  0x14   : > { %902 = vmatprep.subr.bf16.mxu0 %v1012_v0  ;;  %v1097_v11 = vld [vmem:[%s1071_s19] sm:$0xff]  }
  0x15   : > { %v1101_v12 = vld [vmem:[%s1071_s19] sm:$0xff]  }
  0x16   : > { %368 = vrot.lane.b32.xlu1 %v1097_v11, %s1015_s28  ;;  %v969_v13 = vld [vmem:[%s1081_s23] ss:$0 sps:$4 sm:$0xff]  }
  0x17   : > { %v1106_v14 = vld [vmem:[%s1071_s19] sm:$0xff]  }
  0x18   : > { %v971_v15 = vld [vmem:[%s1081_s23] ss:$0 sps:$4 sm:$0xff]  }
  0x19   : > { %v968_v22 = vld [vmem:[%s1081_s23] ss:$0 sps:$4 sm:$0xff]  }
  0x1a   : > { %887 = vmatmul.mubr.msk.bf16.vlgmr.msra.gmra.mrb[0].mxu0 %vm247_vm1, %v233_v3  ;;  %496 = vrot.lane.b32.xlu1 %v1101_v12, %s1016_s29 }
  0x1b   : > { %904 = vmatprep.mubr.msk.bf16.mxu0 %vm1013_vm0, %v1012_v0 }
  0x1e   : > { %489 = vrot.lane.b32.xlu1 %v969_v13, %s1016_s29 }
  0x22   : > { %624 = vrot.lane.b32.xlu1 %v1106_v14, %s1017_s30 }
  0x26   : > { %617 = vrot.lane.b32.xlu1 %v971_v15, %s1017_s30 }
  0x84   : > { %v307_v21 = vpop.permute.xlu1 %306 }
  0x85   : > { %891 = vmatpush3.bf16.msra.mxu1 %v307_v21 }
  0x86   : > { %896 = vmatprep.subr.bf16.mxu1 %v1012_v0 }
  0x88   : > { %v369_v25 = vpop.permute.xlu1 %368 }
  0x89   : > { %v374_v27 = vsel %vm247_vm1, %v369_v25, 0 }
  0x8c   : > { %v497_v29 = vpop.permute.xlu1 %496 }
  0x8d   : > { %v502_v32 = vsel %vm247_vm1, %v497_v29, 0 }
  0x90   : > { %v490_v31 = vpop.permute.xlu1 %489 }
  0x94   : > { %v625_v33 = vpop.permute.xlu1 %624 }
  0x95   : > { %v630_v34 = vsel %vm247_vm1, %v625_v33, 0 }
  0x98   : > { %v618_v35 = vpop.permute.xlu1 %617 }
  0xed   : > { %v288_v5 = vpop.f32.mrb[0].mxu0 }
  0xee   : > { %v289_v6 = vadd.f32 %v1092_v4, %v288_v5  ;;  %v888_v7 = vpop.f32.mrb[1].mxu0 }
  0xef   : > { %v291_v8 = vpop.f32.mrb[2].mxu0 }
  0xf0   : > { %v889_v9 = vpop.f32.mrb[3].mxu0  ;;  %v294_v10 = vsel %vm247_vm1, %v289_v6, -inf }
  0xf1   : > { %295 = vmax.xlane.f32.xlu0 %v294_v10 }
 0x17e   : > { %v296_v16 = vpop.xlane.xlu0 %295 }
 0x17f   : > { %v297_v17 = vsub.f32 %v289_v6, %v296_v16 }
 0x181   : > { %v298_v18 = vmul.f32 1.442695, %v297_v17 }
 0x183   : > { %972 = vpow2.f32 %v298_v18 }
 0x18d   : > { %v973_v19 = vpop.eup %972 }
 0x18e   : > { %v300_v20 = vsel %vm247_vm1, %v973_v19, 0.0 }
 0x18f   : > { %301 = vadd.xlane.f32.xlu0 %v300_v20 }
 0x1a5   : > { %361 = vrot.lane.b32.xlu0 %v968_v22, %s1015_s28 }
 0x21c   : > { %v302_v23 = vpop.xlane.xlu0 %301 }
 0x21d   : > { %974 = vrcp.f32 %v302_v23 }
 0x220   : > { %v362_v30 = vpop.permute.xlu0 %361 }
 0x227   : > { %v975_v24 = vpop.eup %974 }
 0x228   : > { %v304_v26 = vmul.f32 %v975_v24, %v973_v19 }
 0x22a   : > { %v305_v28 = vpack.c.bf16 %v304_v26, %v304_v26 }
 0x22c   : > { %893 = vmatmul.mubr.msk.bf16.vlgmr.msra.gmra.mrb[0].mxu1 %vm247_vm1, %v305_v28 }
 0x22d   : > { %897 = vmatpush3.bf16.xpose.msra.mxu1 %v374_v27  ;;  %898 = vmatprep.mubr.msk.bf16.mxu1 %vm1013_vm0, %v1012_v0 }
 0x22e   : > { %908 = vmatprep.subr.bf16.mxu1 %v1012_v0 }
 0x234   : > { %899 = vmatmul.mubr.msk.bf16.vlgmr.msra.gmra.mrb[4].mxu1 %vm247_vm1, %v362_v30 }
 0x235   : > { %909 = vmatpush3.bf16.xpose.msra.mxu1 %v502_v32  ;;  %910 = vmatprep.mubr.msk.bf16.mxu1 %vm1013_vm0, %v1012_v0 }
 0x236   : > { %920 = vmatprep.subr.bf16.mxu1 %v1012_v0 }
 0x23c   : > { %911 = vmatmul.mubr.msk.bf16.vlgmr.msra.gmra.mrb[8].mxu1 %vm247_vm1, %v490_v31 }
 0x23d   : > { %921 = vmatpush3.bf16.xpose.msra.mxu1 %v630_v34  ;;  %922 = vmatprep.mubr.msk.bf16.mxu1 %vm1013_vm0, %v1012_v0 }
 0x244   : > { %923 = vmatmul.mubr.msk.bf16.vlgmr.msra.gmra.mrb[12].mxu1 %vm247_vm1, %v618_v35 }
 0x2ff   : > { %v346_v36 = vpop.f32.mrb[0].mxu1 }
 0x300   : > { %v352_v37 = vpack.c.bf16 %v346_v36, %v346_v36  ;;  %v894_v38 = vpop.f32.mrb[1].mxu1 }
 0x301   : > { %v349_v39 = vpop.f32.mrb[2].mxu1 }
 0x302   : > { %354 = vst.msk [vmem:[%s1133_s6] sm:$0xf] %vm353_vm2, %v352_v37  ;;  %v895_v40 = vpop.f32.mrb[3].mxu1 }
 0x307   : > { %v410_v41 = vpop.f32.mrb[4].mxu1 }
 0x308   : > { %v411_v42 = vadd.f32 %v1092_v4, %v410_v41  ;;  %v900_v43 = vpop.f32.mrb[5].mxu1 }
 0x309   : > { %v413_v44 = vpop.f32.mrb[6].mxu1 }
 0x30a   : > { %v901_v45 = vpop.f32.mrb[7].mxu1  ;;  %v416_v46 = vsel %vm247_vm1, %v411_v42, -inf }
 0x30b   : > { %417 = vmax.xlane.f32.xlu1 %v416_v46 }
 0x30f   : > { %v538_v47 = vpop.f32.mrb[8].mxu1 }
 0x310   : > { %v539_v48 = vadd.f32 %v1092_v4, %v538_v47  ;;  %v912_v49 = vpop.f32.mrb[9].mxu1 }
 0x311   : > { %v541_v50 = vpop.f32.mrb[10].mxu1 }
 0x312   : > { %v913_v51 = vpop.f32.mrb[11].mxu1  ;;  %v544_v52 = vsel %vm247_vm1, %v539_v48, -inf }
 0x313   : > { %545 = vmax.xlane.f32.xlu0 %v544_v52 }
 0x317   : > { %v666_v53 = vpop.f32.mrb[12].mxu1 }
 0x318   : > { %v667_v54 = vadd.f32 %v1092_v4, %v666_v53  ;;  %v924_v55 = vpop.f32.mrb[13].mxu1 }
 0x319   : > { %v669_v56 = vpop.f32.mrb[14].mxu1 }
 0x31a   : > { %v925_v57 = vpop.f32.mrb[15].mxu1  ;;  %v672_v58 = vsel %vm247_vm1, %v667_v54, -inf }
 0x31b   : > { %673 = vmax.xlane.f32.xlu1 %v672_v58 }
 0x32c   : > { %428 = vrot.lane.b32.xlu1 %v1097_v11, %s1018_s7 }
 0x398   : > { %v418_v59 = vpop.xlane.xlu1 %417 }
 0x399   : > { %v419_v60 = vsub.f32 %v411_v42, %v418_v59 }
 0x39b   : > { %v420_v61 = vmul.f32 1.442695, %v419_v60 }
 0x39d   : > { %976 = vpow2.f32 %v420_v61 }
 0x3a0   : > { %v546_v62 = vpop.xlane.xlu0 %545 }
 0x3a1   : > { %v547_v63 = vsub.f32 %v539_v48, %v546_v62 }
 0x3a3   : > { %v548_v1 = vmul.f32 1.442695, %v547_v63 }
 0x3a5   : > { %978 = vpow2.f32 %v548_v1 }
 0x3a7   : > { %v977_v2 = vpop.eup %976 }
 0x3a8   : > { %v674_v3 = vpop.xlane.xlu1 %673  ;;  %v422_v4 = vsel %vm247_vm1, %v977_v2, 0.0 }
 0x3a9   : > { %v675_v5 = vsub.f32 %v667_v54, %v674_v3  ;;  %423 = vadd.xlane.f32.xlu0 %v422_v4 }
 0x3ab   : > { %v676_v6 = vmul.f32 1.442695, %v675_v5 }
 0x3ac   : > { %v429_v7 = vpop.permute.xlu1 %428 }
 0x3ad   : > { %980 = vpow2.f32 %v676_v6  ;;  %903 = vmatpush3.bf16.msra.mxu0 %v429_v7 }
 0x3ae   : > { %914 = vmatprep.subr.bf16.mxu0 %v1012_v0 }
 0x3af   : > { %v979_v8 = vpop.eup %978 }
 0x3b0   : > { %v550_v9 = vsel %vm247_vm1, %v979_v8, 0.0 }
 0x3b1   : > { %551 = vadd.xlane.f32.xlu1 %v550_v9 }
 0x3b7   : > { %v981_v10 = vpop.eup %980 }
 0x3b8   : > { %v678_v11 = vsel %vm247_vm1, %v981_v10, 0.0 }
 0x3b9   : > { %679 = vadd.xlane.f32.xlu0 %v678_v11 }
 0x3c2   : > { %684 = vrot.lane.b32.xlu1 %v1106_v14, %s1019_s8 }
 0x3cf   : > { %556 = vrot.lane.b32.xlu0 %v1101_v12, %s1020_s9 }
 0x436   : > { %v424_v13 = vpop.xlane.xlu0 %423 }
 0x437   : > { %982 = vrcp.f32 %v424_v13 }
 0x43e   : > { %v552_v15 = vpop.xlane.xlu1 %551 }
 0x43f   : > { %984 = vrcp.f32 %v552_v15 }
 0x441   : > { %v983_v16 = vpop.eup %982 }
 0x442   : > { %v426_v17 = vmul.f32 %v983_v16, %v977_v2  ;;  %v685_v12 = vpop.permute.xlu1 %684 }
 0x444   : > { %v427_v18 = vpack.c.bf16 %v426_v17, %v426_v17 }
 0x446   : > { %v680_v19 = vpop.xlane.xlu0 %679  ;;  %905 = vmatmul.mubr.msk.bf16.vlgmr.msra.gmra.mrb[4].mxu0 %vm247_vm1, %v427_v18 }
 0x447   : > { %986 = vrcp.f32 %v680_v19  ;;  %916 = vmatprep.mubr.msk.bf16.mxu0 %vm1013_vm0, %v1012_v0 }
 0x449   : > { %v985_v20 = vpop.eup %984 }
 0x44a   : > { %v554_v14 = vmul.f32 %v985_v20, %v979_v8  ;;  %v557_v21 = vpop.permute.xlu0 %556 }
 0x44b   : > { %915 = vmatpush3.bf16.msra.mxu0 %v557_v21 }
 0x44c   : > { %v555_v22 = vpack.c.bf16 %v554_v14, %v554_v14  ;;  %926 = vmatprep.subr.bf16.mxu0 %v1012_v0 }
 0x44e   : > { %917 = vmatmul.mubr.msk.bf16.vlgmr.msra.gmra.mrb[8].mxu0 %vm247_vm1, %v555_v22 }
 0x44f   : > { %927 = vmatpush3.bf16.msra.mxu0 %v685_v12  ;;  %928 = vmatprep.mubr.msk.bf16.mxu0 %vm1013_vm0, %v1012_v0 }
 0x451   : > { %v987_v23 = vpop.eup %986 }
 0x452   : > { %v682_v24 = vmul.f32 %v987_v23, %v981_v10 }
 0x454   : > { %v683_v25 = vpack.c.bf16 %v682_v24, %v682_v24 }
 0x456   : > { %929 = vmatmul.mubr.msk.bf16.vlgmr.msra.gmra.mrb[12].mxu0 %vm247_vm1, %v683_v25 }
 0x519   : > { %v468_v26 = vpop.f32.mrb[4].mxu0 }
 0x51a   : > { %v865_v27 = vpack.c.bf16 %v468_v26, %v468_v26  ;;  %v906_v28 = vpop.f32.mrb[5].mxu0 }
 0x51b   : > { %v471_v29 = vpop.f32.mrb[6].mxu0 }
 0x51c   : > { %478 = vrot.lane.b32.xlu1 %v865_v27, %s1019_s8  ;;  %v907_v30 = vpop.f32.mrb[7].mxu0 }
 0x521   : > { %v596_v31 = vpop.f32.mrb[8].mxu0 }
 0x522   : > { %v866_v32 = vpack.c.bf16 %v596_v31, %v596_v31  ;;  %v918_v33 = vpop.f32.mrb[9].mxu0 }
 0x523   : > { %v599_v34 = vpop.f32.mrb[10].mxu0 }
 0x524   : > { %606 = vrot.lane.b32.xlu0 %v866_v32, %s1020_s9  ;;  %v919_v0 = vpop.f32.mrb[11].mxu0 }
 0x529   : > { %v724_v35 = vpop.f32.mrb[12].mxu0 }
 0x52a   : > { %v867_v36 = vpack.c.bf16 %v724_v35, %v724_v35  ;;  %v930_v37 = vpop.f32.mrb[13].mxu0 }
 0x52b   : > { %v727_v38 = vpop.f32.mrb[14].mxu0 }
 0x52c   : > { %734 = vrot.lane.b32.xlu1 %v867_v36, %s1018_s7  ;;  %v931_v39 = vpop.f32.mrb[15].mxu0 }
 0x58e   : > { %v479_v40 = vpop.permute.xlu1 %478 }
 0x58f   : > { %482 = vst.msk [vmem:[%s1133_s6] sm:$0xf] %vm481_vm3, %v479_v40 }
 0x596   : > { %v607_v41 = vpop.permute.xlu0 %606 }
 0x597   : > { %610 = vst.msk [vmem:[%s1133_s6] sm:$0xf] %vm609_vm4, %v607_v41 }
 0x59e   : > { %v735_v42 = vpop.permute.xlu1 %734 }
 0x59f   : > { %738 = vst.msk [vmem:[%s1133_s6] sm:$0xf] %vm737_vm5, %v735_v42 }
 0x5a0 PF: > { %s13_s14 = sadd.s32 1, %s1010_s14   ;;  %s1179_s12 = smov %s1006_s13 }
 0x5a1   : > { %p10_p5 = scmp.ge.s32.totalorder %s13_s14, 4   ;;  %s1180_s13 = smov %s1182_s15 }
 0x5a3   :  { %12 = sbr.rel (!%p10_p5) target bundleno = 2 (0x2), region = 68 }

// kernel: student_grafomer_forward.49
= control target key start
LH: loop header
LB: loop body
LE: loop exit
PB: predicated region body
PF: predicated region fallthrough
CT: control target
= control target key end

     0   :  { %v178_v1 = vmov 0.0   ;;  %vm179_vm0 = vmmov 0   ;;  %s239_s0 = inlined_call_operand.vmem [shape: bf16[16,64], index: 0, kind: input, shape index: {}]   ;;  %s240_s1 = inlined_call_operand.vmem [shape: bf16[16,64], index: 1, kind: input, shape index: {}]   ;;  %s241_s2 = inlined_call_operand.vmem [shape: bf16[64,128], index: 2, kind: input, shape index: {}]   ;;  %s242_s3 = inlined_call_operand.hbm [shape: f32[16,128], index: 3, kind: output, shape index: {}]  }
   0x1   :  { %v150_v0 = vld [vmem:[%s241_s2] sm:$0xff]   ;;  %133 = vmatprep.subr.bf16.mxu0 %v178_v1  ;;  %v151_v2 = vld [vmem:[%s241_s2 + $0x8] sm:$0xff]   ;;  %141 = vmatprep.mubr.msk.bf16.mxu0 %vm179_vm0, %v178_v1  ;;  %v152_v3 = vld [vmem:[%s241_s2 + $0x10] sm:$0xff]  }
   0x2   :  { %134 = vmatpush3.bf16.msra.mxu0 %v150_v0  ;;  %v16_v4 = vld [vmem:[%s239_s0] sm:$0xf] }
   0x3   :  { %135 = vmatprep.subr.bf16.mxu0 %v178_v1 }
   0x4   :  { %8 = vsyncpa [#allocation3], 0  ;;  %v17_v5 = vld [vmem:[%s239_s0 + $0x4] sm:$0xf]  ;;  %v18_v6 = vld [vmem:[%s240_s1] sm:$0xf] }
   0x5   :  { %v19_v7 = vld [vmem:[%s240_s1 + $0x4] sm:$0xf]  ;;  %v20_v8 = vadd.bf16 %v18_v6, %v16_v4  ;;  %v153_v10 = vld [vmem:[%s241_s2 + $0x18] sm:$0xff]   ;;  %vm59_vm1 = vcmask 523264   ;;  %s180_s0 = smov [#allocation2]  }
   0x6   :  { %136 = vmatpush3.bf16.msra.mxu0 %v151_v2  ;;  %v21_v9 = vadd.bf16 %v19_v7, %v17_v5  ;;  %s111_s28 = sshll.u32 %s180_s0, 4  ;;  %s112_s28 = int_to_ptr.vmem [resolvable:$true] %s111_s28 }
   0x7   :  { %137 = vmatprep.subr.bf16.mxu0 %v178_v1  ;;  %s154_s1 = scalar_lea.vmem %s112_s28, 256  ;;  %p159_p1 = scmp.lt.s32.totalorder %s112_s28, %s112_s28 }
   0x8   :  { %v122_v11 = vcombine.low %v20_v8, %v21_v9  ;;  %p155_p0 = scmp.ne.s32.totalorder %s112_s28, %s154_s1  ;;  %p160_p2 = scmp.lt.s32.totalorder %s154_s1, %s154_s1 }
   0xa   :  { %138 = vmatpush3.bf16.msra.mxu0 %v152_v3  ;;  %p161_p3 = por %p160_p2, %p159_p1 }
   0xb   :  { %139 = vmatprep.subr.bf16.mxu0 %v178_v1 }
   0xc   :  { %p162_p4 = pnand %p161_p3, %p155_p0 }
   0xe   :  { %140 = vmatpush3.bf16.msra.mxu0 %v153_v10 }
  0x11   :  { %142 = vmatmul.mubr.msk.bf16.vlgmr.msra.gmra.mrb[0].mxu0 %vm59_vm1, %v122_v11 }
  0xe4   :  { %v97_v12 = vpop.f32.mrb[0].mxu0 }
  0xe5   :  { %104 = vst [vmem:[#allocation2] sm:$0xff] %v97_v12  ;;  %v143_v13 = vpop.f32.mrb[1].mxu0 }
  0xe6   :  { %v100_v14 = vpop.f32.mrb[2].mxu0 }
  0xe7   :  { %105 = vst [vmem:[#allocation2 + $0x8] sm:$0xff] %v100_v14  ;;  %v144_v15 = vpop.f32.mrb[3].mxu0 }
  0xe8   :  { %165 = shalt.err (!%p162_p4)
}
  0xe9   :  { %s166_s30 = scalar_lea.hbm %s242_s3, 256 }
  0xea   :  { %p167_p5 = scmp.ne.s32.totalorder %s242_s3, %s166_s30  ;;  %p170_p6 = scmp.lt.u32.totalorder %s166_s30, %s242_s3 }
  0xec   :  { %p172_p7 = pnand %p170_p6, %p167_p5 }
  0xee   :  { %175 = shalt.err (!%p172_p7)
}
  0xef   :  { %s181_s8 = smov 128   ;;  %s182_s9 = smov 8  }
  0xf0   :  { %117 = dma.vmem_to_hbm [thread:$0]  %s112_s28, 256, %s242_s3, [#allocation3], %s181_s8, %s181_s8, %s182_s9  }
  0xf1   :  { %176 = dma.done.wait [#allocation3], 256  }
  0xf2   :  { %177 = vsyncadd [#allocation3], 4294967040 }
  0xf3   :  { %121 = vsyncpa [#allocation3], 1 }

// kernel: student_grafomer_forward.40
= control target key start
LH: loop header
LB: loop body
LE: loop exit
PB: predicated region body
PF: predicated region fallthrough
CT: control target
= control target key end

     0   :  { %vm31_vm0 = vcmask 523264   ;;  %v430_v0 = vmov 0.0   ;;  %vm431_vm1 = vmmov 0   ;;  %vm328_vm2 = vcmask 519168   ;;  %s541_s1 = inlined_call_operand.vmem [shape: bf16[64,128], index: 1, kind: input, shape index: {}]   ;;  %s542_s0 = inlined_call_operand.vmem [shape: bf16[16,64], index: 0, kind: input, shape index: {}]   ;;  %s543_s3 = inlined_call_operand.vmem [shape: bf16[128,64], index: 3, kind: input, shape index: {}]   ;;  %s544_s2 = inlined_call_operand.vmem [shape: f32[1,128], index: 2, kind: input, shape index: {}]   ;;  %s545_s4 = inlined_call_operand.vmem [shape: f32[1,64], index: 4, kind: input, shape index: {}]   ;;  %s546_s5 = inlined_call_operand.vmem [shape: f32[1,64], index: 5, kind: input, shape index: {}]   ;;  %s547_s6 = inlined_call_operand.vmem [shape: f32[1,64], index: 6, kind: input, shape index: {}]   ;;  %s548_s7 = inlined_call_operand.vmem [shape: bf16[16,64], index: 7, kind: output, shape index: {}]  }
   0x1   :  { %375 = vmatprep.subr.bf16.mxu0 %v430_v0  ;;  %v409_v1 = vld [vmem:[%s541_s1] sm:$0xff]   ;;  %383 = vmatprep.mubr.msk.bf16.mxu0 %vm431_vm1, %v430_v0  ;;  %32 = vst.msk [vmem:[#allocation2] sm:$0xff] %vm31_vm0, %v430_v0  ;;  %33 = vst.msk [vmem:[#allocation2 + $0x8] sm:$0xff] %vm31_vm0, %v430_v0  ;;  %v410_v2 = vld [vmem:[%s541_s1 + $0x8] sm:$0xff]  }
   0x2   :  { %387 = vmatprep.subr.bf16.mxu1 %v430_v0  ;;  %403 = vmatprep.mubr.msk.bf16.mxu1 %vm431_vm1, %v430_v0  ;;  %v411_v3 = vld [vmem:[%s541_s1 + $0x10] sm:$0xff]   ;;  %v412_v4 = vld [vmem:[%s541_s1 + $0x18] sm:$0xff]   ;;  %v413_v5 = vld [vmem:[%s542_s0] sm:$0xff]  }
   0x3   :  { %376 = vmatpush3.bf16.msra.mxu0 %v409_v1  ;;  %v414_v6 = vld [vmem:[%s543_s3] sm:$0xff]   ;;  %v415_v7 = vld [vmem:[%s543_s3 + $0x8] sm:$0xff]   ;;  %v416_v8 = vld [vmem:[%s543_s3 + $0x10] sm:$0xff]  }
   0x4   :  { %377 = vmatprep.subr.bf16.mxu0 %v430_v0  ;;  %388 = vmatpush3.bf16.msra.mxu1 %v414_v6  ;;  %v417_v9 = vld [vmem:[%s543_s3 + $0x18] sm:$0xff]   ;;  %v418_v10 = vld [vmem:[%s543_s3 + $0x20] sm:$0xff]   ;;  %v419_v11 = vld [vmem:[%s543_s3 + $0x28] sm:$0xff]  }
   0x5   :  { %389 = vmatprep.subr.bf16.mxu1 %v430_v0  ;;  %v420_v12 = vld [vmem:[%s543_s3 + $0x30] sm:$0xff]   ;;  %v421_v13 = vld [vmem:[%s543_s3 + $0x38] sm:$0xff]   ;;  %v335_v14 = vld [vmem:[%s544_s2] ss:$0 sm:$0xff] }
   0x6   :  { %v358_v48 = vld [vmem:[%s542_s0] sm:$0xff]  }
   0x7   :  { %378 = vmatpush3.bf16.msra.mxu0 %v410_v2  ;;  %v350_v49 = vld [vmem:[%s545_s4] ss:$0 sm:$0xff]  ;;  %v359_v50 = vunpack.c.l.bf16 %v358_v48  ;;  %v360_v53 = vunpack.c.h.bf16 %v358_v48 }
   0x8   :  { %379 = vmatprep.subr.bf16.mxu0 %v430_v0  ;;  %390 = vmatpush3.bf16.msra.mxu1 %v415_v7  ;;  %v143_v40 = vld [vmem:[#allocation2] sm:$0xff]  ;;  %v144_v42 = vld [vmem:[#allocation2 + $0x8] sm:$0xff] }
   0x9   :  { %391 = vmatprep.subr.bf16.mxu1 %v430_v0 }
   0xb   :  { %380 = vmatpush3.bf16.msra.mxu0 %v411_v3 }
   0xc   :  { %381 = vmatprep.subr.bf16.mxu0 %v430_v0  ;;  %392 = vmatpush3.bf16.msra.mxu1 %v416_v8 }
   0xd   :  { %393 = vmatprep.subr.bf16.mxu1 %v430_v0 }
   0xf   :  { %382 = vmatpush3.bf16.msra.mxu0 %v412_v4 }
  0x10   :  { %394 = vmatpush3.bf16.msra.mxu1 %v417_v9 }
  0x11   :  { %395 = vmatprep.subr.bf16.mxu1 %v430_v0 }
  0x12   :  { %384 = vmatmul.mubr.msk.bf16.vlgmr.msra.gmra.mrb[0].mxu0 %vm31_vm0, %v413_v5 }
  0x14   :  { %396 = vmatpush3.bf16.msra.mxu1 %v418_v10 }
  0x15   :  { %397 = vmatprep.subr.bf16.mxu1 %v430_v0 }
  0x18   :  { %398 = vmatpush3.bf16.msra.mxu1 %v419_v11 }
  0x19   :  { %399 = vmatprep.subr.bf16.mxu1 %v430_v0 }
  0x1c   :  { %400 = vmatpush3.bf16.msra.mxu1 %v420_v12 }
  0x1d   :  { %401 = vmatprep.subr.bf16.mxu1 %v430_v0 }
  0x20   :  { %402 = vmatpush3.bf16.msra.mxu1 %v421_v13  ;;  %v351_v13 = vld [vmem:[%s546_s5] ss:$0 sm:$0xff] }
  0xe5   :  { %v118_v15 = vpop.f32.mrb[0].mxu0 }
  0xe6   :  { %v119_v16 = vadd.f32 %v335_v14, %v118_v15  ;;  %v385_v17 = vpop.f32.mrb[1].mxu0  ;;  %v352_v15 = vld [vmem:[%s547_s6] ss:$0 sm:$0xff] }
  0xe7   :  { %v121_v18 = vpop.f32.mrb[2].mxu0 }
  0xe8   :  { %v125_v19 = vmul.f32 %v119_v16, %v119_v16  ;;  %v122_v20 = vadd.f32 %v335_v14, %v121_v18  ;;  %v386_v21 = vpop.f32.mrb[3].mxu0 }
  0xea   :  { %v127_v22 = vmul.f32 %v125_v19, %v119_v16  ;;  %v126_v23 = vmul.f32 %v122_v20, %v122_v20 }
  0xec   :  { %v129_v24 = vmul.f32 0.044715, %v127_v22  ;;  %v128_v25 = vmul.f32 %v126_v23, %v122_v20 }
  0xee   :  { %v131_v26 = vadd.f32 %v129_v24, %v119_v16  ;;  %v130_v27 = vmul.f32 0.044715, %v128_v25 }
  0xf0   :  { %v133_v28 = vmul.f32 0.7978846, %v131_v26  ;;  %v132_v29 = vadd.f32 %v130_v27, %v122_v20 }
  0xf2   :  { %422 = vtanh.f32 %v133_v28  ;;  %v134_v30 = vmul.f32 0.7978846, %v132_v29 }
  0xf4   :  { %424 = vtanh.f32 %v134_v30 }
  0xfc   :  { %v423_v31 = vpop.eup %422 }
  0xfd   :  { %v137_v32 = vadd.f32 1.0, %v423_v31 }
  0xfe   :  { %v425_v33 = vpop.eup %424 }
  0xff   :  { %v138_v34 = vadd.f32 1.0, %v425_v33  ;;  %v139_v35 = vmul.f32 0.5, %v137_v32 }
 0x101   :  { %v140_v36 = vmul.f32 0.5, %v138_v34  ;;  %v141_v37 = vmul.f32 %v139_v35, %v119_v16 }
 0x103   :  { %v142_v38 = vmul.f32 %v140_v36, %v122_v20 }
 0x105   :  { %v145_v39 = vpack.c.bf16 %v142_v38, %v141_v37 }
 0x107   :  { %404 = vmatmul.mubr.bf16.vlgmr.msra.gmra.mrb[0].mxu1 %v145_v39 }
 0x1da   :  { %v244_v41 = vpop.f32.mrb[0].mxu1 }
 0x1db   :  { %v251_v43 = vadd.f32 %v244_v41, %v143_v40  ;;  %v405_v44 = vpop.f32.mrb[1].mxu1 }
 0x1dc   :  { %v247_v45 = vpop.f32.mrb[2].mxu1 }
 0x1dd   :  { %253 = vst.msk [vmem:[#allocation2] sm:$0xff] %vm31_vm0, %v251_v43  ;;  %v252_v46 = vadd.f32 %v247_v45, %v144_v42  ;;  %v406_v47 = vpop.f32.mrb[3].mxu1 }
 0x1df   :  { %254 = vst.msk [vmem:[#allocation2 + $0x8] sm:$0xff] %vm31_vm0, %v252_v46 }
 0x1e4   :  { %v258_v51 = vld [vmem:[#allocation2] sm:$0xff] }
 0x1e5   :  { %v267_v52 = vadd.f32 %v350_v49, %v258_v51 }
 0x1e6   :  { %v259_v54 = vld [vmem:[#allocation2 + $0x8] sm:$0xff] }
 0x1e7   :  { %v273_v55 = vadd.f32 %v359_v50, %v267_v52  ;;  %v268_v56 = vadd.f32 %v350_v49, %v259_v54 }
 0x1e9   :  { %v275_v57 = vsel %vm31_vm0, %v273_v55, 0.0  ;;  %v274_v58 = vadd.f32 %v360_v53, %v268_v56 }
 0x1ea   :  { %276 = vadd.xlane.f32.xlu0 %v275_v57 }
 0x1eb   :  { %v278_v59 = vsel %vm31_vm0, %v274_v58, 0.0 }
 0x1ee   :  { %279 = vadd.xlane.f32.xlu0 %v278_v59 }
 0x277   :  { %v277_v60 = vpop.xlane.xlu0 %276 }
 0x278   :  { %v282_v61 = vmul.f32 0.015625, %v277_v60 }
 0x27a   :  { %v284_v62 = vsub.f32 %v273_v55, %v282_v61 }
 0x27b   :  { %v280_v63 = vpop.xlane.xlu0 %279 }
 0x27c   :  { %v283_v0 = vmul.f32 0.015625, %v280_v63  ;;  %v286_v1 = vmul.f32 %v284_v62, %v284_v62 }
 0x27e   :  { %v285_v2 = vsub.f32 %v274_v58, %v283_v0  ;;  %v288_v3 = vsel %vm31_vm0, %v286_v1, 0.0 }
 0x27f   :  { %289 = vadd.xlane.f32.xlu1 %v288_v3 }
 0x280   :  { %v287_v4 = vmul.f32 %v285_v2, %v285_v2 }
 0x282   :  { %v291_v5 = vsel %vm31_vm0, %v287_v4, 0.0 }
 0x283   :  { %292 = vadd.xlane.f32.xlu1 %v291_v5 }
 0x30c   :  { %v290_v6 = vpop.xlane.xlu1 %289 }
 0x30d   :  { %v294_v7 = vmul.f32 0.015625, %v290_v6 }
 0x30f   :  { %v296_v8 = vadd.f32 1e-05, %v294_v7 }
 0x310   :  { %v293_v9 = vpop.xlane.xlu1 %292 }
 0x311   :  { %426 = vrsqrt.f32 %v296_v8  ;;  %v295_v10 = vmul.f32 0.015625, %v293_v9 }
 0x313   :  { %v297_v11 = vadd.f32 1e-05, %v295_v10 }
 0x315   :  { %428 = vrsqrt.f32 %v297_v11 }
 0x31b   :  { %v427_v12 = vpop.eup %426 }
 0x31c   :  { %v300_v14 = vmul.f32 %v427_v12, %v284_v62 }
 0x31e   :  { %v309_v16 = vmul.f32 %v351_v13, %v300_v14 }
 0x31f   :  { %v429_v17 = vpop.eup %428 }
 0x320   :  { %v318_v18 = vadd.f32 %v352_v15, %v309_v16  ;;  %v301_v19 = vmul.f32 %v429_v17, %v285_v2 }
 0x322   :  { %v355_v20 = vpack.c.bf16 %v318_v18, %v318_v18  ;;  %v310_v21 = vmul.f32 %v351_v13, %v301_v19 }
 0x324   :  { %329 = vst.msk [vmem:[%s548_s7] sm:$0xf] %vm328_vm2, %v355_v20  ;;  %v319_v22 = vadd.f32 %v352_v15, %v310_v21 }
 0x326   :  { %v356_v23 = vpack.c.bf16 %v319_v22, %v319_v22 }
 0x328   :  { %330 = vst.msk [vmem:[%s548_s7 + $0x4] sm:$0xf] %vm328_vm2, %v356_v23 }

</bundles_post_ra>
